<compile_context>
chip_gen: v5e
topology: v5e:2x2
jax: 0.10.0
libtpu: 0.0.40
codegen_flags: <defaults>
</compile_context>

<pallas_src>
from functools import partial

import jax
import jax.numpy as jnp
from jax.experimental import pallas as pl
from jax.experimental.pallas import tpu as pltpu


def _round_up(x, m):
    return (x + m - 1) // m * m


def _vmem_limit_bytes():
    """Generation-aware scoped-VMEM request (v5e/v6e: 64 MiB, v7x: 48 MiB)."""
    try:
        cap = int(pltpu.get_tpu_info().vmem_capacity_bytes)
    except Exception:
        cap = 64 * 1024 * 1024  # conservative (v7x-sized) default
    return min(64 * 1024 * 1024, cap * 3 // 4)


def _divisors(n):
    return [d for d in range(1, n + 1) if n % d == 0]


def _pick_rows(m, bytes_per_row, budget, prefer_split=True):
    """Largest multiple-of-8 divisor of m whose per-step footprint fits budget.

    prefer_split keeps >=2 blocks when possible so a 'parallel' grid axis can be
    sharded across the two v7x TensorCores.
    """
    cap = max(8, budget // max(1, bytes_per_row))
    cap = min(cap, m)
    if prefer_split and m >= 16:
        cap = min(cap, max(8, m // 2))
    cap = max(8, (cap // 8) * 8)
    for t in range(cap, 7, -1):
        if m % t == 0 and t % 8 == 0:
            return t
    # Fallback: a single full-extent block (always a legal block shape); only
    # reachable for small / oddly-sized m where it also fits comfortably.
    return m


# ----------------------------------------------------------------------------
# Kernel 1: fused matmul (1x1 conv) + folded-BN scale/bias + optional ReLU.
# ----------------------------------------------------------------------------
def _matmul_bn_act_kernel(x_ref, w_ref, s_ref, b_ref, o_ref, *, relu):
    acc = jnp.dot(x_ref[...], w_ref[...], preferred_element_type=jnp.float32)
    y = acc * s_ref[...] + b_ref[...]
    if relu:
        y = jnp.maximum(y, 0.0)
    o_ref[...] = y.astype(o_ref.dtype)


def matmul_bn_act(x, w, scale, bias, *, relu, vmem_limit):
    M, K = x.shape
    K2, N = w.shape
    assert K == K2
    per_row = 4 * K + 8 * N  # double-buffered bf16 in/out + f32 accumulator
    tm = _pick_rows(M, per_row, vmem_limit // 3)
    return pl.pallas_call(
        partial(_matmul_bn_act_kernel, relu=relu),
        out_shape=jax.ShapeDtypeStruct((M, N), jnp.bfloat16),
        grid=(M // tm,),
        in_specs=[
            pl.BlockSpec((tm, K), lambda i: (i, 0)),
            pl.BlockSpec((K, N), lambda i: (0, 0)),
            pl.BlockSpec((1, N), lambda i: (0, 0)),
            pl.BlockSpec((1, N), lambda i: (0, 0)),
        ],
        out_specs=pl.BlockSpec((tm, N), lambda i: (i, 0)),
        compiler_params=pltpu.CompilerParams(
            dimension_semantics=("parallel",),
            vmem_limit_bytes=vmem_limit),
    )(x, w, scale, bias)


# ----------------------------------------------------------------------------
# Kernel 2: 3x3 conv (stride 1, pad 1) + BN + ReLU.
#
# Dense (B, H*W, C) in, dense (B, H*W, N) out.  Per grid step (b, g) the kernel
# copies the hr-row tile (plus 1-row halo on each side) of the full image --
# which stays resident in VMEM per batch thanks to the constant index map --
# into a zero-padded VMEM scratch of width Wp (multiple of 8), then runs 3
# accumulated matmuls (kw taps) with the 3 kh taps packed along K (K = 3*C).
# ----------------------------------------------------------------------------
def _conv3x3_bn_relu_kernel(x_ref, w_ref, s_ref, b_ref, o_ref, scr_ref,
                            *, H, W, Wp, hr):
    g = pl.program_id(1)

    # Zero-padded local window: hr + 4 rows of width Wp.
    #   row 0 / row hr+3        : guard rows (read only by discarded seam cols)
    #   row lr+1 (lr=0..hr+1)   : image row g*hr + lr - 1 at cols [2, W+2)
    scr_ref[...] = jnp.zeros_like(scr_ref)
    for lr in range(hr + 2):
        row = g * hr + lr - 1

        def cp(row=row, lr=lr):
            scr_ref[pl.ds((lr + 1) * Wp + 2, W), :] = x_ref[0, pl.ds(row * W, W), :]

        if lr == 0 or lr == hr + 1:          # only halo rows can be out of range
            pl.when((row >= 0) & (row < H))(cp)
        else:
            cp()

    # 3 matmuls (one per kw), kh taps packed along the contraction dim.
    L = hr * Wp
    acc = None
    for kw in range(3):
        lhs = jnp.concatenate(
            [scr_ref[pl.ds((kh + 1) * Wp + (kw - 1), L), :] for kh in range(3)],
            axis=-1)                                     # (L, 3*C)
        part = jnp.dot(lhs, w_ref[kw], preferred_element_type=jnp.float32)
        acc = part if acc is None else acc + part

    y = jnp.maximum(acc * s_ref[...] + b_ref[...], 0.0)   # (L, N)
    # drop the left pad (2 cols) / right pad columns -> dense (hr*W, N)
    y = y.reshape(hr, Wp, -1)[:, 2:2 + W, :].reshape(hr * W, -1)
    o_ref[0] = y.astype(o_ref.dtype)


def _pick_conv2_rows(H, W, Wp, C, N, budget):
    cands = [hr for hr in _divisors(H)
             if ((hr * W) % 8 == 0 or hr == H) and hr * Wp <= 2048]
    if not cands:
        cands = [H]

    def need(hr):
        return ((hr + 4) * Wp * C * 2          # scratch (bf16)
                + hr * Wp * N * 4              # f32 accumulator
                + 2 * hr * W * N * 2           # double-buffered output block
                + 2 * H * W * C * 2            # double-buffered full-image input
                + 2 * 3 * 3 * C * N * 2)       # weights

    fit = [hr for hr in cands if need(hr) <= budget]
    pool = fit if fit else [min(cands)]
    multi = [hr for hr in pool if H // hr >= 2]   # keep >=2 blocks for megacore
    return max(multi) if multi else max(pool)


def conv3x3_bn_relu(x, w2p, scale, bias, *, H, W, vmem_limit):
    # x: (B, H*W, C) dense bf16 conv1 output.  w2p: (3, 3*C, N).
    B, HW, C = x.shape
    assert HW == H * W
    N = w2p.shape[-1]
    Wp = _round_up(W + 3, 8)                      # 8-aligned padded row stride
    hr = _pick_conv2_rows(H, W, Wp, C, N, vmem_limit // 2)
    return pl.pallas_call(
        partial(_conv3x3_bn_relu_kernel, H=H, W=W, Wp=Wp, hr=hr),
        out_shape=jax.ShapeDtypeStruct((B, HW, N), jnp.bfloat16),
        grid=(B, H // hr),
        in_specs=[
            # full image, constant row-group index -> DMA'd once per batch
            pl.BlockSpec((1, HW, C), lambda b, g: (b, 0, 0)),
            pl.BlockSpec(w2p.shape, lambda b, g: (0, 0, 0)),
            pl.BlockSpec((1, N), lambda b, g: (0, 0)),
            pl.BlockSpec((1, N), lambda b, g: (0, 0)),
        ],
        out_specs=pl.BlockSpec((1, hr * W, N), lambda b, g: (b, g, 0)),
        scratch_shapes=[pltpu.VMEM(((hr + 4) * Wp, C), jnp.bfloat16)],
        compiler_params=pltpu.CompilerParams(
            dimension_semantics=("parallel", "parallel"),
            vmem_limit_bytes=vmem_limit),
    )(x, w2p, scale, bias)


# ----------------------------------------------------------------------------
# Kernel 3: 1x1 conv (conv3) + BN, with the SE global-average-pool channel sums
# fused into the epilogue (accumulated across the HW grid axis).
# ----------------------------------------------------------------------------
def _conv1x1_bn_pool_kernel(x_ref, w_ref, s_ref, b_ref, o_ref, pool_ref):
    acc = jnp.dot(x_ref[0], w_ref[...], preferred_element_type=jnp.float32)
    y = acc * s_ref[...] + b_ref[...]
    o_ref[0] = y.astype(o_ref.dtype)

    @pl.when(pl.program_id(1) == 0)
    def _():
        pool_ref[...] = jnp.zeros_like(pool_ref)

    pool_ref[0] += jnp.sum(y, axis=0, keepdims=True)


def conv1x1_bn_pool(x, w, scale, bias, *, vmem_limit):
    # x: (B, HW, K) -> y: (B, HW, N) bf16 and channel sums: (B, 1, N) f32
    B, HW, K = x.shape
    K2, N = w.shape
    assert K == K2
    per_row = 4 * K + 8 * N
    thw = _pick_rows(HW, per_row, vmem_limit // 3)
    return pl.pallas_call(
        _conv1x1_bn_pool_kernel,
        out_shape=(jax.ShapeDtypeStruct((B, HW, N), jnp.bfloat16),
                   jax.ShapeDtypeStruct((B, 1, N), jnp.float32)),
        grid=(B, HW // thw),
        in_specs=[
            pl.BlockSpec((1, thw, K), lambda b, h: (b, h, 0)),
            pl.BlockSpec((K, N), lambda b, h: (0, 0)),
            pl.BlockSpec((1, N), lambda b, h: (0, 0)),
            pl.BlockSpec((1, N), lambda b, h: (0, 0)),
        ],
        out_specs=(pl.BlockSpec((1, thw, N), lambda b, h: (b, h, 0)),
                   pl.BlockSpec((1, 1, N), lambda b, h: (b, 0, 0))),
        compiler_params=pltpu.CompilerParams(
            dimension_semantics=("parallel", "arbitrary"),
            vmem_limit_bytes=vmem_limit),
    )(x, w, scale, bias)


# ----------------------------------------------------------------------------
# Kernel 4: SE per-channel rescale + residual add + final ReLU (elementwise).
# Writes bf16 and fuses the channel un-padding slice (cout lanes).
# ----------------------------------------------------------------------------
def _se_scale_res_relu_kernel(y_ref, r_ref, s_ref, o_ref, *, cout):
    y = y_ref[0].astype(jnp.float32)
    r = r_ref[0].astype(jnp.float32)
    out = jnp.maximum(y * s_ref[0] + r, 0.0)
    o_ref[0] = out[:, :cout].astype(o_ref.dtype)


def se_scale_res_relu(y, res, s, *, cout, vmem_limit):
    B, HW, C = y.shape
    assert res.shape == (B, HW, C) and s.shape == (B, 1, C)
    per_row = 20 * C + 4 * cout
    thw = _pick_rows(HW, per_row, vmem_limit // 3)
    return pl.pallas_call(
        partial(_se_scale_res_relu_kernel, cout=cout),
        out_shape=jax.ShapeDtypeStruct((B, HW, cout), jnp.bfloat16),
        grid=(B, HW // thw),
        in_specs=[
            pl.BlockSpec((1, thw, C), lambda b, h: (b, h, 0)),
            pl.BlockSpec((1, thw, C), lambda b, h: (b, h, 0)),
            pl.BlockSpec((1, 1, C), lambda b, h: (b, 0, 0)),
        ],
        out_specs=pl.BlockSpec((1, thw, cout), lambda b, h: (b, h, 0)),
        compiler_params=pltpu.CompilerParams(
            dimension_semantics=("parallel", "parallel"),
            vmem_limit_bytes=vmem_limit),
    )(y, res, s)


# ----------------------------------------------------------------------------
# Forward wrapper.  Only remaining XLA layout work: the NCHW->NHWC channel-pad
# cast of the input and the single NHWC->NCHW transpose (with f32 cast) of the
# output -- both unavoidable for a standalone NCHW module.
# ----------------------------------------------------------------------------
def se_bottleneck_forward(x_nchw, params):
    B, Cin, H, W = x_nchw.shape
    Cin_p, Pp = params["w1"].shape
    C4p = params["w3"].shape[1]
    # downsample is None => residual add requires inplanes == planes*4
    assert Cin_p == C4p

    vmem_limit = _vmem_limit_bytes()

    # NCHW -> NHWC, pad channels to a lane-dense multiple of 128, cast bf16.
    x = jnp.transpose(x_nchw, (0, 2, 3, 1))
    x_p = jnp.pad(x, ((0, 0), (0, 0), (0, 0), (0, Cin_p - Cin))).astype(jnp.bfloat16)

    # conv1 (1x1) + bn1 + relu   -> dense (B, H*W, Pp) bf16
    h1 = matmul_bn_act(x_p.reshape(B * H * W, Cin_p),
                       params["w1"], params["s1"], params["b1"],
                       relu=True, vmem_limit=vmem_limit)
    h1 = h1.reshape(B, H * W, Pp)

    # conv2 (3x3) + bn2 + relu   -> dense (B, H*W, Pp) bf16 (no XLA pad/slice)
    h2 = conv3x3_bn_relu(h1, params["w2"], params["s2"], params["b2"],
                         H=H, W=W, vmem_limit=vmem_limit)

    # conv3 (1x1) + bn3 (no relu), SE channel sums fused into the same pass.
    y3, pool_sum = conv1x1_bn_pool(h2, params["w3"], params["s3"], params["b3"],
                                   vmem_limit=vmem_limit)

    # SE FC (tiny: B x C x C/16 FLOPs) in plain XLA.
    pool = pool_sum[:, 0, :] / float(H * W)
    z = jnp.maximum(pool @ params["fc1"], 0.0)
    s = jax.nn.sigmoid(z @ params["fc2"])              # (B, C4p)

    # SE rescale + residual + final ReLU; bf16 out with fused channel slice.
    res = x_p.reshape(B, H * W, Cin_p)
    out = se_scale_res_relu(y3, res, s[:, None, :], cout=Cin,
                            vmem_limit=vmem_limit)

    out = out.reshape(B, H, W, Cin).astype(jnp.float32)
    return jnp.transpose(out, (0, 3, 1, 2))            # back to NCHW


# ----------------------------------------------------------------------------
# Deterministic parameter init (shapes follow the PyTorch module __init__).
# Kernel params are channel-padded to multiples of 128 and stored bf16;
# raw f32 copies are kept for the pure-JAX reference.
# ----------------------------------------------------------------------------
def init_params(key, inplanes, planes, reduction=16):
    C4 = planes * 4
    hidden = max(C4 // reduction, 1)
    Cin_p = _round_up(inplanes, 128)
    Pp = _round_up(planes, 128)
    C4p = _round_up(C4, 128)
    ks = jax.random.split(key, 17)

    def u(k, shape, s=0.3):
        return jax.random.uniform(k, shape, jnp.float32, -s, s)

    # PyTorch-layout weights
    w1_t = u(ks[0], (planes, inplanes, 1, 1))
    w2_t = u(ks[1], (planes, planes, 3, 3))
    w3_t = u(ks[2], (C4, planes, 1, 1))
    fc1_t = u(ks[3], (hidden, C4))
    fc2_t = u(ks[4], (C4, hidden))

    def bn_fold(kg, kb, km, kv, c):
        gamma = 1.0 + u(kg, (c,), 0.1)
        beta = u(kb, (c,), 0.1)
        mean = u(km, (c,), 0.1)
        var = 1.0 + u(kv, (c,), 0.1)
        eps = 1e-5
        scale = gamma / jnp.sqrt(var + eps)
        bias = beta - mean * scale
        return scale, bias

    s1, b1 = bn_fold(ks[5], ks[6], ks[7], ks[8], planes)
    s2, b2 = bn_fold(ks[9], ks[10], ks[11], ks[12], planes)
    s3, b3 = bn_fold(ks[13], ks[14], ks[15], ks[16], C4)

    def pad2(a, r, c):
        return jnp.pad(a, ((0, r - a.shape[0]), (0, c - a.shape[1])))

    def pad_vec(v, c):
        return jnp.pad(v, (0, c - v.shape[0])).reshape(1, c)

    w1 = pad2(w1_t[:, :, 0, 0].T, Cin_p, Pp).astype(jnp.bfloat16)

    # conv2 weights packed for the kh-along-K layout: w2[kw][kh*Pp + i, o]
    w2_hwio = jnp.transpose(w2_t, (2, 3, 1, 0))                  # (kh, kw, in, out)
    w2_hwio = jnp.pad(w2_hwio, ((0, 0), (0, 0),
                                (0, Pp - planes), (0, Pp - planes)))
    w2 = jnp.transpose(w2_hwio, (1, 0, 2, 3)).reshape(3, 3 * Pp, Pp)
    w2 = w2.astype(jnp.bfloat16)

    w3 = pad2(w3_t[:, :, 0, 0].T, Pp, C4p).astype(jnp.bfloat16)
    fc1 = pad2(fc1_t.T, C4p, hidden)          # f32 (used in XLA)
    fc2 = pad2(fc2_t.T, hidden, C4p)

    return {
        "w1": w1, "w2": w2, "w3": w3, "fc1": fc1, "fc2": fc2,
        "s1": pad_vec(s1, Pp), "b1": pad_vec(b1, Pp),
        "s2": pad_vec(s2, Pp), "b2": pad_vec(b2, Pp),
        "s3": pad_vec(s3, C4p), "b3": pad_vec(b3, C4p),
        "_ref": {
            "w1": w1_t[:, :, 0, 0].T, "w2_t": w2_t, "w3": w3_t[:, :, 0, 0].T,
            "fc1": fc1_t.T, "fc2": fc2_t.T,
            "s1": s1, "b1": b1, "s2": s2, "b2": b2, "s3": s3, "b3": b3,
        },
    }


# ----------------------------------------------------------------------------
# Pure-JAX f32 reference (lax.conv in NCHW) for the correctness check.
# ----------------------------------------------------------------------------
def reference_forward(x, params):
    p = params["_ref"]

    def conv1x1(h, w_mat):
        B, C, H, W = h.shape
        hc = jnp.transpose(h, (0, 2, 3, 1)).reshape(-1, C) @ w_mat
        return jnp.transpose(hc.reshape(B, H, W, -1), (0, 3, 1, 2))

    def bn(h, s, b):
        return h * s[None, :, None, None] + b[None, :, None, None]

    out = jax.nn.relu(bn(conv1x1(x, p["w1"]), p["s1"], p["b1"]))
    out = jax.lax.conv_general_dilated(
        out, p["w2_t"], window_strides=(1, 1), padding=((1, 1), (1, 1)),
        dimension_numbers=("NCHW", "OIHW", "NCHW"))
    out = jax.nn.relu(bn(out, p["s2"], p["b2"]))
    out = bn(conv1x1(out, p["w3"]), p["s3"], p["b3"])
    pool = jnp.mean(out, axis=(2, 3))
    s = jax.nn.sigmoid(jax.nn.relu(pool @ p["fc1"]) @ p["fc2"])
    out = out * s[:, :, None, None] + x
    return jax.nn.relu(out)


if __name__ == "__main__":
    inplanes, planes, reduction = 16, 4, 16   # planes*4 == inplanes (downsample=None)
    B, H, W = 2, 16, 16

    key = jax.random.PRNGKey(0)
    kx, kp = jax.random.split(key)
    x = jax.random.uniform(kx, (B, inplanes, H, W), jnp.float32, -1.0, 1.0)
    params = init_params(kp, inplanes, planes, reduction)

    out = jax.jit(se_bottleneck_forward)(x, params)
    out = jax.block_until_ready(out)

    ref = reference_forward(x, params)
    assert out.shape == (B, planes * 4, H, W)
    # bf16 MXU inputs / bf16 intermediates => slightly looser tolerance vs f32 ref
    assert jnp.allclose(out, ref, atol=5e-2, rtol=5e-2), "mismatch vs reference"

    print("KERNEL_OK")
</pallas_src>

<mosaic_0001>
module attributes {stable_mosaic.version = 11 : i64} {
  func.func @_matmul_bn_act_kernel(%arg0: i32, %arg1: memref<256x128xbf16, #tpu.memory_space<vmem>>, %arg2: memref<128x128xbf16, #tpu.memory_space<vmem>>, %arg3: memref<1x128xf32, #tpu.memory_space<vmem>>, %arg4: memref<1x128xf32, #tpu.memory_space<vmem>>, %arg5: memref<256x128xbf16, #tpu.memory_space<vmem>>) attributes {dimension_semantics = [#tpu.dimension_semantics<parallel>], iteration_bounds = array<i64: 2>, scalar_prefetch = 0 : i64, scratch_operands = 0 : i64, tpu.core_type = #tpu.core_type<tc>, window_params = [{transform_indices = @transform_0, window_bounds = array<i64: 256, 128>}, {pipeline_mode = #tpu.pipeline_mode<synchronous>, transform_indices = @transform_1, window_bounds = array<i64: 128, 128>}, {pipeline_mode = #tpu.pipeline_mode<synchronous>, transform_indices = @transform_2, window_bounds = array<i64: 1, 128>}, {pipeline_mode = #tpu.pipeline_mode<synchronous>, transform_indices = @transform_3, window_bounds = array<i64: 1, 128>}, {transform_indices = @transform_4, window_bounds = array<i64: 256, 128>}]} {
    %c0 = arith.constant 0 : index
    %c0_0 = arith.constant 0 : index
    %0 = vector.load %arg1[%c0, %c0_0] : memref<256x128xbf16, #tpu.memory_space<vmem>>, vector<256x128xbf16>
    %c0_1 = arith.constant 0 : index
    %c0_2 = arith.constant 0 : index
    %1 = vector.load %arg2[%c0_1, %c0_2] : memref<128x128xbf16, #tpu.memory_space<vmem>>, vector<128x128xbf16>
    %cst = arith.constant dense<0.000000e+00> : vector<256x128xf32>
    %2 = tpu.matmul %0, %1, %cst {dimension_numbers = #tpu.dot_dimension_numbers<[1], [0], [0], [1], [0, 0, 1, 1], [], []>} : vector<256x128xbf16>, vector<128x128xbf16>, vector<256x128xf32> -> vector<256x128xf32>
    %c0_3 = arith.constant 0 : index
    %c0_4 = arith.constant 0 : index
    %3 = vector.load %arg3[%c0_3, %c0_4] : memref<1x128xf32, #tpu.memory_space<vmem>>, vector<1x128xf32>
    %4 = vector.broadcast %3 : vector<1x128xf32> to vector<256x128xf32>
    %5 = arith.mulf %2, %4 : vector<256x128xf32>
    %c0_5 = arith.constant 0 : index
    %c0_6 = arith.constant 0 : index
    %6 = vector.load %arg4[%c0_5, %c0_6] : memref<1x128xf32, #tpu.memory_space<vmem>>, vector<1x128xf32>
    %7 = vector.broadcast %6 : vector<1x128xf32> to vector<256x128xf32>
    %8 = arith.addf %5, %7 : vector<256x128xf32>
    %cst_7 = arith.constant 0.000000e+00 : f32
    %9 = vector.broadcast %cst_7 : f32 to vector<256x128xf32>
    %10 = arith.maximumf %8, %9 : vector<256x128xf32>
    %11 = arith.truncf %10 : vector<256x128xf32> to vector<256x128xbf16>
    %c0_8 = arith.constant 0 : index
    %c0_9 = arith.constant 0 : index
    %12 = vector.load %arg5[%c0_8, %c0_9] : memref<256x128xbf16, #tpu.memory_space<vmem>>, vector<256x128xbf16>
    tpu.vector_store %arg5[%c0_8, %c0_9], %11 {strides = array<i32>} : memref<256x128xbf16, #tpu.memory_space<vmem>>, vector<256x128xbf16>,
    return
  }
  func.func @transform_0(%arg0: i32) -> (i32, i32) {
    %c0_i32 = arith.constant 0 : i32
    %c0_i32_0 = arith.constant 0 : i32
    return %arg0, %c0_i32 : i32, i32
  }
  func.func @transform_1(%arg0: i32) -> (i32, i32) {
    %c0_i32 = arith.constant 0 : i32
    %c0_i32_0 = arith.constant 0 : i32
    %c0_i32_1 = arith.constant 0 : i32
    return %c0_i32, %c0_i32_0 : i32, i32
  }
  func.func @transform_2(%arg0: i32) -> (i32, i32) {
    %c0_i32 = arith.constant 0 : i32
    %c0_i32_0 = arith.constant 0 : i32
    %c0_i32_1 = arith.constant 0 : i32
    return %c0_i32, %c0_i32_0 : i32, i32
  }
  func.func @transform_3(%arg0: i32) -> (i32, i32) {
    %c0_i32 = arith.constant 0 : i32
    %c0_i32_0 = arith.constant 0 : i32
    %c0_i32_1 = arith.constant 0 : i32
    return %c0_i32, %c0_i32_0 : i32, i32
  }
  func.func @transform_4(%arg0: i32) -> (i32, i32) {
    %c0_i32 = arith.constant 0 : i32
    %c0_i32_0 = arith.constant 0 : i32
    return %arg0, %c0_i32 : i32, i32
  }
}

module attributes {stable_mosaic.version = 11 : i64} {
  func.func @_conv1x1_bn_pool_kernel(%arg0: i32, %arg1: i32, %arg2: memref<1x128x128xbf16, #tpu.memory_space<vmem>>, %arg3: memref<128x128xbf16, #tpu.memory_space<vmem>>, %arg4: memref<1x128xf32, #tpu.memory_space<vmem>>, %arg5: memref<1x128xf32, #tpu.memory_space<vmem>>, %arg6: memref<1x128x128xbf16, #tpu.memory_space<vmem>>, %arg7: memref<1x1x128xf32, #tpu.memory_space<vmem>>) attributes {dimension_semantics = [#tpu.dimension_semantics<parallel>, #tpu.dimension_semantics<arbitrary>], iteration_bounds = array<i64: 2, 2>, scalar_prefetch = 0 : i64, scratch_operands = 0 : i64, tpu.core_type = #tpu.core_type<tc>, window_params = [{transform_indices = @transform_0, window_bounds = array<i64: 1, 128, 128>}, {pipeline_mode = #tpu.pipeline_mode<synchronous>, transform_indices = @transform_1, window_bounds = array<i64: 128, 128>}, {pipeline_mode = #tpu.pipeline_mode<synchronous>, transform_indices = @transform_2, window_bounds = array<i64: 1, 128>}, {pipeline_mode = #tpu.pipeline_mode<synchronous>, transform_indices = @transform_3, window_bounds = array<i64: 1, 128>}, {transform_indices = @transform_4, window_bounds = array<i64: 1, 128, 128>}, {transform_indices = @transform_5, window_bounds = array<i64: 1, 1, 128>}]} {
    %c0 = arith.constant 0 : index
    %c0_0 = arith.constant 0 : index
    %c0_1 = arith.constant 0 : index
    %0 = vector.load %arg2[%c0, %c0_0, %c0_1] : memref<1x128x128xbf16, #tpu.memory_space<vmem>>, vector<1x128x128xbf16>
    %1 = vector.shape_cast %0 : vector<1x128x128xbf16> to vector<128x128xbf16>
    %c0_2 = arith.constant 0 : index
    %c0_3 = arith.constant 0 : index
    %2 = vector.load %arg3[%c0_2, %c0_3] : memref<128x128xbf16, #tpu.memory_space<vmem>>, vector<128x128xbf16>
    %cst = arith.constant dense<0.000000e+00> : vector<128x128xf32>
    %3 = tpu.matmul %1, %2, %cst {dimension_numbers = #tpu.dot_dimension_numbers<[1], [0], [0], [1], [0, 0, 1, 1], [], []>} : vector<128x128xbf16>, vector<128x128xbf16>, vector<128x128xf32> -> vector<128x128xf32>
    %c0_4 = arith.constant 0 : index
    %c0_5 = arith.constant 0 : index
    %4 = vector.load %arg4[%c0_4, %c0_5] : memref<1x128xf32, #tpu.memory_space<vmem>>, vector<1x128xf32>
    %5 = vector.broadcast %4 : vector<1x128xf32> to vector<128x128xf32>
    %6 = arith.mulf %3, %5 : vector<128x128xf32>
    %c0_6 = arith.constant 0 : index
    %c0_7 = arith.constant 0 : index
    %7 = vector.load %arg5[%c0_6, %c0_7] : memref<1x128xf32, #tpu.memory_space<vmem>>, vector<1x128xf32>
    %8 = vector.broadcast %7 : vector<1x128xf32> to vector<128x128xf32>
    %9 = arith.addf %6, %8 : vector<128x128xf32>
    %10 = arith.truncf %9 : vector<128x128xf32> to vector<128x128xbf16>
    %c0_8 = arith.constant 0 : index
    %c0_9 = arith.constant 0 : index
    %c0_10 = arith.constant 0 : index
    %11 = vector.load %arg6[%c0_8, %c0_9, %c0_10] : memref<1x128x128xbf16, #tpu.memory_space<vmem>>, vector<1x128x128xbf16>
    %12 = vector.shape_cast %11 : vector<1x128x128xbf16> to vector<128x128xbf16>
    %13 = vector.shape_cast %10 : vector<128x128xbf16> to vector<1x128x128xbf16>
    tpu.vector_store %arg6[%c0_8, %c0_9, %c0_10], %13 {strides = array<i32>} : memref<1x128x128xbf16, #tpu.memory_space<vmem>>, vector<1x128x128xbf16>,
    %c0_i32 = arith.constant 0 : i32
    %14 = arith.cmpi eq, %arg1, %c0_i32 : i32
    %15 = arith.extui %14 : i1 to i32
    %c0_i32_11 = arith.constant 0 : i32
    %16 = arith.cmpi ne, %15, %c0_i32_11 : i32
    scf.if %16 {
      %cst_19 = arith.constant 0.000000e+00 : f32
      %25 = vector.broadcast %cst_19 : f32 to vector<1x1x128xf32>
      %c0_20 = arith.constant 0 : index
      %c0_21 = arith.constant 0 : index
      %c0_22 = arith.constant 0 : index
      %26 = vector.load %arg7[%c0_20, %c0_21, %c0_22] : memref<1x1x128xf32, #tpu.memory_space<vmem>>, vector<1x1x128xf32>
      tpu.vector_store %arg7[%c0_20, %c0_21, %c0_22], %25 {strides = array<i32>} : memref<1x1x128xf32, #tpu.memory_space<vmem>>, vector<1x1x128xf32>,
    } else {
    }
    %c0_12 = arith.constant 0 : index
    %c0_13 = arith.constant 0 : index
    %c0_14 = arith.constant 0 : index
    %17 = vector.load %arg7[%c0_12, %c0_13, %c0_14] : memref<1x1x128xf32, #tpu.memory_space<vmem>>, vector<1x1x128xf32>
    %18 = vector.shape_cast %17 : vector<1x1x128xf32> to vector<1x128xf32>
    %cst_15 = arith.constant dense<0.000000e+00> : vector<128xf32>
    %19 = vector.multi_reduction <add>, %9, %cst_15 [0] : vector<128x128xf32> to vector<128xf32>
    %20 = vector.shape_cast %19 : vector<128xf32> to vector<1x128xf32>
    %21 = arith.addf %18, %20 : vector<1x128xf32>
    %c0_16 = arith.constant 0 : index
    %c0_17 = arith.constant 0 : index
    %c0_18 = arith.constant 0 : index
    %22 = vector.load %arg7[%c0_16, %c0_17, %c0_18] : memref<1x1x128xf32, #tpu.memory_space<vmem>>, vector<1x1x128xf32>
    %23 = vector.shape_cast %22 : vector<1x1x128xf32> to vector<1x128xf32>
    %24 = vector.shape_cast %21 : vector<1x128xf32> to vector<1x1x128xf32>
    tpu.vector_store %arg7[%c0_16, %c0_17, %c0_18], %24 {strides = array<i32>} : memref<1x1x128xf32, #tpu.memory_space<vmem>>, vector<1x1x128xf32>,
    return
  }
  func.func @transform_0(%arg0: i32, %arg1: i32) -> (i32, i32, i32) {
    %c0_i32 = arith.constant 0 : i32
    %c0_i32_0 = arith.constant 0 : i32
    return %arg0, %arg1, %c0_i32 : i32, i32, i32
  }
  func.func @transform_1(%arg0: i32, %arg1: i32) -> (i32, i32) {
    %c0_i32 = arith.constant 0 : i32
    %c0_i32_0 = arith.constant 0 : i32
    %c0_i32_1 = arith.constant 0 : i32
    return %c0_i32, %c0_i32_0 : i32, i32
  }
  func.func @transform_2(%arg0: i32, %arg1: i32) -> (i32, i32) {
    %c0_i32 = arith.constant 0 : i32
    %c0_i32_0 = arith.constant 0 : i32
    %c0_i32_1 = arith.constant 0 : i32
    return %c0_i32, %c0_i32_0 : i32, i32
  }
  func.func @transform_3(%arg0: i32, %arg1: i32) -> (i32, i32) {
    %c0_i32 = arith.constant 0 : i32
    %c0_i32_0 = arith.constant 0 : i32
    %c0_i32_1 = arith.constant 0 : i32
    return %c0_i32, %c0_i32_0 : i32, i32
  }
  func.func @transform_4(%arg0: i32, %arg1: i32) -> (i32, i32, i32) {
    %c0_i32 = arith.constant 0 : i32
    %c0_i32_0 = arith.constant 0 : i32
    return %arg0, %arg1, %c0_i32 : i32, i32, i32
  }
  func.func @transform_5(%arg0: i32, %arg1: i32) -> (i32, i32, i32) {
    %c0_i32 = arith.constant 0 : i32
    %c0_i32_0 = arith.constant 0 : i32
    %c0_i32_1 = arith.constant 0 : i32
    return %arg0, %c0_i32, %c0_i32_0 : i32, i32, i32
  }
}

module attributes {stable_mosaic.version = 11 : i64} {
  func.func @_conv3x3_bn_relu_kernel(%arg0: i32, %arg1: i32, %arg2: memref<1x256x128xbf16, #tpu.memory_space<vmem>>, %arg3: memref<3x384x128xbf16, #tpu.memory_space<vmem>>, %arg4: memref<1x128xf32, #tpu.memory_space<vmem>>, %arg5: memref<1x128xf32, #tpu.memory_space<vmem>>, %arg6: memref<1x128x128xbf16, #tpu.memory_space<vmem>>, %arg7: memref<288x128xbf16, #tpu.memory_space<vmem>>) attributes {dimension_semantics = [#tpu.dimension_semantics<parallel>, #tpu.dimension_semantics<parallel>], iteration_bounds = array<i64: 2, 2>, scalar_prefetch = 0 : i64, scratch_operands = 1 : i64, tpu.core_type = #tpu.core_type<tc>, window_params = [{transform_indices = @transform_0, window_bounds = array<i64: 1, 256, 128>}, {pipeline_mode = #tpu.pipeline_mode<synchronous>, transform_indices = @transform_1, window_bounds = array<i64: 3, 384, 128>}, {pipeline_mode = #tpu.pipeline_mode<synchronous>, transform_indices = @transform_2, window_bounds = array<i64: 1, 128>}, {pipeline_mode = #tpu.pipeline_mode<synchronous>, transform_indices = @transform_3, window_bounds = array<i64: 1, 128>}, {transform_indices = @transform_4, window_bounds = array<i64: 1, 128, 128>}]} {
    %cst = arith.constant 0.000000e+00 : bf16
    %0 = vector.broadcast %cst : bf16 to vector<288x128xbf16>
    %c0 = arith.constant 0 : index
    %c0_0 = arith.constant 0 : index
    %1 = vector.load %arg7[%c0, %c0_0] : memref<288x128xbf16, #tpu.memory_space<vmem>>, vector<288x128xbf16>
    tpu.vector_store %arg7[%c0, %c0_0], %0 {strides = array<i32>} : memref<288x128xbf16, #tpu.memory_space<vmem>>, vector<288x128xbf16>,
    %c8_i32 = arith.constant 8 : i32
    %2 = arith.muli %arg1, %c8_i32 : i32
    %c0_i32 = arith.constant 0 : i32
    %3 = arith.addi %2, %c0_i32 : i32
    %c1_i32 = arith.constant 1 : i32
    %4 = arith.subi %3, %c1_i32 : i32
    %c0_i32_1 = arith.constant 0 : i32
    %5 = arith.cmpi sge, %4, %c0_i32_1 : i32
    %c16_i32 = arith.constant 16 : i32
    %6 = arith.cmpi slt, %4, %c16_i32 : i32
    %7 = arith.andi %5, %6 : i1
    %8 = arith.extui %7 : i1 to i32
    %c0_i32_2 = arith.constant 0 : i32
    %9 = arith.cmpi ne, %8, %c0_i32_2 : i32
    scf.if %9 {
      %c16_i32_85 = arith.constant 16 : i32
      %120 = arith.muli %4, %c16_i32_85 : i32
      %c0_86 = arith.constant 0 : index
      %121 = arith.index_cast %120 : i32 to index
      %c0_87 = arith.constant 0 : index
      %122 = vector.load %arg2[%c0_86, %121, %c0_87] : memref<1x256x128xbf16, #tpu.memory_space<vmem>>, vector<1x16x128xbf16>
      %123 = vector.shape_cast %122 : vector<1x16x128xbf16> to vector<16x128xbf16>
      %c26 = arith.constant 26 : index
      %c0_88 = arith.constant 0 : index
      %124 = vector.load %arg7[%c26, %c0_88] : memref<288x128xbf16, #tpu.memory_space<vmem>>, vector<16x128xbf16>
      tpu.vector_store %arg7[%c26, %c0_88], %123 {strides = array<i32>} : memref<288x128xbf16, #tpu.memory_space<vmem>>, vector<16x128xbf16>,
    } else {
    }
    %c8_i32_3 = arith.constant 8 : i32
    %10 = arith.muli %arg1, %c8_i32_3 : i32
    %c1_i32_4 = arith.constant 1 : i32
    %11 = arith.addi %10, %c1_i32_4 : i32
    %c1_i32_5 = arith.constant 1 : i32
    %12 = arith.subi %11, %c1_i32_5 : i32
    %c16_i32_6 = arith.constant 16 : i32
    %13 = arith.muli %12, %c16_i32_6 : i32
    %c0_7 = arith.constant 0 : index
    %14 = arith.index_cast %13 : i32 to index
    %c0_8 = arith.constant 0 : index
    %15 = vector.load %arg2[%c0_7, %14, %c0_8] : memref<1x256x128xbf16, #tpu.memory_space<vmem>>, vector<1x16x128xbf16>
    %16 = vector.shape_cast %15 : vector<1x16x128xbf16> to vector<16x128xbf16>
    %c50 = arith.constant 50 : index
    %c0_9 = arith.constant 0 : index
    %17 = vector.load %arg7[%c50, %c0_9] : memref<288x128xbf16, #tpu.memory_space<vmem>>, vector<16x128xbf16>
    tpu.vector_store %arg7[%c50, %c0_9], %16 {strides = array<i32>} : memref<288x128xbf16, #tpu.memory_space<vmem>>, vector<16x128xbf16>,
    %c8_i32_10 = arith.constant 8 : i32
    %18 = arith.muli %arg1, %c8_i32_10 : i32
    %c2_i32 = arith.constant 2 : i32
    %19 = arith.addi %18, %c2_i32 : i32
    %c1_i32_11 = arith.constant 1 : i32
    %20 = arith.subi %19, %c1_i32_11 : i32
    %c16_i32_12 = arith.constant 16 : i32
    %21 = arith.muli %20, %c16_i32_12 : i32
    %c0_13 = arith.constant 0 : index
    %22 = arith.index_cast %21 : i32 to index
    %c0_14 = arith.constant 0 : index
    %23 = vector.load %arg2[%c0_13, %22, %c0_14] : memref<1x256x128xbf16, #tpu.memory_space<vmem>>, vector<1x16x128xbf16>
    %24 = vector.shape_cast %23 : vector<1x16x128xbf16> to vector<16x128xbf16>
    %c74 = arith.constant 74 : index
    %c0_15 = arith.constant 0 : index
    %25 = vector.load %arg7[%c74, %c0_15] : memref<288x128xbf16, #tpu.memory_space<vmem>>, vector<16x128xbf16>
    tpu.vector_store %arg7[%c74, %c0_15], %24 {strides = array<i32>} : memref<288x128xbf16, #tpu.memory_space<vmem>>, vector<16x128xbf16>,
    %c8_i32_16 = arith.constant 8 : i32
    %26 = arith.muli %arg1, %c8_i32_16 : i32
    %c3_i32 = arith.constant 3 : i32
    %27 = arith.addi %26, %c3_i32 : i32
    %c1_i32_17 = arith.constant 1 : i32
    %28 = arith.subi %27, %c1_i32_17 : i32
    %c16_i32_18 = arith.constant 16 : i32
    %29 = arith.muli %28, %c16_i32_18 : i32
    %c0_19 = arith.constant 0 : index
    %30 = arith.index_cast %29 : i32 to index
    %c0_20 = arith.constant 0 : index
    %31 = vector.load %arg2[%c0_19, %30, %c0_20] : memref<1x256x128xbf16, #tpu.memory_space<vmem>>, vector<1x16x128xbf16>
    %32 = vector.shape_cast %31 : vector<1x16x128xbf16> to vector<16x128xbf16>
    %c98 = arith.constant 98 : index
    %c0_21 = arith.constant 0 : index
    %33 = vector.load %arg7[%c98, %c0_21] : memref<288x128xbf16, #tpu.memory_space<vmem>>, vector<16x128xbf16>
    tpu.vector_store %arg7[%c98, %c0_21], %32 {strides = array<i32>} : memref<288x128xbf16, #tpu.memory_space<vmem>>, vector<16x128xbf16>,
    %c8_i32_22 = arith.constant 8 : i32
    %34 = arith.muli %arg1, %c8_i32_22 : i32
    %c4_i32 = arith.constant 4 : i32
    %35 = arith.addi %34, %c4_i32 : i32
    %c1_i32_23 = arith.constant 1 : i32
    %36 = arith.subi %35, %c1_i32_23 : i32
    %c16_i32_24 = arith.constant 16 : i32
    %37 = arith.muli %36, %c16_i32_24 : i32
    %c0_25 = arith.constant 0 : index
    %38 = arith.index_cast %37 : i32 to index
    %c0_26 = arith.constant 0 : index
    %39 = vector.load %arg2[%c0_25, %38, %c0_26] : memref<1x256x128xbf16, #tpu.memory_space<vmem>>, vector<1x16x128xbf16>
    %40 = vector.shape_cast %39 : vector<1x16x128xbf16> to vector<16x128xbf16>
    %c122 = arith.constant 122 : index
    %c0_27 = arith.constant 0 : index
    %41 = vector.load %arg7[%c122, %c0_27] : memref<288x128xbf16, #tpu.memory_space<vmem>>, vector<16x128xbf16>
    tpu.vector_store %arg7[%c122, %c0_27], %40 {strides = array<i32>} : memref<288x128xbf16, #tpu.memory_space<vmem>>, vector<16x128xbf16>,
    %c8_i32_28 = arith.constant 8 : i32
    %42 = arith.muli %arg1, %c8_i32_28 : i32
    %c5_i32 = arith.constant 5 : i32
    %43 = arith.addi %42, %c5_i32 : i32
    %c1_i32_29 = arith.constant 1 : i32
    %44 = arith.subi %43, %c1_i32_29 : i32
    %c16_i32_30 = arith.constant 16 : i32
    %45 = arith.muli %44, %c16_i32_30 : i32
    %c0_31 = arith.constant 0 : index
    %46 = arith.index_cast %45 : i32 to index
    %c0_32 = arith.constant 0 : index
    %47 = vector.load %arg2[%c0_31, %46, %c0_32] : memref<1x256x128xbf16, #tpu.memory_space<vmem>>, vector<1x16x128xbf16>
    %48 = vector.shape_cast %47 : vector<1x16x128xbf16> to vector<16x128xbf16>
    %c146 = arith.constant 146 : index
    %c0_33 = arith.constant 0 : index
    %49 = vector.load %arg7[%c146, %c0_33] : memref<288x128xbf16, #tpu.memory_space<vmem>>, vector<16x128xbf16>
    tpu.vector_store %arg7[%c146, %c0_33], %48 {strides = array<i32>} : memref<288x128xbf16, #tpu.memory_space<vmem>>, vector<16x128xbf16>,
    %c8_i32_34 = arith.constant 8 : i32
    %50 = arith.muli %arg1, %c8_i32_34 : i32
    %c6_i32 = arith.constant 6 : i32
    %51 = arith.addi %50, %c6_i32 : i32
    %c1_i32_35 = arith.constant 1 : i32
    %52 = arith.subi %51, %c1_i32_35 : i32
    %c16_i32_36 = arith.constant 16 : i32
    %53 = arith.muli %52, %c16_i32_36 : i32
    %c0_37 = arith.constant 0 : index
    %54 = arith.index_cast %53 : i32 to index
    %c0_38 = arith.constant 0 : index
    %55 = vector.load %arg2[%c0_37, %54, %c0_38] : memref<1x256x128xbf16, #tpu.memory_space<vmem>>, vector<1x16x128xbf16>
    %56 = vector.shape_cast %55 : vector<1x16x128xbf16> to vector<16x128xbf16>
    %c170 = arith.constant 170 : index
    %c0_39 = arith.constant 0 : index
    %57 = vector.load %arg7[%c170, %c0_39] : memref<288x128xbf16, #tpu.memory_space<vmem>>, vector<16x128xbf16>
    tpu.vector_store %arg7[%c170, %c0_39], %56 {strides = array<i32>} : memref<288x128xbf16, #tpu.memory_space<vmem>>, vector<16x128xbf16>,
    %c8_i32_40 = arith.constant 8 : i32
    %58 = arith.muli %arg1, %c8_i32_40 : i32
    %c7_i32 = arith.constant 7 : i32
    %59 = arith.addi %58, %c7_i32 : i32
    %c1_i32_41 = arith.constant 1 : i32
    %60 = arith.subi %59, %c1_i32_41 : i32
    %c16_i32_42 = arith.constant 16 : i32
    %61 = arith.muli %60, %c16_i32_42 : i32
    %c0_43 = arith.constant 0 : index
    %62 = arith.index_cast %61 : i32 to index
    %c0_44 = arith.constant 0 : index
    %63 = vector.load %arg2[%c0_43, %62, %c0_44] : memref<1x256x128xbf16, #tpu.memory_space<vmem>>, vector<1x16x128xbf16>
    %64 = vector.shape_cast %63 : vector<1x16x128xbf16> to vector<16x128xbf16>
    %c194 = arith.constant 194 : index
    %c0_45 = arith.constant 0 : index
    %65 = vector.load %arg7[%c194, %c0_45] : memref<288x128xbf16, #tpu.memory_space<vmem>>, vector<16x128xbf16>
    tpu.vector_store %arg7[%c194, %c0_45], %64 {strides = array<i32>} : memref<288x128xbf16, #tpu.memory_space<vmem>>, vector<16x128xbf16>,
    %c8_i32_46 = arith.constant 8 : i32
    %66 = arith.muli %arg1, %c8_i32_46 : i32
    %c8_i32_47 = arith.constant 8 : i32
    %67 = arith.addi %66, %c8_i32_47 : i32
    %c1_i32_48 = arith.constant 1 : i32
    %68 = arith.subi %67, %c1_i32_48 : i32
    %c16_i32_49 = arith.constant 16 : i32
    %69 = arith.muli %68, %c16_i32_49 : i32
    %c0_50 = arith.constant 0 : index
    %70 = arith.index_cast %69 : i32 to index
    %c0_51 = arith.constant 0 : index
    %71 = vector.load %arg2[%c0_50, %70, %c0_51] : memref<1x256x128xbf16, #tpu.memory_space<vmem>>, vector<1x16x128xbf16>
    %72 = vector.shape_cast %71 : vector<1x16x128xbf16> to vector<16x128xbf16>
    %c218 = arith.constant 218 : index
    %c0_52 = arith.constant 0 : index
    %73 = vector.load %arg7[%c218, %c0_52] : memref<288x128xbf16, #tpu.memory_space<vmem>>, vector<16x128xbf16>
    tpu.vector_store %arg7[%c218, %c0_52], %72 {strides = array<i32>} : memref<288x128xbf16, #tpu.memory_space<vmem>>, vector<16x128xbf16>,
    %c8_i32_53 = arith.constant 8 : i32
    %74 = arith.muli %arg1, %c8_i32_53 : i32
    %c9_i32 = arith.constant 9 : i32
    %75 = arith.addi %74, %c9_i32 : i32
    %c1_i32_54 = arith.constant 1 : i32
    %76 = arith.subi %75, %c1_i32_54 : i32
    %c0_i32_55 = arith.constant 0 : i32
    %77 = arith.cmpi sge, %76, %c0_i32_55 : i32
    %c16_i32_56 = arith.constant 16 : i32
    %78 = arith.cmpi slt, %76, %c16_i32_56 : i32
    %79 = arith.andi %77, %78 : i1
    %80 = arith.extui %79 : i1 to i32
    %c0_i32_57 = arith.constant 0 : i32
    %81 = arith.cmpi ne, %80, %c0_i32_57 : i32
    scf.if %81 {
      %c16_i32_85 = arith.constant 16 : i32
      %120 = arith.muli %76, %c16_i32_85 : i32
      %c0_86 = arith.constant 0 : index
      %121 = arith.index_cast %120 : i32 to index
      %c0_87 = arith.constant 0 : index
      %122 = vector.load %arg2[%c0_86, %121, %c0_87] : memref<1x256x128xbf16, #tpu.memory_space<vmem>>, vector<1x16x128xbf16>
      %123 = vector.shape_cast %122 : vector<1x16x128xbf16> to vector<16x128xbf16>
      %c242 = arith.constant 242 : index
      %c0_88 = arith.constant 0 : index
      %124 = vector.load %arg7[%c242, %c0_88] : memref<288x128xbf16, #tpu.memory_space<vmem>>, vector<16x128xbf16>
      tpu.vector_store %arg7[%c242, %c0_88], %123 {strides = array<i32>} : memref<288x128xbf16, #tpu.memory_space<vmem>>, vector<16x128xbf16>,
    } else {
    }
    %c23 = arith.constant 23 : index
    %c0_58 = arith.constant 0 : index
    %82 = vector.load %arg7[%c23, %c0_58] : memref<288x128xbf16, #tpu.memory_space<vmem>>, vector<192x128xbf16>
    %c47 = arith.constant 47 : index
    %c0_59 = arith.constant 0 : index
    %83 = vector.load %arg7[%c47, %c0_59] : memref<288x128xbf16, #tpu.memory_space<vmem>>, vector<192x128xbf16>
    %c71 = arith.constant 71 : index
    %c0_60 = arith.constant 0 : index
    %84 = vector.load %arg7[%c71, %c0_60] : memref<288x128xbf16, #tpu.memory_space<vmem>>, vector<192x128xbf16>
    %85 = tpu.concatenate %82, %83, %84 in 1 : vector<192x128xbf16>, vector<192x128xbf16>, vector<192x128xbf16> -> vector<192x384xbf16>
    %c0_61 = arith.constant 0 : index
    %c0_62 = arith.constant 0 : index
    %c0_63 = arith.constant 0 : index
    %86 = vector.load %arg3[%c0_61, %c0_62, %c0_63] : memref<3x384x128xbf16, #tpu.memory_space<vmem>>, vector<1x384x128xbf16>
    %87 = vector.shape_cast %86 : vector<1x384x128xbf16> to vector<384x128xbf16>
    %cst_64 = arith.constant dense<0.000000e+00> : vector<192x128xf32>
    %88 = tpu.matmul %85, %87, %cst_64 {dimension_numbers = #tpu.dot_dimension_numbers<[1], [0], [0], [1], [0, 0, 1, 1], [], []>} : vector<192x384xbf16>, vector<384x128xbf16>, vector<192x128xf32> -> vector<192x128xf32>
    %c24 = arith.constant 24 : index
    %c0_65 = arith.constant 0 : index
    %89 = vector.load %arg7[%c24, %c0_65] : memref<288x128xbf16, #tpu.memory_space<vmem>>, vector<192x128xbf16>
    %c48 = arith.constant 48 : index
    %c0_66 = arith.constant 0 : index
    %90 = vector.load %arg7[%c48, %c0_66] : memref<288x128xbf16, #tpu.memory_space<vmem>>, vector<192x128xbf16>
    %c72 = arith.constant 72 : index
    %c0_67 = arith.constant 0 : index
    %91 = vector.load %arg7[%c72, %c0_67] : memref<288x128xbf16, #tpu.memory_space<vmem>>, vector<192x128xbf16>
    %92 = tpu.concatenate %89, %90, %91 in 1 : vector<192x128xbf16>, vector<192x128xbf16>, vector<192x128xbf16> -> vector<192x384xbf16>
    %c1 = arith.constant 1 : index
    %c0_68 = arith.constant 0 : index
    %c0_69 = arith.constant 0 : index
    %93 = vector.load %arg3[%c1, %c0_68, %c0_69] : memref<3x384x128xbf16, #tpu.memory_space<vmem>>, vector<1x384x128xbf16>
    %94 = vector.shape_cast %93 : vector<1x384x128xbf16> to vector<384x128xbf16>
    %cst_70 = arith.constant dense<0.000000e+00> : vector<192x128xf32>
    %95 = tpu.matmul %92, %94, %cst_70 {dimension_numbers = #tpu.dot_dimension_numbers<[1], [0], [0], [1], [0, 0, 1, 1], [], []>} : vector<192x384xbf16>, vector<384x128xbf16>, vector<192x128xf32> -> vector<192x128xf32>
    %96 = arith.addf %88, %95 : vector<192x128xf32>
    %c25 = arith.constant 25 : index
    %c0_71 = arith.constant 0 : index
    %97 = vector.load %arg7[%c25, %c0_71] : memref<288x128xbf16, #tpu.memory_space<vmem>>, vector<192x128xbf16>
    %c49 = arith.constant 49 : index
    %c0_72 = arith.constant 0 : index
    %98 = vector.load %arg7[%c49, %c0_72] : memref<288x128xbf16, #tpu.memory_space<vmem>>, vector<192x128xbf16>
    %c73 = arith.constant 73 : index
    %c0_73 = arith.constant 0 : index
    %99 = vector.load %arg7[%c73, %c0_73] : memref<288x128xbf16, #tpu.memory_space<vmem>>, vector<192x128xbf16>
    %100 = tpu.concatenate %97, %98, %99 in 1 : vector<192x128xbf16>, vector<192x128xbf16>, vector<192x128xbf16> -> vector<192x384xbf16>
    %c2 = arith.constant 2 : index
    %c0_74 = arith.constant 0 : index
    %c0_75 = arith.constant 0 : index
    %101 = vector.load %arg3[%c2, %c0_74, %c0_75] : memref<3x384x128xbf16, #tpu.memory_space<vmem>>, vector<1x384x128xbf16>
    %102 = vector.shape_cast %101 : vector<1x384x128xbf16> to vector<384x128xbf16>
    %cst_76 = arith.constant dense<0.000000e+00> : vector<192x128xf32>
    %103 = tpu.matmul %100, %102, %cst_76 {dimension_numbers = #tpu.dot_dimension_numbers<[1], [0], [0], [1], [0, 0, 1, 1], [], []>} : vector<192x384xbf16>, vector<384x128xbf16>, vector<192x128xf32> -> vector<192x128xf32>
    %104 = arith.addf %96, %103 : vector<192x128xf32>
    %c0_77 = arith.constant 0 : index
    %c0_78 = arith.constant 0 : index
    %105 = vector.load %arg4[%c0_77, %c0_78] : memref<1x128xf32, #tpu.memory_space<vmem>>, vector<1x128xf32>
    %106 = vector.broadcast %105 : vector<1x128xf32> to vector<192x128xf32>
    %107 = arith.mulf %104, %106 : vector<192x128xf32>
    %c0_79 = arith.constant 0 : index
    %c0_80 = arith.constant 0 : index
    %108 = vector.load %arg5[%c0_79, %c0_80] : memref<1x128xf32, #tpu.memory_space<vmem>>, vector<1x128xf32>
    %109 = vector.broadcast %108 : vector<1x128xf32> to vector<192x128xf32>
    %110 = arith.addf %107, %109 : vector<192x128xf32>
    %cst_81 = arith.constant 0.000000e+00 : f32
    %111 = vector.broadcast %cst_81 : f32 to vector<192x128xf32>
    %112 = arith.maximumf %110, %111 : vector<192x128xf32>
    %113 = vector.shape_cast %112 : vector<192x128xf32> to vector<8x24x128xf32>
    %114 = vector.extract_strided_slice %113 {offsets = [0, 2, 0], sizes = [8, 16, 128], strides = [1, 1, 1]} : vector<8x24x128xf32> to vector<8x16x128xf32>
    %115 = vector.shape_cast %114 : vector<8x16x128xf32> to vector<128x128xf32>
    %116 = arith.truncf %115 : vector<128x128xf32> to vector<128x128xbf16>
    %c0_82 = arith.constant 0 : index
    %c0_83 = arith.constant 0 : index
    %c0_84 = arith.constant 0 : index
    %117 = vector.load %arg6[%c0_82, %c0_83, %c0_84] : memref<1x128x128xbf16, #tpu.memory_space<vmem>>, vector<1x128x128xbf16>
    %118 = vector.shape_cast %117 : vector<1x128x128xbf16> to vector<128x128xbf16>
    %119 = vector.shape_cast %116 : vector<128x128xbf16> to vector<1x128x128xbf16>
    tpu.vector_store %arg6[%c0_82, %c0_83, %c0_84], %119 {strides = array<i32>} : memref<1x128x128xbf16, #tpu.memory_space<vmem>>, vector<1x128x128xbf16>,
    return
  }
  func.func @transform_0(%arg0: i32, %arg1: i32) -> (i32, i32, i32) {
    %c0_i32 = arith.constant 0 : i32
    %c0_i32_0 = arith.constant 0 : i32
    %c0_i32_1 = arith.constant 0 : i32
    return %arg0, %c0_i32, %c0_i32_0 : i32, i32, i32
  }
  func.func @transform_1(%arg0: i32, %arg1: i32) -> (i32, i32, i32) {
    %c0_i32 = arith.constant 0 : i32
    %c0_i32_0 = arith.constant 0 : i32
    %c0_i32_1 = arith.constant 0 : i32
    %c0_i32_2 = arith.constant 0 : i32
    return %c0_i32, %c0_i32_0, %c0_i32_1 : i32, i32, i32
  }
  func.func @transform_2(%arg0: i32, %arg1: i32) -> (i32, i32) {
    %c0_i32 = arith.constant 0 : i32
    %c0_i32_0 = arith.constant 0 : i32
    %c0_i32_1 = arith.constant 0 : i32
    return %c0_i32, %c0_i32_0 : i32, i32
  }
  func.func @transform_3(%arg0: i32, %arg1: i32) -> (i32, i32) {
    %c0_i32 = arith.constant 0 : i32
    %c0_i32_0 = arith.constant 0 : i32
    %c0_i32_1 = arith.constant 0 : i32
    return %c0_i32, %c0_i32_0 : i32, i32
  }
  func.func @transform_4(%arg0: i32, %arg1: i32) -> (i32, i32, i32) {
    %c0_i32 = arith.constant 0 : i32
    %c0_i32_0 = arith.constant 0 : i32
    return %arg0, %arg1, %c0_i32 : i32, i32, i32
  }
}

module attributes {stable_mosaic.version = 11 : i64} {
  func.func @_se_scale_res_relu_kernel(%arg0: i32, %arg1: i32, %arg2: memref<1x128x128xbf16, #tpu.memory_space<vmem>>, %arg3: memref<1x128x128xbf16, #tpu.memory_space<vmem>>, %arg4: memref<1x1x128xf32, #tpu.memory_space<vmem>>, %arg5: memref<1x128x16xbf16, #tpu.memory_space<vmem>>) attributes {dimension_semantics = [#tpu.dimension_semantics<parallel>, #tpu.dimension_semantics<parallel>], iteration_bounds = array<i64: 2, 2>, scalar_prefetch = 0 : i64, scratch_operands = 0 : i64, tpu.core_type = #tpu.core_type<tc>, window_params = [{transform_indices = @transform_0, window_bounds = array<i64: 1, 128, 128>}, {transform_indices = @transform_1, window_bounds = array<i64: 1, 128, 128>}, {transform_indices = @transform_2, window_bounds = array<i64: 1, 1, 128>}, {transform_indices = @transform_3, window_bounds = array<i64: 1, 128, 16>}]} {
    %c0 = arith.constant 0 : index
    %c0_0 = arith.constant 0 : index
    %c0_1 = arith.constant 0 : index
    %0 = vector.load %arg2[%c0, %c0_0, %c0_1] : memref<1x128x128xbf16, #tpu.memory_space<vmem>>, vector<1x128x128xbf16>
    %1 = vector.shape_cast %0 : vector<1x128x128xbf16> to vector<128x128xbf16>
    %2 = arith.extf %1 : vector<128x128xbf16> to vector<128x128xf32>
    %c0_2 = arith.constant 0 : index
    %c0_3 = arith.constant 0 : index
    %c0_4 = arith.constant 0 : index
    %3 = vector.load %arg3[%c0_2, %c0_3, %c0_4] : memref<1x128x128xbf16, #tpu.memory_space<vmem>>, vector<1x128x128xbf16>
    %4 = vector.shape_cast %3 : vector<1x128x128xbf16> to vector<128x128xbf16>
    %5 = arith.extf %4 : vector<128x128xbf16> to vector<128x128xf32>
    %c0_5 = arith.constant 0 : index
    %c0_6 = arith.constant 0 : index
    %c0_7 = arith.constant 0 : index
    %6 = vector.load %arg4[%c0_5, %c0_6, %c0_7] : memref<1x1x128xf32, #tpu.memory_space<vmem>>, vector<1x1x128xf32>
    %7 = vector.shape_cast %6 : vector<1x1x128xf32> to vector<1x128xf32>
    %8 = vector.broadcast %7 : vector<1x128xf32> to vector<128x128xf32>
    %9 = arith.mulf %2, %8 : vector<128x128xf32>
    %10 = arith.addf %9, %5 : vector<128x128xf32>
    %cst = arith.constant 0.000000e+00 : f32
    %11 = vector.broadcast %cst : f32 to vector<128x128xf32>
    %12 = arith.maximumf %10, %11 : vector<128x128xf32>
    %13 = vector.extract_strided_slice %12 {offsets = [0, 0], sizes = [128, 16], strides = [1, 1]} : vector<128x128xf32> to vector<128x16xf32>
    %14 = arith.truncf %13 : vector<128x16xf32> to vector<128x16xbf16>
    %c0_8 = arith.constant 0 : index
    %c0_9 = arith.constant 0 : index
    %c0_10 = arith.constant 0 : index
    %15 = vector.load %arg5[%c0_8, %c0_9, %c0_10] : memref<1x128x16xbf16, #tpu.memory_space<vmem>>, vector<1x128x16xbf16>
    %16 = vector.shape_cast %15 : vector<1x128x16xbf16> to vector<128x16xbf16>
    %17 = vector.shape_cast %14 : vector<128x16xbf16> to vector<1x128x16xbf16>
    tpu.vector_store %arg5[%c0_8, %c0_9, %c0_10], %17 {strides = array<i32>} : memref<1x128x16xbf16, #tpu.memory_space<vmem>>, vector<1x128x16xbf16>,
    return
  }
  func.func @transform_0(%arg0: i32, %arg1: i32) -> (i32, i32, i32) {
    %c0_i32 = arith.constant 0 : i32
    %c0_i32_0 = arith.constant 0 : i32
    return %arg0, %arg1, %c0_i32 : i32, i32, i32
  }
  func.func @transform_1(%arg0: i32, %arg1: i32) -> (i32, i32, i32) {
    %c0_i32 = arith.constant 0 : i32
    %c0_i32_0 = arith.constant 0 : i32
    return %arg0, %arg1, %c0_i32 : i32, i32, i32
  }
  func.func @transform_2(%arg0: i32, %arg1: i32) -> (i32, i32, i32) {
    %c0_i32 = arith.constant 0 : i32
    %c0_i32_0 = arith.constant 0 : i32
    %c0_i32_1 = arith.constant 0 : i32
    return %arg0, %c0_i32, %c0_i32_0 : i32, i32, i32
  }
  func.func @transform_3(%arg0: i32, %arg1: i32) -> (i32, i32, i32) {
    %c0_i32 = arith.constant 0 : i32
    %c0_i32_0 = arith.constant 0 : i32
    return %arg0, %arg1, %c0_i32 : i32, i32, i32
  }
}

</mosaic_0001>

<bundles_post_ra>
// kernel: se_bottleneck_forward.4
= control target key start
LH: loop header
LB: loop body
LE: loop exit
PB: predicated region body
PF: predicated region fallthrough
CT: control target
= control target key end

     0   :  { %s999_s15 = smov 0   ;;  %s1157_s0 = inlined_call_operand.vmem [shape: bf16[512,128], index: 0, kind: input, shape index: {}]   ;;  %s1158_s1 = inlined_call_operand.vmem [shape: bf16[128,128], index: 1, kind: input, shape index: {}]   ;;  %s1159_s2 = inlined_call_operand.vmem [shape: f32[1,128], index: 2, kind: input, shape index: {}]   ;;  %s1160_s3 = inlined_call_operand.vmem [shape: f32[1,128], index: 3, kind: input, shape index: {}]   ;;  %s1161_s4 = inlined_call_operand.vmem [shape: bf16[512,128], index: 4, kind: output, shape index: {}]  }
   0x1 LB: > { %s706_s16 = sadd.s32 4294967295, %s972_s15   ;;  %p710_p0 = scmp.ge.s32.totalorder %s972_s15, 1  ;;  %s972_s15 = sphi %s999_s15, %s14_s15  }
   0x2   : > { %p163_p1 = scmp.lt.s32.totalorder %s972_s15, 3 }
   0x4   : > { %p164_p2 = pnand %p710_p0, %p163_p1 }
   0x5   : > { %s711_s25 = sshll.u32 (!%p164_p2), %s706_s16, 5 }
   0x6   : > { %167 = sbr.rel (%p164_p2) target bundleno = 242 (0xf2), region = 36  ;;  %p190_p3 = scmp.lt.s32.totalorder (!%p164_p2), %s711_s25, 63 }
   0xb   : > { %v836_v0 = vld [vmem:[%s1158_s1 + $0x38] sm:$0xff]  ;;  %v835_v1 = vld [vmem:[%s1158_s1 + $0x30] sm:$0xff]  ;;  %v834_v2 = vld [vmem:[%s1158_s1 + $0x28] sm:$0xff]  ;;  %s1163_s25 = smov (!%p190_p3, %s711_s25), 63 }
   0xc   : > { %393 = vmatpush.bf16.msra.mxu0 %v836_v0  ;;  %932 = vmatpush.bf16.msra.mxu1 %v836_v0  ;;  %v833_v3 = vld [vmem:[%s1158_s1 + $0x20] sm:$0xff]  ;;  %v832_v4 = vld [vmem:[%s1158_s1 + $0x18] sm:$0xff]  ;;  %v831_v5 = vld [vmem:[%s1158_s1 + $0x10] sm:$0xff]  ;;  %s712_s6 = sshll.u32 %s1163_s25, 2 }
   0xd   : > { %933 = vmatpush.bf16.msra.mxu2 %v836_v0  ;;  %934 = vmatpush.bf16.msra.mxu3 %v836_v0  ;;  %v830_v6 = vld [vmem:[%s1158_s1 + $0x8] sm:$0xff]  ;;  %v829_v7 = vld [vmem:[%s1158_s1] sm:$0xff]  ;;  %s1039_s11 = scalar_lea.vmem %s1157_s0, %s712_s6  ;;  %s1082_s19 = scalar_lea.vmem %s1161_s4, %s712_s6 }
   0xe   : > { %v813_v8 = vld [vmem:[%s1039_s11] sm:$0xff]  ;;  %v814_v12 = vld [vmem:[%s1039_s11 + $0x8] sm:$0xff]  ;;  %v815_v16 = vld [vmem:[%s1039_s11 + $0x10] sm:$0xff] }
   0xf   : > { %v817_v9 = vld [vmem:[%s1039_s11 + $0x20] sm:$0xff]  ;;  %v818_v13 = vld [vmem:[%s1039_s11 + $0x28] sm:$0xff]  ;;  %v819_v17 = vld [vmem:[%s1039_s11 + $0x30] sm:$0xff] }
  0x10   : > { %394 = vmatpush.bf16.msra.mxu0 %v835_v1  ;;  %935 = vmatpush.bf16.msra.mxu1 %v835_v1  ;;  %v821_v10 = vld [vmem:[%s1039_s11 + $0x40] sm:$0xff]  ;;  %v822_v14 = vld [vmem:[%s1039_s11 + $0x48] sm:$0xff]  ;;  %v823_v18 = vld [vmem:[%s1039_s11 + $0x50] sm:$0xff] }
  0x11   : > { %936 = vmatpush.bf16.msra.mxu2 %v835_v1  ;;  %937 = vmatpush.bf16.msra.mxu3 %v835_v1  ;;  %v825_v11 = vld [vmem:[%s1039_s11 + $0x60] sm:$0xff]  ;;  %v826_v15 = vld [vmem:[%s1039_s11 + $0x68] sm:$0xff]  ;;  %v827_v19 = vld [vmem:[%s1039_s11 + $0x70] sm:$0xff] }
  0x12   : > { %v816_v20 = vld [vmem:[%s1039_s11 + $0x18] sm:$0xff]  ;;  %v1060_v26 = vld [vmem:[%s1159_s2] ss:$0 sm:$0xff] }
  0x13   : > { %v820_v21 = vld [vmem:[%s1039_s11 + $0x38] sm:$0xff]  ;;  %v1066_v28 = vld [vmem:[%s1160_s3] ss:$0 sm:$0xff] }
  0x14   : > { %395 = vmatpush.bf16.msra.mxu0 %v834_v2  ;;  %938 = vmatpush.bf16.msra.mxu1 %v834_v2  ;;  %v824_v22 = vld [vmem:[%s1039_s11 + $0x58] sm:$0xff] }
  0x15   : > { %939 = vmatpush.bf16.msra.mxu2 %v834_v2  ;;  %940 = vmatpush.bf16.msra.mxu3 %v834_v2  ;;  %v828_v23 = vld [vmem:[%s1039_s11 + $0x78] sm:$0xff] }
  0x18   : > { %396 = vmatpush.bf16.msra.mxu0 %v833_v3  ;;  %941 = vmatpush.bf16.msra.mxu1 %v833_v3 }
  0x19   : > { %942 = vmatpush.bf16.msra.mxu2 %v833_v3  ;;  %943 = vmatpush.bf16.msra.mxu3 %v833_v3 }
  0x1c   : > { %397 = vmatpush.bf16.msra.mxu0 %v832_v4  ;;  %944 = vmatpush.bf16.msra.mxu1 %v832_v4 }
  0x1d   : > { %945 = vmatpush.bf16.msra.mxu2 %v832_v4  ;;  %946 = vmatpush.bf16.msra.mxu3 %v832_v4 }
  0x20   : > { %398 = vmatpush.bf16.msra.mxu0 %v831_v5  ;;  %947 = vmatpush.bf16.msra.mxu1 %v831_v5 }
  0x21   : > { %948 = vmatpush.bf16.msra.mxu2 %v831_v5  ;;  %949 = vmatpush.bf16.msra.mxu3 %v831_v5 }
  0x24   : > { %399 = vmatpush.bf16.msra.mxu0 %v830_v6  ;;  %950 = vmatpush.bf16.msra.mxu1 %v830_v6 }
  0x25   : > { %951 = vmatpush.bf16.msra.mxu2 %v830_v6  ;;  %952 = vmatpush.bf16.msra.mxu3 %v830_v6 }
  0x28   : > { %400 = vmatpush.bf16.msra.mxu0 %v829_v7  ;;  %953 = vmatpush.bf16.msra.mxu1 %v829_v7 }
  0x29   : > { %954 = vmatpush.bf16.msra.mxu2 %v829_v7  ;;  %955 = vmatpush.bf16.msra.mxu3 %v829_v7 }
  0x2b   : > { %401 = vmatmul.bf16.vlgmr.msra.gmra.mxu0 %v813_v8  ;;  %421 = vmatmul.bf16.vlgmr.msra.gmra.mxu1 %v817_v9 }
  0x2c   : > { %441 = vmatmul.bf16.vlgmr.msra.gmra.mxu2 %v821_v10  ;;  %461 = vmatmul.bf16.vlgmr.msra.gmra.mxu3 %v825_v11 }
  0x3b   : > { %406 = vmatmul.bf16.gmra.mxu0 %v814_v12  ;;  %426 = vmatmul.bf16.gmra.mxu1 %v818_v13 }
  0x3c   : > { %446 = vmatmul.bf16.gmra.mxu2 %v822_v14  ;;  %466 = vmatmul.bf16.gmra.mxu3 %v826_v15 }
  0x4b   : > { %411 = vmatmul.bf16.gmra.mxu0 %v815_v16  ;;  %431 = vmatmul.bf16.gmra.mxu1 %v819_v17 }
  0x4c   : > { %451 = vmatmul.bf16.gmra.mxu2 %v823_v18  ;;  %471 = vmatmul.bf16.gmra.mxu3 %v827_v19 }
  0x5b   : > { %416 = vmatmul.bf16.gmra.mxu0 %v816_v20  ;;  %436 = vmatmul.bf16.gmra.mxu1 %v820_v21 }
  0x5c   : > { %456 = vmatmul.bf16.gmra.mxu2 %v824_v22  ;;  %476 = vmatmul.bf16.gmra.mxu3 %v828_v23 }
  0xa8   : > { %v402_v24 = vpop.f32.mrf.mxu0  ;;  %v422_v25 = vpop.f32.mrf.mxu1 }
  0xa9   : > { %v486_v27 = vmul.f32 %v1060_v26, %v402_v24  ;;  %v494_v29 = vmul.f32 %v1060_v26, %v422_v25 }
  0xab   : > { %v522_v34 = vadd.f32 %v1066_v28, %v486_v27  ;;  %v530_v35 = vadd.f32 %v1066_v28, %v494_v29 }
  0xad   : > { %v554_v42 = vmax.f32 %v522_v34, 0.0  ;;  %v562_v43 = vmax.f32 %v530_v35, 0.0 }
  0xaf   : > { %v442_v30 = vpop.f32.mrf.mxu2  ;;  %v462_v31 = vpop.f32.mrf.mxu3 }
  0xb0   : > { %v404_v32 = vpop.f32.mrf.mxu0  ;;  %v424_v33 = vpop.f32.mrf.mxu1  ;;  %v502_v40 = vmul.f32 %v1060_v26, %v442_v30  ;;  %v510_v41 = vmul.f32 %v1060_v26, %v462_v31 }
  0xb1   : > { %v487_v36 = vmul.f32 %v1060_v26, %v404_v32  ;;  %v495_v37 = vmul.f32 %v1060_v26, %v424_v33 }
  0xb2   : > { %v538_v50 = vadd.f32 %v1066_v28, %v502_v40  ;;  %v546_v51 = vadd.f32 %v1066_v28, %v510_v41 }
  0xb3   : > { %v523_v38 = vadd.f32 %v1066_v28, %v487_v36  ;;  %v531_v39 = vadd.f32 %v1066_v28, %v495_v37 }
  0xb4   : > { %v570_v58 = vmax.f32 %v538_v50, 0.0  ;;  %v578_v59 = vmax.f32 %v546_v51, 0.0 }
  0xb5   : > { %v555_v44 = vmax.f32 %v523_v38, 0.0  ;;  %v563_v45 = vmax.f32 %v531_v39, 0.0 }
  0xb7   : > { %v840_v46 = vpack.c.bf16 %v555_v44, %v554_v42  ;;  %v860_v47 = vpack.c.bf16 %v563_v45, %v562_v43  ;;  %v444_v48 = vpop.f32.mrf.mxu2  ;;  %v464_v49 = vpop.f32.mrf.mxu3 }
  0xb8   : > { %v503_v52 = vmul.f32 %v1060_v26, %v444_v48  ;;  %v511_v53 = vmul.f32 %v1060_v26, %v464_v49  ;;  %v407_v54 = vpop.f32.mrf.mxu0  ;;  %v427_v55 = vpop.f32.mrf.mxu1 }
  0xb9   : > { %841 = vst [vmem:[%s1082_s19] sm:$0xff] %v840_v46   ;;  %v488_v62 = vmul.f32 %v1060_v26, %v407_v54  ;;  %v496_v63 = vmul.f32 %v1060_v26, %v427_v55 }
  0xba   : > { %920 = vst [vmem:[%s1082_s19 + $0x20] sm:$0xff] %v860_v47   ;;  %v539_v56 = vadd.f32 %v1066_v28, %v503_v52  ;;  %v547_v57 = vadd.f32 %v1066_v28, %v511_v53 }
  0xbb   : > { %v524_v6 = vadd.f32 %v1066_v28, %v488_v62  ;;  %v532_v7 = vadd.f32 %v1066_v28, %v496_v63 }
  0xbc   : > { %v571_v60 = vmax.f32 %v539_v56, 0.0  ;;  %v579_v61 = vmax.f32 %v547_v57, 0.0 }
  0xbd   : > { %v556_v14 = vmax.f32 %v524_v6, 0.0  ;;  %v564_v15 = vmax.f32 %v532_v7, 0.0 }
  0xbe   : > { %v880_v0 = vpack.c.bf16 %v571_v60, %v570_v58  ;;  %v900_v1 = vpack.c.bf16 %v579_v61, %v578_v59 }
  0xbf   : > { %v447_v2 = vpop.f32.mrf.mxu2  ;;  %v467_v3 = vpop.f32.mrf.mxu3 }
  0xc0   : > { %924 = vst [vmem:[%s1082_s19 + $0x40] sm:$0xff] %v880_v0   ;;  %v409_v4 = vpop.f32.mrf.mxu0  ;;  %v429_v5 = vpop.f32.mrf.mxu1  ;;  %v504_v12 = vmul.f32 %v1060_v26, %v447_v2  ;;  %v512_v13 = vmul.f32 %v1060_v26, %v467_v3 }
  0xc1   : > { %928 = vst [vmem:[%s1082_s19 + $0x60] sm:$0xff] %v900_v1   ;;  %v489_v8 = vmul.f32 %v1060_v26, %v409_v4  ;;  %v497_v9 = vmul.f32 %v1060_v26, %v429_v5 }
  0xc2   : > { %v540_v22 = vadd.f32 %v1066_v28, %v504_v12  ;;  %v548_v23 = vadd.f32 %v1066_v28, %v512_v13 }
  0xc3   : > { %v525_v10 = vadd.f32 %v1066_v28, %v489_v8  ;;  %v533_v11 = vadd.f32 %v1066_v28, %v497_v9 }
  0xc4   : > { %v572_v32 = vmax.f32 %v540_v22, 0.0  ;;  %v580_v33 = vmax.f32 %v548_v23, 0.0 }
  0xc5   : > { %v557_v16 = vmax.f32 %v525_v10, 0.0  ;;  %v565_v17 = vmax.f32 %v533_v11, 0.0 }
  0xc7   : > { %v845_v18 = vpack.c.bf16 %v557_v16, %v556_v14  ;;  %v865_v19 = vpack.c.bf16 %v565_v17, %v564_v15  ;;  %v449_v20 = vpop.f32.mrf.mxu2  ;;  %v469_v21 = vpop.f32.mrf.mxu3 }
  0xc8   : > { %v505_v24 = vmul.f32 %v1060_v26, %v449_v20  ;;  %v513_v25 = vmul.f32 %v1060_v26, %v469_v21  ;;  %v412_v27 = vpop.f32.mrf.mxu0  ;;  %v432_v29 = vpop.f32.mrf.mxu1 }
  0xc9   : > { %917 = vst [vmem:[%s1082_s19 + $0x8] sm:$0xff] %v845_v18   ;;  %v490_v36 = vmul.f32 %v1060_v26, %v412_v27  ;;  %v498_v37 = vmul.f32 %v1060_v26, %v432_v29 }
  0xca   : > { %921 = vst [vmem:[%s1082_s19 + $0x28] sm:$0xff] %v865_v19   ;;  %v541_v30 = vadd.f32 %v1066_v28, %v505_v24  ;;  %v549_v31 = vadd.f32 %v1066_v28, %v513_v25 }
  0xcb   : > { %v526_v44 = vadd.f32 %v1066_v28, %v490_v36  ;;  %v534_v45 = vadd.f32 %v1066_v28, %v498_v37 }
  0xcc   : > { %v573_v34 = vmax.f32 %v541_v30, 0.0  ;;  %v581_v35 = vmax.f32 %v549_v31, 0.0 }
  0xcd   : > { %v558_v52 = vmax.f32 %v526_v44, 0.0  ;;  %v566_v53 = vmax.f32 %v534_v45, 0.0 }
  0xce   : > { %v885_v38 = vpack.c.bf16 %v573_v34, %v572_v32  ;;  %v905_v39 = vpack.c.bf16 %v581_v35, %v580_v33 }
  0xcf   : > { %v452_v40 = vpop.f32.mrf.mxu2  ;;  %v472_v41 = vpop.f32.mrf.mxu3 }
  0xd0   : > { %925 = vst [vmem:[%s1082_s19 + $0x48] sm:$0xff] %v885_v38   ;;  %v414_v42 = vpop.f32.mrf.mxu0  ;;  %v434_v43 = vpop.f32.mrf.mxu1  ;;  %v506_v50 = vmul.f32 %v1060_v26, %v452_v40  ;;  %v514_v51 = vmul.f32 %v1060_v26, %v472_v41 }
  0xd1   : > { %929 = vst [vmem:[%s1082_s19 + $0x68] sm:$0xff] %v905_v39   ;;  %v491_v46 = vmul.f32 %v1060_v26, %v414_v42  ;;  %v499_v47 = vmul.f32 %v1060_v26, %v434_v43 }
  0xd2   : > { %v542_v60 = vadd.f32 %v1066_v28, %v506_v50  ;;  %v550_v61 = vadd.f32 %v1066_v28, %v514_v51 }
  0xd3   : > { %v527_v48 = vadd.f32 %v1066_v28, %v491_v46  ;;  %v535_v49 = vadd.f32 %v1066_v28, %v499_v47 }
  0xd4   : > { %v574_v4 = vmax.f32 %v542_v60, 0.0  ;;  %v582_v5 = vmax.f32 %v550_v61, 0.0 }
  0xd5   : > { %v559_v54 = vmax.f32 %v527_v48, 0.0  ;;  %v567_v55 = vmax.f32 %v535_v49, 0.0 }
  0xd7   : > { %v850_v56 = vpack.c.bf16 %v559_v54, %v558_v52  ;;  %v870_v57 = vpack.c.bf16 %v567_v55, %v566_v53  ;;  %v454_v58 = vpop.f32.mrf.mxu2  ;;  %v474_v59 = vpop.f32.mrf.mxu3 }
  0xd8   : > { %v507_v62 = vmul.f32 %v1060_v26, %v454_v58  ;;  %v515_v63 = vmul.f32 %v1060_v26, %v474_v59  ;;  %v417_v0 = vpop.f32.mrf.mxu0  ;;  %v437_v1 = vpop.f32.mrf.mxu1 }
  0xd9   : > { %918 = vst [vmem:[%s1082_s19 + $0x10] sm:$0xff] %v850_v56   ;;  %v492_v8 = vmul.f32 %v1060_v26, %v417_v0  ;;  %v500_v9 = vmul.f32 %v1060_v26, %v437_v1 }
  0xda   : > { %922 = vst [vmem:[%s1082_s19 + $0x30] sm:$0xff] %v870_v57   ;;  %v543_v2 = vadd.f32 %v1066_v28, %v507_v62  ;;  %v551_v3 = vadd.f32 %v1066_v28, %v515_v63 }
  0xdb   : > { %v528_v16 = vadd.f32 %v1066_v28, %v492_v8  ;;  %v536_v17 = vadd.f32 %v1066_v28, %v500_v9 }
  0xdc   : > { %v575_v6 = vmax.f32 %v543_v2, 0.0  ;;  %v583_v7 = vmax.f32 %v551_v3, 0.0 }
  0xdd   : > { %v560_v24 = vmax.f32 %v528_v16, 0.0  ;;  %v568_v25 = vmax.f32 %v536_v17, 0.0 }
  0xde   : > { %v890_v10 = vpack.c.bf16 %v575_v6, %v574_v4  ;;  %v910_v11 = vpack.c.bf16 %v583_v7, %v582_v5 }
  0xdf   : > { %v457_v12 = vpop.f32.mrf.mxu2  ;;  %v477_v13 = vpop.f32.mrf.mxu3 }
  0xe0   : > { %926 = vst [vmem:[%s1082_s19 + $0x50] sm:$0xff] %v890_v10   ;;  %v419_v14 = vpop.f32.mrf.mxu0  ;;  %v439_v15 = vpop.f32.mrf.mxu1  ;;  %v508_v22 = vmul.f32 %v1060_v26, %v457_v12  ;;  %v516_v23 = vmul.f32 %v1060_v26, %v477_v13 }
  0xe1   : > { %930 = vst [vmem:[%s1082_s19 + $0x70] sm:$0xff] %v910_v11   ;;  %v493_v18 = vmul.f32 %v1060_v26, %v419_v14  ;;  %v501_v19 = vmul.f32 %v1060_v26, %v439_v15 }
  0xe2   : > { %v544_v34 = vadd.f32 %v1066_v28, %v508_v22  ;;  %v552_v35 = vadd.f32 %v1066_v28, %v516_v23 }
  0xe3   : > { %v529_v20 = vadd.f32 %v1066_v28, %v493_v18  ;;  %v537_v21 = vadd.f32 %v1066_v28, %v501_v19 }
  0xe4   : > { %v576_v40 = vmax.f32 %v544_v34, 0.0  ;;  %v584_v41 = vmax.f32 %v552_v35, 0.0 }
  0xe5   : > { %v561_v27 = vmax.f32 %v529_v20, 0.0  ;;  %v569_v29 = vmax.f32 %v537_v21, 0.0 }
  0xe7   : > { %v855_v30 = vpack.c.bf16 %v561_v27, %v560_v24  ;;  %v875_v31 = vpack.c.bf16 %v569_v29, %v568_v25  ;;  %v459_v32 = vpop.f32.mrf.mxu2  ;;  %v479_v33 = vpop.f32.mrf.mxu3 }
  0xe8   : > { %v509_v36 = vmul.f32 %v1060_v26, %v459_v32  ;;  %v517_v37 = vmul.f32 %v1060_v26, %v479_v33 }
  0xe9   : > { %919 = vst [vmem:[%s1082_s19 + $0x18] sm:$0xff] %v855_v30  }
  0xea   : > { %923 = vst [vmem:[%s1082_s19 + $0x38] sm:$0xff] %v875_v31   ;;  %v545_v38 = vadd.f32 %v1066_v28, %v509_v36  ;;  %v553_v39 = vadd.f32 %v1066_v28, %v517_v37 }
  0xec   : > { %v577_v42 = vmax.f32 %v545_v38, 0.0  ;;  %v585_v43 = vmax.f32 %v553_v39, 0.0 }
  0xee   : > { %v895_v44 = vpack.c.bf16 %v577_v42, %v576_v40  ;;  %v915_v45 = vpack.c.bf16 %v585_v43, %v584_v41 }
  0xf0   : > { %927 = vst [vmem:[%s1082_s19 + $0x58] sm:$0xff] %v895_v44  }
  0xf1   : > { %931 = vst [vmem:[%s1082_s19 + $0x78] sm:$0xff] %v915_v45  }
  0xf2 PF: > { %s14_s15 = sadd.s32 1, %s972_s15  }
  0xf3   : > { %p11_p4 = scmp.ge.s32.totalorder %s14_s15, 4  }
  0xf5   :  { %13 = sbr.rel (!%p11_p4) target bundleno = 1 (0x1), region = 66 }

// kernel: se_bottleneck_forward.6
= control target key start
LH: loop header
LB: loop body
LE: loop exit
PB: predicated region body
PF: predicated region fallthrough
CT: control target
= control target key end

     0   :  { %s945_s18 = smov 0   ;;  %s947_s19 = smov 0   ;;  %s1059_s0 = inlined_call_operand.vmem [shape: bf16[2,256,128], index: 0, kind: input, shape index: {}]   ;;  %s1060_s1 = inlined_call_operand.vmem [shape: bf16[128,128], index: 1, kind: input, shape index: {}]   ;;  %s1061_s2 = inlined_call_operand.vmem [shape: f32[1,128], index: 2, kind: input, shape index: {}]   ;;  %s1062_s3 = inlined_call_operand.vmem [shape: f32[1,128], index: 3, kind: input, shape index: {}]   ;;  %s1063_s4 = inlined_call_operand.vmem [shape: bf16[2,256,128], index: 4, kind: output, shape index: {0}]   ;;  %s1064_s5 = inlined_call_operand.vmem [shape: f32[2,1,128], index: 5, kind: output, shape index: {1}]  }
   0x1   :  { %s949_s20 = smov 0   ;;  %s951_s21 = smov 0  }
   0x2   :  { %s953_s22 = smov 0  }
   0x3 LB: > { %s25_s23 = sadd.s32 1, %s904_s20  ;;  %s28_s24 = sadd.s32 1, %s908_s21  ;;  %s912_s22 = sphi %s953_s22, %s16_s22   ;;  %s908_s21 = sphi %s951_s21, %s1068_s21   ;;  %s904_s20 = sphi %s949_s20, %s1067_s20   ;;  %s900_s19 = sphi %s947_s19, %s1066_s19   ;;  %s896_s18 = sphi %s945_s18, %s1065_s18  }
   0x4   : > { %p26_p0 = scmp.ge.s32.totalorder %s25_s23, 2  ;;  %p670_p1 = scmp.ge.s32.totalorder %s912_s22, 1 }
   0x5   : > { %p211_p2 = scmp.lt.s32.totalorder %s912_s22, 5 }
   0x6   : > { %s1070_s23 = smov (%p26_p0, %s25_s23), 0  ;;  %s1072_s24 = smov (!%p26_p0, %s28_s24), %s908_s21 }
   0x7   : > { %p212_p3 = pnand %p670_p1, %p211_p2  ;;  %p30_p4 = scmp.ge.s32.totalorder %s1072_s24, 2 }
   0x8   : > { %p251_p5 = scmp.lt.s32.totalorder (!%p212_p3), %s900_s19, 1  ;;  %s671_s9 = sshll.u32 (!%p212_p3), %s896_s18, 4 }
   0x9   : > { %s1074_s24 = smov (%p30_p4, %s1072_s24), 0  ;;  %215 = sbr.rel (%p212_p3) target bundleno = 258 (0x102), region = 36 }
   0xa   : > { %p253_p6 = scmp.lt.s32.totalorder (!%p212_p3), %s671_s9, 31  ;;  %p741_p7 = scmp.ne.s32.totalorder (!%p212_p3), %s896_s18, 0 }
   0xe   : > { %v759_v0 = vld [vmem:[%s1060_s1 + $0x38] sm:$0xff]  ;;  %v758_v1 = vld [vmem:[%s1060_s1 + $0x30] sm:$0xff]  ;;  %s1076_s19 = smov (!%p251_p5, %s900_s19), 1  ;;  %v757_v2 = vld [vmem:[%s1060_s1 + $0x28] sm:$0xff]  ;;  %s1078_s9 = smov (!%p253_p6, %s671_s9), 31 }
   0xf   : > { %401 = vmatpush.bf16.msra.mxu0 %v759_v0  ;;  %807 = vmatpush.bf16.msra.mxu1 %v759_v0  ;;  %s989_s6 = scalar_lea.vmem %s1064_s5, %s1076_s19  ;;  %v756_v3 = vld [vmem:[%s1060_s1 + $0x20] sm:$0xff]  ;;  %v755_v4 = vld [vmem:[%s1060_s1 + $0x18] sm:$0xff]  ;;  %s672_s14 = sshll.u32 %s1076_s19, 5  ;;  %v754_v5 = vld [vmem:[%s1060_s1 + $0x10] sm:$0xff] }
  0x10   : > { %808 = vmatpush.bf16.msra.mxu2 %v759_v0  ;;  %809 = vmatpush.bf16.msra.mxu3 %v759_v0  ;;  %s1005_s17 = sadd.s32 %s672_s14, %s1078_s9  ;;  %v753_v6 = vld [vmem:[%s1060_s1 + $0x8] sm:$0xff]  ;;  %v752_v7 = vld [vmem:[%s1060_s1] sm:$0xff] }
  0x11   : > { %s673_s19 = sshll.u32 %s1005_s17, 2  ;;  %v872_v18 = vld [vmem:[%s1061_s2] ss:$0 sm:$0xff] }
  0x12   : > { %s258_s7 = scalar_lea.vmem %s1059_s0, %s673_s19  ;;  %v873_v20 = vld [vmem:[%s1062_s3] ss:$0 sm:$0xff]  ;;  %s1030_s14 = scalar_lea.vmem %s1063_s4, %s673_s19 }
  0x13   : > { %402 = vmatpush.bf16.msra.mxu0 %v758_v1  ;;  %810 = vmatpush.bf16.msra.mxu1 %v758_v1  ;;  %v744_v8 = vld [vmem:[%s258_s7] sm:$0xff]  ;;  %v746_v9 = vld [vmem:[%s258_s7 + $0x10] sm:$0xff]  ;;  %v745_v12 = vld [vmem:[%s258_s7 + $0x8] sm:$0xff] }
  0x14   : > { %811 = vmatpush.bf16.msra.mxu2 %v758_v1  ;;  %812 = vmatpush.bf16.msra.mxu3 %v758_v1  ;;  %v748_v10 = vld [vmem:[%s258_s7 + $0x20] sm:$0xff]  ;;  %v750_v11 = vld [vmem:[%s258_s7 + $0x30] sm:$0xff]  ;;  %v747_v13 = vld [vmem:[%s258_s7 + $0x18] sm:$0xff] }
  0x15   : > { %v749_v14 = vld [vmem:[%s258_s7 + $0x28] sm:$0xff]  ;;  %v751_v15 = vld [vmem:[%s258_s7 + $0x38] sm:$0xff] }
  0x17   : > { %403 = vmatpush.bf16.msra.mxu0 %v757_v2  ;;  %813 = vmatpush.bf16.msra.mxu1 %v757_v2 }
  0x18   : > { %814 = vmatpush.bf16.msra.mxu2 %v757_v2  ;;  %815 = vmatpush.bf16.msra.mxu3 %v757_v2 }
  0x1b   : > { %404 = vmatpush.bf16.msra.mxu0 %v756_v3  ;;  %816 = vmatpush.bf16.msra.mxu1 %v756_v3 }
  0x1c   : > { %817 = vmatpush.bf16.msra.mxu2 %v756_v3  ;;  %818 = vmatpush.bf16.msra.mxu3 %v756_v3 }
  0x1f   : > { %405 = vmatpush.bf16.msra.mxu0 %v755_v4  ;;  %819 = vmatpush.bf16.msra.mxu1 %v755_v4 }
  0x20   : > { %820 = vmatpush.bf16.msra.mxu2 %v755_v4  ;;  %821 = vmatpush.bf16.msra.mxu3 %v755_v4 }
  0x23   : > { %406 = vmatpush.bf16.msra.mxu0 %v754_v5  ;;  %822 = vmatpush.bf16.msra.mxu1 %v754_v5 }
  0x24   : > { %823 = vmatpush.bf16.msra.mxu2 %v754_v5  ;;  %824 = vmatpush.bf16.msra.mxu3 %v754_v5 }
  0x27   : > { %407 = vmatpush.bf16.msra.mxu0 %v753_v6  ;;  %825 = vmatpush.bf16.msra.mxu1 %v753_v6 }
  0x28   : > { %826 = vmatpush.bf16.msra.mxu2 %v753_v6  ;;  %827 = vmatpush.bf16.msra.mxu3 %v753_v6 }
  0x2b   : > { %408 = vmatpush.bf16.msra.mxu0 %v752_v7  ;;  %828 = vmatpush.bf16.msra.mxu1 %v752_v7 }
  0x2c   : > { %829 = vmatpush.bf16.msra.mxu2 %v752_v7  ;;  %830 = vmatpush.bf16.msra.mxu3 %v752_v7 }
  0x2e   : > { %409 = vmatmul.bf16.vlgmr.msra.gmra.mxu0 %v744_v8  ;;  %419 = vmatmul.bf16.vlgmr.msra.gmra.mxu1 %v746_v9 }
  0x2f   : > { %429 = vmatmul.bf16.vlgmr.msra.gmra.mxu2 %v748_v10  ;;  %439 = vmatmul.bf16.vlgmr.msra.gmra.mxu3 %v750_v11 }
  0x3e   : > { %414 = vmatmul.bf16.gmra.mxu0 %v745_v12  ;;  %424 = vmatmul.bf16.gmra.mxu1 %v747_v13 }
  0x3f   : > { %434 = vmatmul.bf16.gmra.mxu2 %v749_v14  ;;  %444 = vmatmul.bf16.gmra.mxu3 %v751_v15 }
  0xab   : > { %v410_v16 = vpop.f32.mrf.mxu0  ;;  %v420_v17 = vpop.f32.mrf.mxu1 }
  0xac   : > { %v454_v19 = vmul.f32 %v872_v18, %v410_v16  ;;  %v458_v21 = vmul.f32 %v872_v18, %v420_v17 }
  0xae   : > { %v474_v28 = vadd.f32 %v873_v20, %v454_v19  ;;  %v478_v29 = vadd.f32 %v873_v20, %v458_v21 }
  0xb2   : > { %v430_v22 = vpop.f32.mrf.mxu2  ;;  %v440_v23 = vpop.f32.mrf.mxu3 }
  0xb3   : > { %v412_v24 = vpop.f32.mrf.mxu0  ;;  %v422_v25 = vpop.f32.mrf.mxu1  ;;  %v462_v34 = vmul.f32 %v872_v18, %v430_v22  ;;  %v466_v35 = vmul.f32 %v872_v18, %v440_v23 }
  0xb4   : > { %v455_v26 = vmul.f32 %v872_v18, %v412_v24  ;;  %v459_v27 = vmul.f32 %v872_v18, %v422_v25 }
  0xb5   : > { %v482_v42 = vadd.f32 %v873_v20, %v462_v34  ;;  %v486_v43 = vadd.f32 %v873_v20, %v466_v35 }
  0xb6   : > { %v475_v30 = vadd.f32 %v873_v20, %v455_v26  ;;  %v479_v31 = vadd.f32 %v873_v20, %v459_v27 }
  0xb8   : > { %v763_v32 = vpack.c.bf16 %v475_v30, %v474_v28  ;;  %v773_v33 = vpack.c.bf16 %v479_v31, %v478_v29 }
  0xba   : > { %764 = vst [vmem:[%s1030_s14] sm:$0xff] %v763_v32   ;;  %v432_v36 = vpop.f32.mrf.mxu2  ;;  %v442_v37 = vpop.f32.mrf.mxu3 }
  0xbb   : > { %801 = vst [vmem:[%s1030_s14 + $0x10] sm:$0xff] %v773_v33   ;;  %v463_v38 = vmul.f32 %v872_v18, %v432_v36  ;;  %v467_v39 = vmul.f32 %v872_v18, %v442_v37  ;;  %v415_v40 = vpop.f32.mrf.mxu0  ;;  %v425_v41 = vpop.f32.mrf.mxu1 }
  0xbc   : > { %v456_v48 = vmul.f32 %v872_v18, %v415_v40  ;;  %v460_v49 = vmul.f32 %v872_v18, %v425_v41 }
  0xbd   : > { %v483_v44 = vadd.f32 %v873_v20, %v463_v38  ;;  %v487_v45 = vadd.f32 %v873_v20, %v467_v39 }
  0xbe   : > { %v476_v56 = vadd.f32 %v873_v20, %v456_v48  ;;  %v480_v57 = vadd.f32 %v873_v20, %v460_v49 }
  0xbf   : > { %v783_v46 = vpack.c.bf16 %v483_v44, %v482_v42  ;;  %v793_v47 = vpack.c.bf16 %v487_v45, %v486_v43 }
  0xc1   : > { %803 = vst [vmem:[%s1030_s14 + $0x20] sm:$0xff] %v783_v46  }
  0xc2   : > { %805 = vst [vmem:[%s1030_s14 + $0x30] sm:$0xff] %v793_v47   ;;  %v435_v50 = vpop.f32.mrf.mxu2  ;;  %v445_v51 = vpop.f32.mrf.mxu3 }
  0xc3   : > { %v417_v52 = vpop.f32.mrf.mxu0  ;;  %v427_v53 = vpop.f32.mrf.mxu1  ;;  %v464_v62 = vmul.f32 %v872_v18, %v435_v50  ;;  %v468_v63 = vmul.f32 %v872_v18, %v445_v51 }
  0xc4   : > { %v457_v54 = vmul.f32 %v872_v18, %v417_v52  ;;  %v461_v55 = vmul.f32 %v872_v18, %v427_v53 }
  0xc5   : > { %v484_v4 = vadd.f32 %v873_v20, %v464_v62  ;;  %v488_v5 = vadd.f32 %v873_v20, %v468_v63 }
  0xc6   : > { %v477_v58 = vadd.f32 %v873_v20, %v457_v54  ;;  %v481_v59 = vadd.f32 %v873_v20, %v461_v55 }
  0xc8   : > { %v768_v60 = vpack.c.bf16 %v477_v58, %v476_v56  ;;  %v778_v61 = vpack.c.bf16 %v481_v59, %v480_v57 }
  0xca   : > { %800 = vst [vmem:[%s1030_s14 + $0x8] sm:$0xff] %v768_v60   ;;  %v437_v0 = vpop.f32.mrf.mxu2  ;;  %v447_v1 = vpop.f32.mrf.mxu3 }
  0xcb   : > { %802 = vst [vmem:[%s1030_s14 + $0x18] sm:$0xff] %v778_v61   ;;  %v465_v2 = vmul.f32 %v872_v18, %v437_v0  ;;  %v469_v3 = vmul.f32 %v872_v18, %v447_v1 }
  0xcd   : > { %v485_v6 = vadd.f32 %v873_v20, %v465_v2  ;;  %v489_v7 = vadd.f32 %v873_v20, %v469_v3 }
  0xce   : > { %525 = sbr.rel (%p741_p7) target bundleno = 213 (0xd5), region = 40 }
  0xcf   : > { %v788_v8 = vpack.c.bf16 %v485_v6, %v484_v4  ;;  %v798_v9 = vpack.c.bf16 %v489_v7, %v488_v5 }
  0xd1   : > { %804 = vst [vmem:[%s1030_s14 + $0x28] sm:$0xff] %v788_v8  }
  0xd2   : > { %806 = vst [vmem:[%s1030_s14 + $0x38] sm:$0xff] %v798_v9  }
  0xd3   : > { %v914_v10 = vmov 0.0  }
  0xd4   : > { %526 = vst [vmem:[%s989_s6] sm:$0x1] %v914_v10 }
  0xd5 PF: > { %v528_v11 = vadd.f32 %v475_v30, %v474_v28 }
  0xd7   : > { %v529_v12 = vadd.f32 %v528_v11, %v476_v56 }
  0xd9   : > { %v530_v13 = vadd.f32 %v529_v12, %v477_v58 }
  0xdb   : > { %v531_v14 = vadd.f32 %v530_v13, %v478_v29  ;;  %v527_v33 = vld [vmem:[%s989_s6] sm:$0x1] }
  0xdd   : > { %v532_v15 = vadd.f32 %v531_v14, %v479_v31 }
  0xdf   : > { %v533_v16 = vadd.f32 %v532_v15, %v480_v57 }
  0xe1   : > { %v534_v17 = vadd.f32 %v533_v16, %v481_v59 }
  0xe3   : > { %v535_v18 = vadd.f32 %v534_v17, %v482_v42 }
  0xe5   : > { %v536_v19 = vadd.f32 %v535_v18, %v483_v44 }
  0xe7   : > { %v537_v20 = vadd.f32 %v536_v19, %v484_v4 }
  0xe9   : > { %v538_v21 = vadd.f32 %v537_v20, %v485_v6 }
  0xeb   : > { %v539_v22 = vadd.f32 %v538_v21, %v486_v43 }
  0xed   : > { %v540_v23 = vadd.f32 %v539_v22, %v487_v45 }
  0xef   : > { %v541_v24 = vadd.f32 %v540_v23, %v488_v5 }
  0xf1   : > { %v542_v25 = vadd.f32 %v541_v24, %v489_v7 }
  0xf3   : > { %v543_v26 = vrot.slane %v542_v25, 4 }
  0xf5   : > { %v544_v27 = vadd.f32 %v543_v26, %v542_v25 }
  0xf7   : > { %v545_v32 = vrot.slane %v544_v27, 2 }
  0xf9   : > { %v546_v28 = vadd.f32 %v545_v32, %v544_v27 }
  0xfb   : > { %v547_v30 = vrot.slane %v546_v28, 1 }
  0xfd   : > { %v548_v29 = vadd.f32 %v547_v30, %v546_v28 }
  0xff   : > { %v549_v31 = vadd.f32 %v548_v29, %v527_v33 }
 0x101   : > { %550 = vst [vmem:[%s989_s6] sm:$0x1] %v549_v31 }
 0x102 PF: > { %s16_s22 = sadd.s32 1, %s912_s22   ;;  %s1065_s18 = smov %s904_s20 }
 0x103   : > { %p13_p8 = scmp.ge.s32.totalorder %s16_s22, 6   ;;  %s1066_s19 = smov %s908_s21 }
 0x104   : > { %s1067_s20 = smov %s1070_s23  ;;  %s1068_s21 = smov %s1074_s24 }
 0x105   :  { %15 = sbr.rel (!%p13_p8) target bundleno = 3 (0x3), region = 82 }

// kernel: se_bottleneck_forward.7
= control target key start
LH: loop header
LB: loop body
LE: loop exit
PB: predicated region body
PF: predicated region fallthrough
CT: control target
= control target key end

     0   :  { %s721_s12 = smov 0   ;;  %s723_s13 = smov 0   ;;  %s855_s0 = inlined_call_operand.vmem [shape: bf16[2,256,128], index: 0, kind: input, shape index: {}]   ;;  %s856_s1 = inlined_call_operand.vmem [shape: bf16[2,256,128], index: 1, kind: input, shape index: {}]   ;;  %s857_s2 = inlined_call_operand.vmem [shape: f32[2,1,128], index: 2, kind: input, shape index: {}]   ;;  %s858_s3 = inlined_call_operand.vmem [shape: bf16[2,256,16], index: 3, kind: output, shape index: {}]  }
   0x1   :  { %s725_s14 = smov 0   ;;  %s727_s15 = smov 0  }
   0x2   :  { %s729_s16 = smov 0  }
   0x3 LB: > { %s22_s17 = sadd.s32 1, %s691_s14  ;;  %s25_s18 = sadd.s32 1, %s695_s15  ;;  %s699_s16 = sphi %s729_s16, %s13_s16   ;;  %s695_s15 = sphi %s727_s15, %s862_s15   ;;  %s691_s14 = sphi %s725_s14, %s861_s14   ;;  %s687_s13 = sphi %s723_s13, %s860_s13   ;;  %s683_s12 = sphi %s721_s12, %s859_s12  }
   0x4   : > { %p23_p0 = scmp.ge.s32.totalorder %s22_s17, 2  ;;  %p530_p1 = scmp.ge.s32.totalorder %s699_s16, 1 }
   0x5   : > { %p183_p2 = scmp.lt.s32.totalorder %s699_s16, 5 }
   0x6   : > { %s864_s17 = smov (%p23_p0, %s22_s17), 0  ;;  %s866_s18 = smov (!%p23_p0, %s25_s18), %s695_s15 }
   0x7   : > { %p184_p3 = pnand %p530_p1, %p183_p2  ;;  %p27_p4 = scmp.ge.s32.totalorder %s866_s18, 2 }
   0x8   : > { %s531_s19 = sshll.u32 (!%p184_p3), %s683_s12, 4  ;;  %p228_p5 = scmp.lt.s32.totalorder (!%p184_p3), %s687_s13, 1 }
   0x9   : > { %s868_s18 = smov (%p27_p4, %s866_s18), 0  ;;  %187 = sbr.rel (%p184_p3) target bundleno = 51 (0x33), region = 32 }
   0xa   : > { %p230_p6 = scmp.lt.s32.totalorder (!%p184_p3), %s531_s19, 31 }
   0xe   : > { %s870_s13 = smov (!%p228_p5, %s687_s13), 1  ;;  %s872_s19 = smov (!%p230_p6, %s531_s19), 31  ;;  %vm392_vm0 = vcmask 125952  }
   0xf   : > { %s532_s20 = sshll.u32 %s870_s13, 5  ;;  %s249_s23 = scalar_lea.vmem %s857_s2, %s870_s13 }
  0x10   : > { %s233_s24 = sadd.s32 %s532_s20, %s872_s19  ;;  %v768_v0 = vld [vmem:[%s249_s23] ss:$0 sm:$0xff] }
  0x11   : > { %s754_s25 = sshll.u32 %s233_s24, 2 }
  0x12   : > { %s760_s28 = scalar_lea.vmem %s855_s0, %s754_s25  ;;  %s766_s4 = scalar_lea.vmem %s856_s1, %s754_s25 }
  0x13   : > { %v543_v1 = vld [vmem:[%s760_s28] sm:$0xff]   ;;  %v606_v3 = vld [vmem:[%s760_s28 + $0x8] sm:$0xff]   ;;  %v607_v9 = vld [vmem:[%s760_s28 + $0x10] sm:$0xff]   ;;  %s789_s7 = scalar_lea.vmem %s858_s3, %s754_s25 }
  0x14   : > { %v575_v2 = vld [vmem:[%s766_s4] sm:$0xff]   ;;  %v544_v4 = vunpack.c.l.bf16 %v543_v1  ;;  %v545_v6 = vunpack.c.h.bf16 %v543_v1  ;;  %v613_v8 = vld [vmem:[%s766_s4 + $0x8] sm:$0xff]   ;;  %v614_v10 = vld [vmem:[%s766_s4 + $0x10] sm:$0xff]   ;;  %v548_v11 = vunpack.c.l.bf16 %v606_v3  ;;  %v549_v13 = vunpack.c.h.bf16 %v606_v3 }
  0x15   : > { %v576_v5 = vunpack.c.l.bf16 %v575_v2  ;;  %v577_v7 = vunpack.c.h.bf16 %v575_v2  ;;  %v580_v12 = vunpack.c.l.bf16 %v613_v8  ;;  %v581_v14 = vunpack.c.h.bf16 %v613_v8  ;;  %v608_v15 = vld [vmem:[%s760_s28 + $0x18] sm:$0xff]   ;;  %v609_v41 = vld [vmem:[%s760_s28 + $0x20] sm:$0xff]   ;;  %v610_v51 = vld [vmem:[%s760_s28 + $0x28] sm:$0xff]  }
  0x16   : > { %v328_v16 = vmul.f32 %v768_v0, %v544_v4  ;;  %v329_v17 = vmul.f32 %v768_v0, %v545_v6  ;;  %v552_v18 = vunpack.c.l.bf16 %v607_v9  ;;  %v584_v19 = vunpack.c.l.bf16 %v614_v10  ;;  %v615_v20 = vld [vmem:[%s766_s4 + $0x18] sm:$0xff]   ;;  %v616_v46 = vld [vmem:[%s766_s4 + $0x20] sm:$0xff]   ;;  %v617_v56 = vld [vmem:[%s766_s4 + $0x28] sm:$0xff]  }
  0x17   : > { %v330_v21 = vmul.f32 %v768_v0, %v548_v11  ;;  %v331_v22 = vmul.f32 %v768_v0, %v549_v13  ;;  %v553_v23 = vunpack.c.h.bf16 %v607_v9  ;;  %v585_v24 = vunpack.c.h.bf16 %v614_v10  ;;  %v611_v61 = vld [vmem:[%s760_s28 + $0x30] sm:$0xff]  }
  0x18   : > { %v344_v25 = vadd.f32 %v576_v5, %v328_v16  ;;  %v345_v26 = vadd.f32 %v577_v7, %v329_v17  ;;  %v332_v27 = vmul.f32 %v768_v0, %v552_v18  ;;  %v556_v28 = vunpack.c.l.bf16 %v608_v15  ;;  %v618_v3 = vld [vmem:[%s766_s4 + $0x30] sm:$0xff]   ;;  %v612_v16 = vld [vmem:[%s760_s28 + $0x38] sm:$0xff]  }
  0x19   : > { %v346_v29 = vadd.f32 %v580_v12, %v330_v21  ;;  %v347_v30 = vadd.f32 %v581_v14, %v331_v22  ;;  %v333_v31 = vmul.f32 %v768_v0, %v553_v23  ;;  %v588_v32 = vunpack.c.l.bf16 %v615_v20  ;;  %v619_v21 = vld [vmem:[%s766_s4 + $0x38] sm:$0xff]  }
  0x1a   : > { %v360_v33 = vmax.f32 %v344_v25, 0.0  ;;  %v361_v34 = vmax.f32 %v345_v26, 0.0  ;;  %v348_v35 = vadd.f32 %v584_v19, %v332_v27  ;;  %v334_v36 = vmul.f32 %v768_v0, %v556_v28 }
  0x1b   : > { %v362_v37 = vmax.f32 %v346_v29, 0.0  ;;  %v363_v38 = vmax.f32 %v347_v30, 0.0  ;;  %v349_v39 = vadd.f32 %v585_v24, %v333_v31  ;;  %v557_v40 = vunpack.c.h.bf16 %v608_v15 }
  0x1c   : > { %v376_v42 = vpack.c.bf16 %v360_v33, %v360_v33  ;;  %v377_v43 = vpack.c.bf16 %v361_v34, %v361_v34  ;;  %v364_v44 = vmax.f32 %v348_v35, 0.0  ;;  %v350_v45 = vadd.f32 %v588_v32, %v334_v36 }
  0x1d   : > { %v378_v47 = vpack.c.bf16 %v362_v37, %v362_v37  ;;  %v379_v48 = vpack.c.bf16 %v363_v38, %v363_v38  ;;  %v365_v49 = vmax.f32 %v349_v39, 0.0  ;;  %v589_v50 = vunpack.c.h.bf16 %v615_v20 }
  0x1e   : > { %393 = vst.msk [vmem:[%s789_s7] sm:$0xf] %vm392_vm0, %v376_v42  ;;  %v380_v52 = vpack.c.bf16 %v364_v44, %v364_v44  ;;  %v366_v53 = vmax.f32 %v350_v45, 0.0  ;;  %v335_v54 = vmul.f32 %v768_v0, %v557_v40  ;;  %v560_v55 = vunpack.c.l.bf16 %v609_v41 }
  0x1f   : > { %394 = vst.msk [vmem:[%s789_s7 + $0x4] sm:$0xf] %vm392_vm0, %v377_v43  ;;  %v381_v57 = vpack.c.bf16 %v365_v49, %v365_v49  ;;  %v592_v58 = vunpack.c.l.bf16 %v616_v46  ;;  %v561_v59 = vunpack.c.h.bf16 %v609_v41  ;;  %v593_v60 = vunpack.c.h.bf16 %v616_v46 }
  0x20   : > { %395 = vst.msk [vmem:[%s789_s7 + $0x8] sm:$0xf] %vm392_vm0, %v378_v47  ;;  %v382_v62 = vpack.c.bf16 %v366_v53, %v366_v53  ;;  %v351_v63 = vadd.f32 %v589_v50, %v335_v54  ;;  %v336_v1 = vmul.f32 %v768_v0, %v560_v55  ;;  %v564_v2 = vunpack.c.l.bf16 %v610_v51 }
  0x21   : > { %396 = vst.msk [vmem:[%s789_s7 + $0xc] sm:$0xf] %vm392_vm0, %v379_v48  ;;  %v337_v4 = vmul.f32 %v768_v0, %v561_v59  ;;  %v596_v5 = vunpack.c.l.bf16 %v617_v56  ;;  %v565_v6 = vunpack.c.h.bf16 %v610_v51  ;;  %v597_v7 = vunpack.c.h.bf16 %v617_v56 }
  0x22   : > { %397 = vst.msk [vmem:[%s789_s7 + $0x10] sm:$0xf] %vm392_vm0, %v380_v52  ;;  %v367_v8 = vmax.f32 %v351_v63, 0.0  ;;  %v352_v9 = vadd.f32 %v592_v58, %v336_v1  ;;  %v338_v10 = vmul.f32 %v768_v0, %v564_v2  ;;  %v568_v11 = vunpack.c.l.bf16 %v611_v61 }
  0x23   : > { %398 = vst.msk [vmem:[%s789_s7 + $0x14] sm:$0xf] %vm392_vm0, %v381_v57  ;;  %v353_v12 = vadd.f32 %v593_v60, %v337_v4  ;;  %v339_v13 = vmul.f32 %v768_v0, %v565_v6  ;;  %v600_v14 = vunpack.c.l.bf16 %v618_v3  ;;  %v569_v15 = vunpack.c.h.bf16 %v611_v61 }
  0x24   : > { %399 = vst.msk [vmem:[%s789_s7 + $0x18] sm:$0xf] %vm392_vm0, %v382_v62  ;;  %v383_v17 = vpack.c.bf16 %v367_v8, %v367_v8  ;;  %v368_v18 = vmax.f32 %v352_v9, 0.0  ;;  %v354_v19 = vadd.f32 %v596_v5, %v338_v10  ;;  %v340_v20 = vmul.f32 %v768_v0, %v568_v11 }
  0x25   : > { %v369_v22 = vmax.f32 %v353_v12, 0.0  ;;  %v355_v23 = vadd.f32 %v597_v7, %v339_v13  ;;  %v601_v24 = vunpack.c.h.bf16 %v618_v3  ;;  %v341_v25 = vmul.f32 %v768_v0, %v569_v15 }
  0x26   : > { %400 = vst.msk [vmem:[%s789_s7 + $0x1c] sm:$0xf] %vm392_vm0, %v383_v17  ;;  %v384_v26 = vpack.c.bf16 %v368_v18, %v368_v18  ;;  %v370_v27 = vmax.f32 %v354_v19, 0.0  ;;  %v356_v28 = vadd.f32 %v600_v14, %v340_v20  ;;  %v572_v29 = vunpack.c.l.bf16 %v612_v16 }
  0x27   : > { %v385_v30 = vpack.c.bf16 %v369_v22, %v369_v22  ;;  %v371_v31 = vmax.f32 %v355_v23, 0.0  ;;  %v357_v32 = vadd.f32 %v601_v24, %v341_v25  ;;  %v604_v33 = vunpack.c.l.bf16 %v619_v21 }
  0x28   : > { %401 = vst.msk [vmem:[%s789_s7 + $0x20] sm:$0xf] %vm392_vm0, %v384_v26  ;;  %v386_v34 = vpack.c.bf16 %v370_v27, %v370_v27  ;;  %v372_v35 = vmax.f32 %v356_v28, 0.0  ;;  %v342_v36 = vmul.f32 %v768_v0, %v572_v29  ;;  %v573_v37 = vunpack.c.h.bf16 %v612_v16 }
  0x29   : > { %402 = vst.msk [vmem:[%s789_s7 + $0x24] sm:$0xf] %vm392_vm0, %v385_v30  ;;  %v387_v38 = vpack.c.bf16 %v371_v31, %v371_v31  ;;  %v373_v39 = vmax.f32 %v357_v32, 0.0  ;;  %v605_v40 = vunpack.c.h.bf16 %v619_v21 }
  0x2a   : > { %403 = vst.msk [vmem:[%s789_s7 + $0x28] sm:$0xf] %vm392_vm0, %v386_v34  ;;  %v388_v41 = vpack.c.bf16 %v372_v35, %v372_v35  ;;  %v358_v42 = vadd.f32 %v604_v33, %v342_v36  ;;  %v343_v43 = vmul.f32 %v768_v0, %v573_v37 }
  0x2b   : > { %404 = vst.msk [vmem:[%s789_s7 + $0x2c] sm:$0xf] %vm392_vm0, %v387_v38  ;;  %v389_v44 = vpack.c.bf16 %v373_v39, %v373_v39 }
  0x2c   : > { %405 = vst.msk [vmem:[%s789_s7 + $0x30] sm:$0xf] %vm392_vm0, %v388_v41  ;;  %v374_v45 = vmax.f32 %v358_v42, 0.0  ;;  %v359_v46 = vadd.f32 %v605_v40, %v343_v43 }
  0x2d   : > { %406 = vst.msk [vmem:[%s789_s7 + $0x34] sm:$0xf] %vm392_vm0, %v389_v44 }
  0x2e   : > { %v390_v47 = vpack.c.bf16 %v374_v45, %v374_v45  ;;  %v375_v48 = vmax.f32 %v359_v46, 0.0 }
  0x30   : > { %407 = vst.msk [vmem:[%s789_s7 + $0x38] sm:$0xf] %vm392_vm0, %v390_v47  ;;  %v391_v49 = vpack.c.bf16 %v375_v48, %v375_v48 }
  0x32   : > { %408 = vst.msk [vmem:[%s789_s7 + $0x3c] sm:$0xf] %vm392_vm0, %v391_v49 }
  0x33 PF: > { %s13_s16 = sadd.s32 1, %s699_s16   ;;  %s859_s12 = smov %s691_s14 }
  0x34   : > { %p10_p7 = scmp.ge.s32.totalorder %s13_s16, 6   ;;  %s860_s13 = smov %s695_s15 }
  0x35   : > { %s861_s14 = smov %s864_s17  ;;  %s862_s15 = smov %s868_s18 }
  0x36   :  { %12 = sbr.rel (!%p10_p7) target bundleno = 3 (0x3), region = 68 }

// kernel: se_bottleneck_forward.5
= control target key start
LH: loop header
LB: loop body
LE: loop exit
PB: predicated region body
PF: predicated region fallthrough
CT: control target
= control target key end

     0   :  { %s3848_s15 = smov 0   ;;  %s3850_s16 = smov 0   ;;  %s4786_s0 = inlined_call_operand.vmem [shape: bf16[2,256,128], index: 0, kind: input, shape index: {}]   ;;  %s4787_s1 = inlined_call_operand.vmem [shape: bf16[3,384,128], index: 1, kind: input, shape index: {}]   ;;  %s4788_s2 = inlined_call_operand.vmem [shape: f32[1,128], index: 2, kind: input, shape index: {}]   ;;  %s4789_s3 = inlined_call_operand.vmem [shape: f32[1,128], index: 3, kind: input, shape index: {}]   ;;  %s4790_s4 = inlined_call_operand.vmem [shape: bf16[2,256,128], index: 4, kind: output, shape index: {}]  }
   0x1   :  { %s3852_s17 = smov 0   ;;  %s3854_s18 = smov 0  }
   0x2   :  { %s3856_s19 = smov 0  }
   0x3 LB: > { %s23_s20 = sadd.s32 1, %s3812_s17  ;;  %s26_s21 = sadd.s32 1, %s3816_s18  ;;  %s3820_s19 = sphi %s3856_s19, %s14_s19   ;;  %s3816_s18 = sphi %s3854_s18, %s4851_s18   ;;  %s3812_s17 = sphi %s3852_s17, %s4850_s17   ;;  %s3808_s16 = sphi %s3850_s16, %s4849_s16   ;;  %s3804_s15 = sphi %s3848_s15, %s4848_s15  }
   0x4   : > { %p24_p0 = scmp.ge.s32.totalorder %s23_s20, 2  ;;  %p2865_p1 = scmp.ge.s32.totalorder %s3820_s19, 1 }
   0x5   : > { %p176_p2 = scmp.lt.s32.totalorder %s3820_s19, 5 }
   0x6   : > { %s4853_s20 = smov (%p24_p0, %s23_s20), 0  ;;  %s4855_s21 = smov (!%p24_p0, %s26_s21), %s3816_s18 }
   0x7   : > { %p177_p3 = pnand %p2865_p1, %p176_p2  ;;  %p28_p4 = scmp.ge.s32.totalorder %s4855_s21, 2 }
   0x9   : > { %s4857_s21 = smov (%p28_p4, %s4855_s21), 0  ;;  %180 = sbr.rel (%p177_p3) target bundleno = 701 (0x2bd), region = 36 }
   0xe   : > { %p206_p5 = scmp.lt.s32.totalorder %s3808_s16, 1  ;;  %s2868_s22 = sshll.u32 %s3804_s15, 4  ;;  %v3822_v0 = vmov 0  }
   0xf   : > { %p214_p6 = scmp.lt.s32.totalorder %s2868_s22, 31  ;;  %s2871_s23 = sshll.u32 %s3804_s15, 3  ;;  %224 = vst [vmem:[#allocation2 + $0x8] sm:$0xf] %v3822_v0 }
  0x10   : > { %s4859_s16 = smov (!%p206_p5, %s3808_s16), 1  ;;  %225 = vst [vmem:[#allocation2 + $0xc] sm:$0xf] %v3822_v0  ;;  %s3889_s5 = sadd.s32 4294967295, %s2871_s23 }
  0x11   : > { %s4861_s22 = smov (!%p214_p6, %s2868_s22), 31  ;;  %s3286_s24 = sshll.u32 %s4859_s16, 7  ;;  %226 = vst [vmem:[#allocation2 + $0x10] sm:$0xf] %v3822_v0 }
  0x12   : > { %s2869_s25 = sshll.u32 %s4859_s16, 5  ;;  %s3885_s28 = scalar_lea.vmem %s4786_s0, %s3286_s24  ;;  %227 = vst [vmem:[#allocation2 + $0x14] sm:$0xf] %v3822_v0 }
  0x13   : > { %s217_s29 = sadd.s32 %s2869_s25, %s4861_s22  ;;  %228 = vst [vmem:[#allocation2 + $0x18] sm:$0xf] %v3822_v0  ;;  %p260_p7 = scmp.ge.s32.totalorder %s3889_s5, 0 }
  0x14   : > { %s2870_s30 = sshll.u32 %s217_s29, 2  ;;  %229 = vst [vmem:[#allocation2 + $0x1c] sm:$0xf] %v3822_v0  ;;  %p261_p8 = scmp.lt.s32.totalorder %s3889_s5, 16 }
  0x15   : > { %s3894_s8 = scalar_lea.vmem %s4790_s4, %s2870_s30  ;;  %230 = vst [vmem:[#allocation2 + $0x20] sm:$0xf] %v3822_v0 }
  0x16   : > { %231 = vst [vmem:[#allocation2 + $0x24] sm:$0xf] %v3822_v0  ;;  %p3898_p9 = pnand %p261_p8, %p260_p7 }
  0x17   : > { %232 = vst [vmem:[#allocation2 + $0x28] sm:$0xf] %v3822_v0  ;;  %s2872_s10 = sshll.u32 (!%p3898_p9), %s3889_s5, 4 }
  0x18   : > { %233 = vst [vmem:[#allocation2 + $0x2c] sm:$0xf] %v3822_v0  ;;  %s267_s11 = sshra.s32 (!%p3898_p9), %s2872_s10, 3 }
  0x19   : > { %234 = vst [vmem:[#allocation2 + $0x30] sm:$0xf] %v3822_v0  ;;  %s2873_s12 = sshll.u32 (!%p3898_p9), %s267_s11, 2 }
  0x1a   : > { %235 = vst [vmem:[#allocation2 + $0x34] sm:$0xf] %v3822_v0  ;;  %s270_s13 = scalar_lea.vmem (!%p3898_p9), %s3885_s28, %s2873_s12 }
  0x1b   : > { %236 = vst [vmem:[#allocation2 + $0x38] sm:$0xf] %v3822_v0 }
  0x1c   : > { %237 = vst [vmem:[#allocation2 + $0x3c] sm:$0xf] %v3822_v0 }
  0x1d   : > { %238 = vst [vmem:[#allocation2 + $0x40] sm:$0xf] %v3822_v0 }
  0x1e   : > { %239 = vst [vmem:[#allocation2 + $0x44] sm:$0xf] %v3822_v0 }
  0x1f   : > { %240 = vst [vmem:[#allocation2 + $0x48] sm:$0xf] %v3822_v0 }
  0x20   : > { %241 = vst [vmem:[#allocation2 + $0x4c] sm:$0xf] %v3822_v0 }
  0x21   : > { %242 = vst [vmem:[#allocation2 + $0x50] sm:$0xf] %v3822_v0 }
  0x22   : > { %243 = vst [vmem:[#allocation2 + $0x54] sm:$0xf] %v3822_v0 }
  0x23   : > { %244 = vst [vmem:[#allocation2 + $0x58] sm:$0xf] %v3822_v0 }
  0x24   : > { %245 = vst [vmem:[#allocation2 + $0x5c] sm:$0xf] %v3822_v0 }
  0x25   : > { %246 = vst [vmem:[#allocation2 + $0x60] sm:$0xf] %v3822_v0 }
  0x26   : > { %247 = vst [vmem:[#allocation2 + $0x64] sm:$0xf] %v3822_v0 }
  0x27   : > { %248 = vst [vmem:[#allocation2 + $0x68] sm:$0xf] %v3822_v0 }
  0x28   : > { %249 = vst [vmem:[#allocation2 + $0x6c] sm:$0xf] %v3822_v0 }
  0x29   : > { %250 = vst [vmem:[#allocation2 + $0x70] sm:$0xf] %v3822_v0 }
  0x2a   : > { %251 = vst [vmem:[#allocation2 + $0x74] sm:$0xf] %v3822_v0  ;;  %265 = sbr.rel (%p3898_p9) target bundleno = 54 (0x36), region = 40 }
  0x2b   : > { %252 = vst [vmem:[#allocation2 + $0x78] sm:$0xf] %v3822_v0 }
  0x2c   : > { %253 = vst [vmem:[#allocation2 + $0x7c] sm:$0xf] %v3822_v0 }
  0x2d   : > { %254 = vst [vmem:[#allocation2 + $0x80] sm:$0xf] %v3822_v0 }
  0x2e   : > { %255 = vst [vmem:[#allocation2 + $0x84] sm:$0xf] %v3822_v0 }
  0x2f   : > { %vm275_vm0 = vcmask 1040384   ;;  %vm276_vm1 = vcmask 1044484   ;;  %v271_v1 = vld [vmem:[%s270_s13] sm:$0xf]  ;;  %v272_v2 = vld [vmem:[%s270_s13 + $0x4] sm:$0xf] }
  0x30   : > { %v278_v3 = vrot.slane %v271_v1, 7  ;;  %v280_v4 = vrot.slane %v272_v2, 7  ;;  %vm277_vm2 = vmor %vm275_vm0, %vm276_vm1 }
  0x32   : > { %v279_v5 = vrot.slane %v278_v3, 4  ;;  %286 = vst [vmem:[#allocation2 + $0xc] sm:$0xe] %v278_v3  ;;  %v282_v6 = vrot.slane %v280_v4, 4 }
  0x34   : > { %v281_v7 = vsel %vm277_vm2, %v279_v5, %v280_v4  ;;  %288 = vst [vmem:[#allocation2 + $0x14] sm:$0x1] %v282_v6 }
  0x35   : > { %287 = vst [vmem:[#allocation2 + $0x10] sm:$0xf] %v281_v7 }
  0x36 PF: > { %s3907_s14 = sshll.u32 %s3804_s15, 7  ;;  %s3911_s16 = sadd.s32 8, %s2871_s23  ;;  %vm298_vm3 = vcmask 1040384   ;;  %vm299_vm4 = vcmask 1044484  }
  0x37   : > { %s290_s22 = sshra.s32 %s3907_s14, 3  ;;  %s3288_s24 = sadd.s32 16, %s3907_s14  ;;  %vm3918_vm5 = vmor %vm298_vm3, %vm299_vm4 }
  0x38   : > { %s2875_s25 = sshll.u32 %s290_s22, 2  ;;  %s314_s26 = sshra.s32 %s3288_s24, 3 }
  0x39   : > { %s293_s27 = scalar_lea.vmem %s3885_s28, %s2875_s25  ;;  %s2877_s29 = sshll.u32 %s314_s26, 2 }
  0x3a   : > { %v294_v8 = vld [vmem:[%s293_s27] sm:$0xf]  ;;  %v295_v9 = vld [vmem:[%s293_s27 + $0x4] sm:$0xf]  ;;  %s317_s30 = scalar_lea.vmem %s3885_s28, %s2877_s29  ;;  %s3290_s5 = sadd.s32 32, %s3907_s14 }
  0x3b   : > { %v301_v10 = vrot.slane %v294_v8, 7  ;;  %v303_v11 = vrot.slane %v295_v9, 7  ;;  %v318_v12 = vld [vmem:[%s317_s30] sm:$0xf]  ;;  %v319_v13 = vld [vmem:[%s317_s30 + $0x4] sm:$0xf] }
  0x3c   : > { %v322_v15 = vrot.slane %v318_v12, 7  ;;  %v324_v16 = vrot.slane %v319_v13, 7  ;;  %s335_s15 = sshra.s32 %s3290_s5, 3  ;;  %s3292_s23 = sadd.s32 48, %s3907_s14 }
  0x3d   : > { %v302_v17 = vrot.slane %v301_v10, 4  ;;  %309 = vst [vmem:[#allocation2 + $0x18] sm:$0xe] %v301_v10  ;;  %v305_v18 = vrot.slane %v303_v11, 4  ;;  %s2879_s6 = sshll.u32 %s335_s15, 2  ;;  %s356_s7 = sshra.s32 %s3292_s23, 3 }
  0x3e   : > { %v323_v19 = vrot.slane %v322_v15, 4  ;;  %330 = vst [vmem:[#allocation2 + $0x24] sm:$0xe] %v322_v15  ;;  %v326_v20 = vrot.slane %v324_v16, 4  ;;  %s338_s9 = scalar_lea.vmem %s3885_s28, %s2879_s6  ;;  %s2881_s10 = sshll.u32 %s356_s7, 2 }
  0x3f   : > { %v304_v21 = vsel %vm3918_vm5, %v302_v17, %v303_v11  ;;  %311 = vst [vmem:[#allocation2 + $0x20] sm:$0x1] %v305_v18  ;;  %v339_v22 = vld [vmem:[%s338_s9] sm:$0xf]  ;;  %v340_v23 = vld [vmem:[%s338_s9 + $0x4] sm:$0xf]  ;;  %s359_s11 = scalar_lea.vmem %s3885_s28, %s2881_s10 }
  0x40   : > { %310 = vst [vmem:[#allocation2 + $0x1c] sm:$0xf] %v304_v21  ;;  %v325_v24 = vsel %vm3918_vm5, %v323_v19, %v324_v16  ;;  %v343_v25 = vrot.slane %v339_v22, 7  ;;  %v345_v26 = vrot.slane %v340_v23, 7  ;;  %v360_v27 = vld [vmem:[%s359_s11] sm:$0xf] }
  0x41   : > { %331 = vst [vmem:[#allocation2 + $0x28] sm:$0xf] %v325_v24  ;;  %v361_v28 = vld [vmem:[%s359_s11 + $0x4] sm:$0xf]  ;;  %v364_v29 = vrot.slane %v360_v27, 7  ;;  %s3294_s12 = sadd.s32 64, %s3907_s14 }
  0x42   : > { %332 = vst [vmem:[#allocation2 + $0x2c] sm:$0x1] %v326_v20  ;;  %v344_v30 = vrot.slane %v343_v25, 4  ;;  %v347_v31 = vrot.slane %v345_v26, 4  ;;  %v366_v32 = vrot.slane %v361_v28, 7  ;;  %s377_s13 = sshra.s32 %s3294_s12, 3 }
  0x43   : > { %351 = vst [vmem:[#allocation2 + $0x30] sm:$0xe] %v343_v25  ;;  %v365_v33 = vrot.slane %v364_v29, 4  ;;  %s2883_s22 = sshll.u32 %s377_s13, 2  ;;  %s3296_s24 = sadd.s32 80, %s3907_s14 }
  0x44   : > { %v346_v34 = vsel %vm3918_vm5, %v344_v30, %v345_v26  ;;  %353 = vst [vmem:[#allocation2 + $0x38] sm:$0x1] %v347_v31  ;;  %v368_v35 = vrot.slane %v366_v32, 4  ;;  %s380_s25 = scalar_lea.vmem %s3885_s28, %s2883_s22  ;;  %s398_s26 = sshra.s32 %s3296_s24, 3 }
  0x45   : > { %352 = vst [vmem:[#allocation2 + $0x34] sm:$0xf] %v346_v34  ;;  %v367_v36 = vsel %vm3918_vm5, %v365_v33, %v366_v32  ;;  %v381_v37 = vld [vmem:[%s380_s25] sm:$0xf]  ;;  %v382_v38 = vld [vmem:[%s380_s25 + $0x4] sm:$0xf] }
  0x46   : > { %372 = vst [vmem:[#allocation2 + $0x3c] sm:$0xe] %v364_v29  ;;  %v385_v39 = vrot.slane %v381_v37, 7  ;;  %v387_v40 = vrot.slane %v382_v38, 7  ;;  %s2885_s27 = sshll.u32 %s398_s26, 2  ;;  %s3298_s29 = sadd.s32 96, %s3907_s14 }
  0x47   : > { %373 = vst [vmem:[#allocation2 + $0x40] sm:$0xf] %v367_v36  ;;  %s401_s30 = scalar_lea.vmem %s3885_s28, %s2885_s27  ;;  %s419_s5 = sshra.s32 %s3298_s29, 3 }
  0x48   : > { %374 = vst [vmem:[#allocation2 + $0x44] sm:$0x1] %v368_v35  ;;  %v386_v41 = vrot.slane %v385_v39, 4  ;;  %v389_v42 = vrot.slane %v387_v40, 4  ;;  %v402_v43 = vld [vmem:[%s401_s30] sm:$0xf] }
  0x49   : > { %393 = vst [vmem:[#allocation2 + $0x48] sm:$0xe] %v385_v39  ;;  %v403_v44 = vld [vmem:[%s401_s30 + $0x4] sm:$0xf]  ;;  %v406_v45 = vrot.slane %v402_v43, 7  ;;  %s2887_s15 = sshll.u32 %s419_s5, 2 }
  0x4a   : > { %v388_v46 = vsel %vm3918_vm5, %v386_v41, %v387_v40  ;;  %395 = vst [vmem:[#allocation2 + $0x50] sm:$0x1] %v389_v42  ;;  %v408_v47 = vrot.slane %v403_v44, 7  ;;  %s422_s23 = scalar_lea.vmem %s3885_s28, %s2887_s15  ;;  %s3300_s6 = sadd.s32 112, %s3907_s14 }
  0x4b   : > { %394 = vst [vmem:[#allocation2 + $0x4c] sm:$0xf] %v388_v46  ;;  %v407_v48 = vrot.slane %v406_v45, 4  ;;  %v423_v49 = vld [vmem:[%s422_s23] sm:$0xf]  ;;  %s440_s7 = sshra.s32 %s3300_s6, 3 }
  0x4c   : > { %414 = vst [vmem:[#allocation2 + $0x54] sm:$0xe] %v406_v45  ;;  %v410_v50 = vrot.slane %v408_v47, 4  ;;  %v424_v51 = vld [vmem:[%s422_s23 + $0x4] sm:$0xf]  ;;  %v427_v52 = vrot.slane %v423_v49, 7 }
  0x4d   : > { %v409_v53 = vsel %vm3918_vm5, %v407_v48, %v408_v47  ;;  %v429_v54 = vrot.slane %v424_v51, 7  ;;  %s2889_s9 = sshll.u32 %s440_s7, 2  ;;  %p460_p10 = scmp.ge.s32.totalorder %s3911_s16, 0 }
  0x4e   : > { %415 = vst [vmem:[#allocation2 + $0x58] sm:$0xf] %v409_v53  ;;  %v428_v55 = vrot.slane %v427_v52, 4  ;;  %s443_s10 = scalar_lea.vmem %s3885_s28, %s2889_s9  ;;  %p461_p11 = scmp.lt.s32.totalorder %s3911_s16, 16 }
  0x4f   : > { %416 = vst [vmem:[#allocation2 + $0x5c] sm:$0x1] %v410_v50  ;;  %v431_v56 = vrot.slane %v429_v54, 4  ;;  %v444_v57 = vld [vmem:[%s443_s10] sm:$0xf] }
  0x50   : > { %435 = vst [vmem:[#allocation2 + $0x60] sm:$0xe] %v427_v52  ;;  %v430_v58 = vsel %vm3918_vm5, %v428_v55, %v429_v54  ;;  %v445_v59 = vld [vmem:[%s443_s10 + $0x4] sm:$0xf]  ;;  %v448_v60 = vrot.slane %v444_v57, 7  ;;  %p462_p12 = pnand %p461_p11, %p460_p10 }
  0x51   : > { %436 = vst [vmem:[#allocation2 + $0x64] sm:$0xf] %v430_v58  ;;  %v450_v61 = vrot.slane %v445_v59, 7  ;;  %s3302_s16 = sadd.s32 (!%p462_p12), 128, %s3907_s14 }
  0x52   : > { %437 = vst [vmem:[#allocation2 + $0x68] sm:$0x1] %v431_v56  ;;  %v449_v62 = vrot.slane %v448_v60, 4  ;;  %465 = sbr.rel (%p462_p12) target bundleno = 94 (0x5e), region = 44  ;;  %s467_s11 = sshra.s32 (!%p462_p12), %s3302_s16, 3 }
  0x53   : > { %456 = vst [vmem:[#allocation2 + $0x6c] sm:$0xe] %v448_v60  ;;  %v452_v63 = vrot.slane %v450_v61, 4  ;;  %s2891_s12 = sshll.u32 (!%p462_p12), %s467_s11, 2 }
  0x54   : > { %v451_v0 = vsel %vm3918_vm5, %v449_v62, %v450_v61  ;;  %s470_s13 = scalar_lea.vmem (!%p462_p12), %s3885_s28, %s2891_s12 }
  0x55   : > { %457 = vst [vmem:[#allocation2 + $0x70] sm:$0xf] %v451_v0 }
  0x56   : > { %458 = vst [vmem:[#allocation2 + $0x74] sm:$0x1] %v452_v63 }
  0x57   : > { %v471_v1 = vld [vmem:[%s470_s13] sm:$0xf]  ;;  %v472_v2 = vld [vmem:[%s470_s13 + $0x4] sm:$0xf] }
  0x58   : > { %v475_v3 = vrot.slane %v471_v1, 7  ;;  %v477_v4 = vrot.slane %v472_v2, 7 }
  0x5a   : > { %483 = vst [vmem:[#allocation2 + $0x78] sm:$0xe] %v475_v3  ;;  %v476_v5 = vrot.slane %v475_v3, 4  ;;  %v479_v6 = vrot.slane %v477_v4, 4 }
  0x5c   : > { %v478_v7 = vsel %vm3918_vm5, %v476_v5, %v477_v4  ;;  %485 = vst [vmem:[#allocation2 + $0x80] sm:$0x1] %v479_v6 }
  0x5d   : > { %484 = vst [vmem:[#allocation2 + $0x7c] sm:$0xf] %v478_v7 }
  0x5e PF: > { %v3334_v8 = vld [vmem:[%s4787_s1 + $0xf8] sm:$0xff]  ;;  %v3333_v9 = vld [vmem:[%s4787_s1 + $0xf0] sm:$0xff]  ;;  %v3332_v10 = vld [vmem:[%s4787_s1 + $0xe8] sm:$0xff]  ;;  %vm1095_vm6 = vsmask.f32 4352  ;;  %vm2668_vm8 = vcmask 1045504  }
  0x5f   : > { %888 = vmatpush.bf16.msra.mxu0 %v3334_v8  ;;  %3691 = vmatpush.bf16.msra.mxu1 %v3334_v8  ;;  %v3331_v11 = vld [vmem:[%s4787_s1 + $0xe0] sm:$0xff]  ;;  %v3330_v12 = vld [vmem:[%s4787_s1 + $0xd8] sm:$0xff]  ;;  %v3329_v13 = vld [vmem:[%s4787_s1 + $0xd0] sm:$0xff]  ;;  %vm1931_vm7 = vsmask.f32 7424 }
  0x60   : > { %3692 = vmatpush.bf16.msra.mxu2 %v3334_v8  ;;  %3693 = vmatpush.bf16.msra.mxu3 %v3334_v8  ;;  %v3328_v14 = vld [vmem:[%s4787_s1 + $0xc8] sm:$0xff]  ;;  %v3978_v16 = vld [vmem:[#allocation2 + $0x10] sm:$0xff]   ;;  %v3980_v17 = vld [vmem:[#allocation2 + $0x20] sm:$0xff]  }
  0x61   : > { %v3976_v15 = vld [vmem:[#allocation2 + $0xc] sm:$0xf]  ;;  %v3379_v19 = vunpack.c.l.b16 %v3978_v16  ;;  %v4803_v21 = vunpack.c.h.b16 %v3980_v17  ;;  %v3327_v23 = vld [vmem:[%s4787_s1 + $0xc0] sm:$0xff]  ;;  %v3350_v24 = vld [vmem:[%s4787_s1 + $0x178] sm:$0xff]  ;;  %v3380_v43 = vunpack.c.h.b16 %v3978_v16 }
  0x62   : > { %v3982_v18 = vld [vmem:[#allocation2 + $0x28] sm:$0xff]   ;;  %v545_v20 = vunpack.c.l.b16 %v3976_v15  ;;  %v3310_v25 = vld [vmem:[%s4787_s1 + $0x38] sm:$0xff]  ;;  %v3349_v32 = vld [vmem:[%s4787_s1 + $0x170] sm:$0xff] }
  0x63   : > { %889 = vmatpush.bf16.msra.mxu0 %v3333_v9  ;;  %3694 = vmatpush.bf16.msra.mxu1 %v3333_v9  ;;  %v3391_v22 = vunpack.c.l.b16 %v3982_v18  ;;  %v4003_v28 = vld [vmem:[#allocation2 + $0x3c] sm:$0xff]   ;;  %v4005_v29 = vld [vmem:[#allocation2 + $0x54] sm:$0xff]   ;;  %v3348_v36 = vld [vmem:[%s4787_s1 + $0x168] sm:$0xff] }
  0x64   : > { %3695 = vmatpush.bf16.msra.mxu2 %v3333_v9  ;;  %3696 = vmatpush.bf16.msra.mxu3 %v3333_v9  ;;  %v664_v26 = vpack.c.b16 %v3379_v19, %v545_v20  ;;  %v3342_v30 = vld [vmem:[%s4787_s1 + $0x138] sm:$0xff]  ;;  %v3309_v33 = vld [vmem:[%s4787_s1 + $0x30] sm:$0xff]  ;;  %v3308_v37 = vld [vmem:[%s4787_s1 + $0x28] sm:$0xff] }
  0x65   : > { %v4001_v27 = vpack.c.b16 %v3391_v22, %v4803_v21  ;;  %v3318_v31 = vld [vmem:[%s4787_s1 + $0x78] sm:$0xff]  ;;  %v3341_v34 = vld [vmem:[%s4787_s1 + $0x130] sm:$0xff]  ;;  %v3340_v39 = vld [vmem:[%s4787_s1 + $0x128] sm:$0xff] }
  0x66   : > { %v3317_v35 = vld [vmem:[%s4787_s1 + $0x70] sm:$0xff]  ;;  %v4034_v38 = vld [vmem:[#allocation2 + $0x18] sm:$0xff]   ;;  %v3316_v40 = vld [vmem:[%s4787_s1 + $0x68] sm:$0xff] }
  0x67   : > { %890 = vmatpush.bf16.msra.mxu0 %v3332_v10  ;;  %3697 = vmatpush.bf16.msra.mxu1 %v3332_v10  ;;  %v3347_v41 = vld [vmem:[%s4787_s1 + $0x160] sm:$0xff]  ;;  %v3383_v44 = vunpack.c.l.b16 %v4034_v38  ;;  %v3346_v47 = vld [vmem:[%s4787_s1 + $0x158] sm:$0xff]  ;;  %v4064_v50 = vld [vmem:[#allocation2 + $0x2c] sm:$0xff]  }
  0x68   : > { %3698 = vmatpush.bf16.msra.mxu2 %v3332_v10  ;;  %3699 = vmatpush.bf16.msra.mxu3 %v3332_v10  ;;  %v3307_v42 = vld [vmem:[%s4787_s1 + $0x20] sm:$0xff]  ;;  %v3306_v48 = vld [vmem:[%s4787_s1 + $0x18] sm:$0xff]  ;;  %v3345_v55 = vld [vmem:[%s4787_s1 + $0x150] sm:$0xff] }
  0x69   : > { %v3339_v45 = vld [vmem:[%s4787_s1 + $0x120] sm:$0xff]  ;;  %v665_v49 = vpack.c.b16 %v3383_v44, %v3380_v43  ;;  %v3338_v53 = vld [vmem:[%s4787_s1 + $0x118] sm:$0xff]  ;;  %v3305_v56 = vld [vmem:[%s4787_s1 + $0x10] sm:$0xff] }
  0x6a   : > { %v3315_v46 = vld [vmem:[%s4787_s1 + $0x60] sm:$0xff]  ;;  %v3314_v54 = vld [vmem:[%s4787_s1 + $0x58] sm:$0xff]  ;;  %v3337_v57 = vld [vmem:[%s4787_s1 + $0x110] sm:$0xff] }
  0x6b   : > { %891 = vmatpush.bf16.msra.mxu0 %v3331_v11  ;;  %3700 = vmatpush.bf16.msra.mxu1 %v3331_v11  ;;  %v4066_v51 = vld [vmem:[#allocation2 + $0x44] sm:$0xff]   ;;  %v4068_v52 = vld [vmem:[#allocation2 + $0x5c] sm:$0xff]   ;;  %v3313_v58 = vld [vmem:[%s4787_s1 + $0x50] sm:$0xff] }
  0x6c   : > { %3701 = vmatpush.bf16.msra.mxu2 %v3331_v11  ;;  %3702 = vmatpush.bf16.msra.mxu3 %v3331_v11  ;;  %v3344_v59 = vld [vmem:[%s4787_s1 + $0x148] sm:$0xff]  ;;  %v511_v61 = vld [vmem:[#allocation2 + $0x14] sm:$0x8]  ;;  %v4097_v62 = vld [vmem:[#allocation2 + $0x60] sm:$0xff]  }
  0x6d   : > { %v3304_v60 = vld [vmem:[%s4787_s1 + $0x8] sm:$0xff]  ;;  %v3343_v3 = vld [vmem:[%s4787_s1 + $0x140] sm:$0xff]  ;;  %v3360_v5 = vld [vmem:[%s4787_s1 + $0x1b8] sm:$0xff]  ;;  %v586_v7 = vunpack.c.l.b16 %v511_v61  ;;  %v3420_v8 = vunpack.c.h.b16 %v4097_v62 }
  0x6e   : > { %v4099_v63 = vld [vmem:[#allocation2 + $0x68] sm:$0xff]   ;;  %v3303_v4 = vld [vmem:[%s4787_s1] sm:$0xff]  ;;  %v3368_v6 = vld [vmem:[%s4787_s1 + $0x1f8] sm:$0xff] }
  0x6f   : > { %892 = vmatpush.bf16.msra.mxu0 %v3330_v12  ;;  %3703 = vmatpush.bf16.msra.mxu1 %v3330_v12  ;;  %v3336_v0 = vld [vmem:[%s4787_s1 + $0x108] sm:$0xff]  ;;  %v4121_v9 = vunpack.c.l.b16 %v4099_v63  ;;  %v3335_v11 = vld [vmem:[%s4787_s1 + $0x100] sm:$0xff]  ;;  %v4135_v22 = vld [vmem:[#allocation2 + $0x34] sm:$0xff]  }
  0x70   : > { %3704 = vmatpush.bf16.msra.mxu2 %v3330_v12  ;;  %3705 = vmatpush.bf16.msra.mxu3 %v3330_v12  ;;  %v3312_v1 = vld [vmem:[%s4787_s1 + $0x48] sm:$0xff]  ;;  %v3311_v12 = vld [vmem:[%s4787_s1 + $0x40] sm:$0xff]  ;;  %v3359_v15 = vld [vmem:[%s4787_s1 + $0x1b0] sm:$0xff] }
  0x71   : > { %v486_v2 = vld [vmem:[#allocation2 + $0x8] sm:$0x8]  ;;  %v3613_v19 = vld [vmem:[#allocation2 + $0x1c] sm:$0xff]  }
  0x72   : > { %v544_v10 = vunpack.c.l.b16 %v486_v2 }
  0x73   : > { %893 = vmatpush.bf16.msra.mxu0 %v3329_v13  ;;  %3706 = vmatpush.bf16.msra.mxu1 %v3329_v13 }
  0x74   : > { %3707 = vmatpush.bf16.msra.mxu2 %v3329_v13  ;;  %3708 = vmatpush.bf16.msra.mxu3 %v3329_v13  ;;  %v3326_v13 = vld [vmem:[%s4787_s1 + $0xb8] sm:$0xff] }
  0x77   : > { %894 = vmatpush.bf16.msra.mxu0 %v3328_v14  ;;  %3709 = vmatpush.bf16.msra.mxu1 %v3328_v14 }
  0x78   : > { %3710 = vmatpush.bf16.msra.mxu2 %v3328_v14  ;;  %3711 = vmatpush.bf16.msra.mxu3 %v3328_v14  ;;  %v3376_v14 = vld [vmem:[%s4787_s1 + $0x238] sm:$0xff] }
  0x7b   : > { %895 = vmatpush.bf16.msra.mxu0 %v3327_v23  ;;  %3712 = vmatpush.bf16.msra.mxu1 %v3327_v23 }
  0x7c   : > { %3713 = vmatpush.bf16.msra.mxu2 %v3327_v23  ;;  %3714 = vmatpush.bf16.msra.mxu3 %v3327_v23  ;;  %v590_v23 = vpack.c.b16 %v3383_v44, %v586_v7  ;;  %v3358_v7 = vld [vmem:[%s4787_s1 + $0x1a8] sm:$0xff] }
  0x7e   : > { %896 = vmatmul.bf16.vlgmr.msra.gmra.mxu0 %v664_v26  ;;  %911 = vmatmul.bf16.vlgmr.msra.gmra.mxu1 %v4001_v27  ;;  %v569_v26 = vpack.c.b16 %v545_v20, %v544_v10  ;;  %v3367_v20 = vld [vmem:[%s4787_s1 + $0x1f0] sm:$0xff]  ;;  %v3324_v10 = vld [vmem:[%s4787_s1 + $0xa8] sm:$0xff] }
  0x7f   : > { %926 = vmatmul.bf16.vlgmr.msra.gmra.mxu2 %v4003_v28  ;;  %941 = vmatmul.bf16.vlgmr.msra.gmra.mxu3 %v4005_v29 }
  0x80   : > { %1026 = vmatpush.bf16.msrb.mxu2 %v3350_v24  ;;  %1546 = vmatpush.bf16.msrb.mxu3 %v3310_v25  ;;  %v4139_v24 = vld [vmem:[#allocation2 + $0x4c] sm:$0xff]   ;;  %v4142_v25 = vpack.c.b16 %v4121_v9, %v3420_v8 }
  0x81   : > { %957 = vmatpush.bf16.msrb.mxu1 %v3342_v30  ;;  %1615 = vmatpush.bf16.msrb.mxu0 %v3318_v31  ;;  %v1114_v30 = vshrl.u32 %v590_v23, 16  ;;  %v1117_v31 = vshll.u32 %v590_v23, 16  ;;  %v3366_v8 = vld [vmem:[%s4787_s1 + $0x1e8] sm:$0xff] }
  0x84   : > { %1027 = vmatpush.bf16.msrb.mxu2 %v3349_v32  ;;  %1547 = vmatpush.bf16.msrb.mxu3 %v3309_v33  ;;  %v1122_v32 = vshrl.u32 %v3613_v19, 16  ;;  %v1125_v33 = vshll.u32 %v3613_v19, 16 }
  0x85   : > { %958 = vmatpush.bf16.msrb.mxu1 %v3341_v34  ;;  %1616 = vmatpush.bf16.msrb.mxu0 %v3317_v35  ;;  %v1097_v34 = vshrl.u32 %v569_v26, 16  ;;  %v1100_v35 = vshll.u32 %v569_v26, 16 }
  0x87   : > { %v1099_v43 = vrot.slane %v1097_v34, 3  ;;  %v1102_v44 = vrot.slane %v1100_v35, 4  ;;  %v3365_v34 = vld [vmem:[%s4787_s1 + $0x1e0] sm:$0xff]  ;;  %v1139_v35 = vshrl.u32 %v3982_v18, 16 }
  0x88   : > { %1028 = vmatpush.bf16.msrb.mxu2 %v3348_v36  ;;  %1548 = vmatpush.bf16.msrb.mxu3 %v3308_v37  ;;  %v1105_v36 = vshrl.u32 %v3978_v16, 16  ;;  %v1108_v37 = vshll.u32 %v3978_v16, 16  ;;  %v1157_v16 = vshrl.u32 %v4001_v27, 16 }
  0x89   : > { %959 = vmatpush.bf16.msrb.mxu1 %v3340_v39  ;;  %1617 = vmatpush.bf16.msrb.mxu0 %v3316_v40  ;;  %v1116_v39 = vrot.slane %v1114_v30, 3  ;;  %v1119_v40 = vrot.slane %v1117_v31, 4 }
  0x8a   : > { %v1159_v61 = vrot.slane %v1157_v16, 3 }
  0x8c   : > { %1029 = vmatpush.bf16.msrb.mxu2 %v3347_v41  ;;  %1549 = vmatpush.bf16.msrb.mxu3 %v3307_v42  ;;  %v1124_v41 = vrot.slane %v1122_v32, 3  ;;  %v1127_v42 = vrot.slane %v1125_v33, 4  ;;  %v1203_v33 = vshrl.u32 %v4135_v22, 16 }
  0x8d   : > { %960 = vmatpush.bf16.msrb.mxu1 %v3339_v45  ;;  %1618 = vmatpush.bf16.msrb.mxu0 %v3315_v46  ;;  %v1107_v45 = vrot.slane %v1105_v36, 3  ;;  %v1110_v46 = vrot.slane %v1108_v37, 4  ;;  %v1142_v36 = vshll.u32 %v3982_v18, 16 }
  0x8e   : > { %901 = vmatmul.bf16.gmra.mxu0 %v665_v49  ;;  %916 = vmatmul.bf16.gmra.mxu1 %v4064_v50  ;;  %v1103_v49 = vor.u32 %v1102_v44, %v1099_v43  ;;  %v1205_v37 = vrot.slane %v1203_v33, 3  ;;  %v4207_v43 = vld [vmem:[#allocation2 + $0x30] sm:$0xff]  }
  0x8f   : > { %931 = vmatmul.bf16.gmra.mxu2 %v4066_v51  ;;  %946 = vmatmul.bf16.gmra.mxu3 %v4068_v52 }
  0x90   : > { %1030 = vmatpush.bf16.msrb.mxu2 %v3346_v47  ;;  %1550 = vmatpush.bf16.msrb.mxu3 %v3306_v48  ;;  %v1120_v47 = vor.u32 %v1119_v40, %v1116_v39  ;;  %v1128_v48 = vor.u32 %v1127_v42, %v1124_v41  ;;  %v1141_v40 = vrot.slane %v1139_v35, 3  ;;  %v1144_v41 = vrot.slane %v1142_v36, 4  ;;  %v3355_v35 = vld [vmem:[%s4787_s1 + $0x190] sm:$0xff] }
  0x91   : > { %961 = vmatpush.bf16.msrb.mxu1 %v3338_v53  ;;  %1619 = vmatpush.bf16.msrb.mxu0 %v3314_v54  ;;  %v1111_v53 = vor.u32 %v1110_v46, %v1107_v45  ;;  %v1224_v46 = vshll.u32 %v4003_v28, 16 }
  0x92   : > { %v1129_v54 = vsel %vm1095_vm6, %v1120_v47, %v1128_v48  ;;  %v3323_v47 = vld [vmem:[%s4787_s1 + $0xa0] sm:$0xff] }
  0x94   : > { %1031 = vmatpush.bf16.msrb.mxu2 %v3345_v55  ;;  %1551 = vmatpush.bf16.msrb.mxu3 %v3305_v56  ;;  %v1112_v55 = vsel %vm1095_vm6, %v1103_v49, %v1111_v53  ;;  %v1160_v56 = vshll.u32 %v4001_v27, 16  ;;  %v4801_v49 = vshrl.u32 %v4207_v43, 16 }
  0x95   : > { %962 = vmatpush.bf16.msrb.mxu1 %v3337_v57  ;;  %1620 = vmatpush.bf16.msrb.mxu0 %v3313_v58  ;;  %v3325_v57 = vld [vmem:[%s4787_s1 + $0xb0] sm:$0xff] }
  0x96   : > { %v3375_v58 = vld [vmem:[%s4787_s1 + $0x230] sm:$0xff]  ;;  %v1168_v16 = vrot.slane %v4801_v49, 3 }
  0x98   : > { %1032 = vmatpush.bf16.msrb.mxu2 %v3344_v59  ;;  %1552 = vmatpush.bf16.msrb.mxu3 %v3304_v60  ;;  %v1148_v59 = vshrl.u32 %v4034_v38, 16  ;;  %v1151_v60 = vshll.u32 %v4034_v38, 16 }
  0x99   : > { %963 = vmatpush.bf16.msrb.mxu1 %v3336_v0  ;;  %1621 = vmatpush.bf16.msrb.mxu0 %v3312_v1  ;;  %v1162_v0 = vrot.slane %v1160_v56, 4 }
  0x9a   : > { %v1150_v1 = vrot.slane %v1148_v59, 3  ;;  %v1153_v2 = vrot.slane %v1151_v60, 4 }
  0x9c   : > { %1033 = vmatpush.bf16.msrb.mxu2 %v3343_v3  ;;  %1553 = vmatpush.bf16.msrb.mxu3 %v3303_v4  ;;  %v1163_v3 = vor.u32 %v1162_v0, %v1159_v61  ;;  %v1239_v61 = vshrl.u32 %v4066_v51, 16  ;;  %v1242_v0 = vshll.u32 %v4066_v51, 16 }
  0x9d   : > { %964 = vmatpush.bf16.msrb.mxu1 %v3335_v11  ;;  %1622 = vmatpush.bf16.msrb.mxu0 %v3311_v12  ;;  %v1175_v11 = vshrl.u32 %v3980_v17, 16  ;;  %v1178_v12 = vshll.u32 %v3980_v17, 16 }
  0x9e   : > { %906 = vmatmul.bf16.gmra.mxu0 %v3613_v19  ;;  %921 = vmatmul.bf16.gmra.mxu1 %v4135_v22  ;;  %v1164_v4 = vsel %vm1095_vm6, %v1128_v48, %v1163_v3  ;;  %v3373_v48 = vld [vmem:[%s4787_s1 + $0x220] sm:$0xff] }
  0x9f   : > { %936 = vmatmul.bf16.gmra.mxu2 %v4139_v24  ;;  %951 = vmatmul.bf16.gmra.mxu3 %v4142_v25  ;;  %v1177_v19 = vrot.slane %v1175_v11, 3  ;;  %v1180_v23 = vrot.slane %v1178_v12, 4 }
  0xa0   : > { %2333 = vmatpush.bf16.msra.mxu2 %v3360_v5  ;;  %2402 = vmatpush.bf16.msra.mxu3 %v3368_v6  ;;  %v1187_v6 = vshll.u32 %v4064_v50, 16 }
  0xa1   : > { %1684 = vmatpush.bf16.msra.mxu1 %v3326_v13  ;;  %2471 = vmatpush.bf16.msra.mxu0 %v3376_v14  ;;  %v1181_v30 = vor.u32 %v1180_v23, %v1177_v19  ;;  %v1257_v19 = vshrl.u32 %v4139_v24, 16  ;;  %v1260_v23 = vshll.u32 %v4139_v24, 16 }
  0xa2   : > { %v1189_v14 = vrot.slane %v1187_v6, 4 }
  0xa4   : > { %2334 = vmatpush.bf16.msra.mxu2 %v3359_v15  ;;  %2403 = vmatpush.bf16.msra.mxu3 %v3367_v20  ;;  %v1206_v15 = vshll.u32 %v4135_v22, 16  ;;  %v3357_v20 = vld [vmem:[%s4787_s1 + $0x1a0] sm:$0xff] }
  0xa5   : > { %1685 = vmatpush.bf16.msra.mxu1 %v3325_v57  ;;  %2472 = vmatpush.bf16.msra.mxu0 %v3375_v58  ;;  %v4228_v58 = vld [vmem:[#allocation2 + $0x38] sm:$0xff]  }
  0xa6   : > { %v1208_v39 = vrot.slane %v1206_v15, 4 }
  0xa8   : > { %2335 = vmatpush.bf16.msra.mxu2 %v3358_v7  ;;  %2404 = vmatpush.bf16.msra.mxu3 %v3366_v8  ;;  %v1209_v42 = vor.u32 %v1208_v39, %v1205_v37 }
  0xa9   : > { %1686 = vmatpush.bf16.msra.mxu1 %v3324_v10 }
  0xac   : > { %2336 = vmatpush.bf16.msra.mxu2 %v3357_v20  ;;  %2405 = vmatpush.bf16.msra.mxu3 %v3365_v34  ;;  %v1259_v20 = vrot.slane %v1257_v19, 3  ;;  %v1262_v34 = vrot.slane %v1260_v23, 4  ;;  %v1293_v23 = vshrl.u32 %v4068_v52, 16 }
  0xad   : > { %1687 = vmatpush.bf16.msra.mxu1 %v3323_v47 }
  0xae   : > { %965 = vmatmul.bf16.vlgmr.msrb.gmra.mxu1 %v4034_v38  ;;  %1623 = vmatmul.bf16.vlgmr.msrb.gmra.mxu0 %v1129_v54  ;;  %v1184_v38 = vshrl.u32 %v4064_v50, 16  ;;  %v1263_v39 = vor.u32 %v1262_v34, %v1259_v20  ;;  %v1296_v20 = vshll.u32 %v4068_v52, 16  ;;  %v3354_v34 = vld [vmem:[%s4787_s1 + $0x188] sm:$0xff] }
  0xaf   : > { %1034 = vmatmul.bf16.vlgmr.msrb.gmra.mxu2 %v4001_v27  ;;  %1554 = vmatmul.bf16.vlgmr.msrb.gmra.mxu3 %v1112_v55  ;;  %v1154_v27 = vor.u32 %v1153_v2, %v1150_v1  ;;  %v1226_v55 = vrot.slane %v1224_v46, 4  ;;  %v3356_v1 = vld [vmem:[%s4787_s1 + $0x198] sm:$0xff] }
  0xb0   : > { %v1186_v13 = vrot.slane %v1184_v38, 3  ;;  %v3364_v2 = vld [vmem:[%s4787_s1 + $0x1d8] sm:$0xff]  ;;  %2337 = vmatpush.bf16.msra.mxu2 %v3356_v1 }
  0xb1   : > { %v1155_v5 = vsel %vm1095_vm6, %v1111_v53, %v1154_v27  ;;  %v1182_v32 = vsel %vm1095_vm6, %v1154_v27, %v1181_v30  ;;  %v4802_v53 = vshll.u32 %v4207_v43, 16  ;;  %v4800_v27 = vshll.u32 %v4228_v58, 16  ;;  %2406 = vmatpush.bf16.msra.mxu3 %v3364_v2  ;;  %v3372_v38 = vld [vmem:[%s4787_s1 + $0x218] sm:$0xff] }
  0xb2   : > { %v1190_v26 = vor.u32 %v1189_v14, %v1186_v13 }
  0xb3   : > { %v1198_v7 = vrot.slane %v4800_v27, 4 }
  0xb4   : > { %v1191_v31 = vsel %vm1095_vm6, %v1163_v3, %v1190_v26  ;;  %v1210_v44 = vsel %vm1095_vm6, %v1190_v26, %v1209_v42  ;;  %v4798_v3 = vshrl.u32 %v4228_v58, 16  ;;  %2338 = vmatpush.bf16.msra.mxu2 %v3355_v35  ;;  %v3362_v35 = vld [vmem:[%s4787_s1 + $0x1c8] sm:$0xff] }
  0xb6   : > { %v1195_v6 = vrot.slane %v4798_v3, 3 }
  0xb8   : > { %v1199_v10 = vor.u32 %v1198_v7, %v1195_v6  ;;  %2339 = vmatpush.bf16.msra.mxu2 %v3354_v34  ;;  %v4381_v34 = vld [vmem:[#allocation2 + $0x58] sm:$0xff]  }
  0xbe   : > { %970 = vmatmul.bf16.gmra.mxu1 %v3980_v17  ;;  %1628 = vmatmul.bf16.gmra.mxu0 %v1164_v4  ;;  %v1241_v4 = vrot.slane %v1239_v61, 3 }
  0xbf   : > { %1039 = vmatmul.bf16.gmra.mxu2 %v4064_v50  ;;  %1559 = vmatmul.bf16.gmra.mxu3 %v1155_v5  ;;  %v3374_v50 = vld [vmem:[%s4787_s1 + $0x228] sm:$0xff]  ;;  %v1244_v5 = vrot.slane %v1242_v0, 4 }
  0xc0   : > { %2473 = vmatpush.bf16.msra.mxu0 %v3374_v50  ;;  %v4262_v50 = vld [vmem:[#allocation2 + $0x40] sm:$0xff]  }
  0xc1   : > { %v1245_v8 = vor.u32 %v1244_v5, %v1241_v4  ;;  %v4795_v26 = vshrl.u32 %v4262_v50, 16 }
  0xc3   : > { %v1214_v36 = vrot.slane %v4795_v26, 3  ;;  %v1264_v46 = vsel %vm1095_vm6, %v1245_v8, %v1263_v39 }
  0xc4   : > { %2474 = vmatpush.bf16.msra.mxu0 %v3373_v48  ;;  %v1275_v48 = vshrl.u32 %v4005_v29, 16 }
  0xc6   : > { %v1277_v0 = vrot.slane %v1275_v48, 3  ;;  %v1298_v48 = vrot.slane %v1296_v20, 4 }
  0xc8   : > { %2475 = vmatpush.bf16.msra.mxu0 %v3372_v38 }
  0xce   : > { %975 = vmatmul.bf16.gmra.mxu1 %v3982_v18  ;;  %1633 = vmatmul.bf16.gmra.mxu0 %v1191_v31  ;;  %v1221_v18 = vshrl.u32 %v4003_v28, 16 }
  0xcf   : > { %1044 = vmatmul.bf16.gmra.mxu2 %v4135_v22  ;;  %1564 = vmatmul.bf16.gmra.mxu3 %v1182_v32  ;;  %v4205_v22 = vor.u32 %v1144_v41, %v1141_v40 }
  0xd0   : > { %v1223_v54 = vrot.slane %v1221_v18, 3  ;;  %v4301_v18 = vld [vmem:[#allocation2 + $0x48] sm:$0xff]  }
  0xd1   : > { %v1201_v45 = vsel %vm1095_vm6, %v1181_v30, %v4205_v22  ;;  %v4796_v30 = vshll.u32 %v4262_v50, 16 }
  0xd2   : > { %v1227_v56 = vor.u32 %v1226_v55, %v1223_v54  ;;  %v1278_v54 = vshll.u32 %v4005_v29, 16  ;;  %v3321_v55 = vld [vmem:[%s4787_s1 + $0x90] sm:$0xff] }
  0xd3   : > { %v1217_v37 = vrot.slane %v4796_v30, 4  ;;  %v3353_v30 = vld [vmem:[%s4787_s1 + $0x180] sm:$0xff] }
  0xd4   : > { %v1228_v59 = vsel %vm1095_vm6, %v1209_v42, %v1227_v56  ;;  %v1246_v13 = vsel %vm1095_vm6, %v1227_v56, %v1245_v8  ;;  %v4794_v56 = vshll.u32 %v4301_v18, 16  ;;  %v1280_v1 = vrot.slane %v1278_v54, 4  ;;  %2340 = vmatpush.bf16.msra.mxu2 %v3353_v30 }
  0xd5   : > { %v1218_v40 = vor.u32 %v1217_v37, %v1214_v36 }
  0xd6   : > { %v1235_v4 = vrot.slane %v4794_v56, 4  ;;  %v1281_v5 = vor.u32 %v1280_v1, %v1277_v0  ;;  %v3370_v0 = vld [vmem:[%s4787_s1 + $0x208] sm:$0xff] }
  0xd7   : > { %v4305_v47 = vsel %vm1095_vm6, %v1199_v10, %v1218_v40 }
  0xde   : > { %980 = vmatmul.bf16.gmra.mxu1 %v4207_v43  ;;  %1638 = vmatmul.bf16.gmra.mxu0 %v1210_v44 }
  0xdf   : > { %1049 = vmatmul.bf16.gmra.mxu2 %v4003_v28  ;;  %1569 = vmatmul.bf16.gmra.mxu3 %v1201_v45  ;;  %v1171_v28 = vrot.slane %v4802_v53, 4 }
  0xe1   : > { %v1172_v57 = vor.u32 %v1171_v28, %v1168_v16  ;;  %v3371_v16 = vld [vmem:[%s4787_s1 + $0x210] sm:$0xff]  ;;  %v4793_v28 = vshrl.u32 %v4301_v18, 16 }
  0xe2   : > { %2476 = vmatpush.bf16.msra.mxu0 %v3371_v16  ;;  %v3320_v16 = vld [vmem:[%s4787_s1 + $0x88] sm:$0xff] }
  0xe3   : > { %v4233_v60 = vsel %vm1095_vm6, %v4205_v22, %v1172_v57  ;;  %v4266_v14 = vsel %vm1095_vm6, %v1172_v57, %v1199_v10  ;;  %v1232_v2 = vrot.slane %v4793_v28, 3  ;;  %v4340_v10 = vld [vmem:[#allocation2 + $0x50] sm:$0xff]  }
  0xe4   : > { %v4792_v36 = vshll.u32 %v4340_v10, 16 }
  0xe6   : > { %2477 = vmatpush.bf16.msra.mxu0 %v3370_v0 }
  0xee   : > { %985 = vmatmul.bf16.gmra.mxu1 %v4228_v58  ;;  %1643 = vmatmul.bf16.gmra.mxu0 %v1228_v59 }
  0xef   : > { %1054 = vmatmul.bf16.gmra.mxu2 %v4066_v51  ;;  %1574 = vmatmul.bf16.gmra.mxu3 %v4233_v60  ;;  %v3322_v51 = vld [vmem:[%s4787_s1 + $0x98] sm:$0xff] }
  0xf0   : > { %1688 = vmatpush.bf16.msra.mxu1 %v3322_v51  ;;  %v1236_v51 = vor.u32 %v1235_v4, %v1232_v2 }
  0xf2   : > { %v4344_v19 = vsel %vm1095_vm6, %v1218_v40, %v1236_v51 }
  0xf4   : > { %1689 = vmatpush.bf16.msra.mxu1 %v3321_v55  ;;  %v1253_v55 = vrot.slane %v4792_v36, 4 }
  0xf8   : > { %1690 = vmatpush.bf16.msra.mxu1 %v3320_v16 }
  0xfb   : > { %v4258_v11 = vpop.f32.mrf.mxu0  ;;  %v4260_v12 = vpop.f32.mrf.mxu1 }
  0xfe   : > { %990 = vmatmul.bf16.gmra.mxu1 %v4262_v50  ;;  %1648 = vmatmul.bf16.gmra.mxu0 %v1246_v13  ;;  %v1282_v13 = vsel %vm1095_vm6, %v1263_v39, %v1281_v5 }
  0xff   : > { %1059 = vmatmul.bf16.gmra.mxu2 %v4139_v24  ;;  %1579 = vmatmul.bf16.gmra.mxu3 %v4266_v14  ;;  %v3363_v24 = vld [vmem:[%s4787_s1 + $0x1d0] sm:$0xff] }
 0x100   : > { %2407 = vmatpush.bf16.msra.mxu3 %v3363_v24  ;;  %v4791_v24 = vshrl.u32 %v4340_v10, 16 }
 0x102   : > { %v4275_v31 = vpop.f32.mrf.mxu2  ;;  %v4277_v32 = vpop.f32.mrf.mxu3  ;;  %v1250_v54 = vrot.slane %v4791_v24, 3 }
 0x103   : > { %v4279_v33 = vpop.f32.mrf.mxu0  ;;  %v4281_v15 = vpop.f32.mrf.mxu1 }
 0x104   : > { %2408 = vmatpush.bf16.msra.mxu3 %v3362_v35  ;;  %v1254_v2 = vor.u32 %v1253_v55, %v1250_v54  ;;  %v4797_v54 = vshrl.u32 %v4381_v34, 16 }
 0x106   : > { %v4386_v36 = vsel %vm1095_vm6, %v1236_v51, %v1254_v2 }
 0x10a   : > { %v4293_v41 = vpop.f32.mrf.mxu2  ;;  %v4295_v42 = vpop.f32.mrf.mxu3 }
 0x10b   : > { %v4297_v44 = vpop.f32.mrf.mxu0  ;;  %v4299_v45 = vpop.f32.mrf.mxu1 }
 0x10e   : > { %995 = vmatmul.bf16.gmra.mxu1 %v4301_v18  ;;  %1653 = vmatmul.bf16.gmra.mxu0 %v1264_v46  ;;  %v1295_v46 = vrot.slane %v1293_v23, 3 }
 0x10f   : > { %1064 = vmatmul.bf16.gmra.mxu2 %v4005_v29  ;;  %1584 = vmatmul.bf16.gmra.mxu3 %v4305_v47 }
 0x110   : > { %v1299_v1 = vor.u32 %v1298_v48, %v1295_v46  ;;  %v1311_v46 = vshrl.u32 %v4142_v25, 16  ;;  %v1314_v48 = vshll.u32 %v4142_v25, 16 }
 0x112   : > { %v4320_v57 = vpop.f32.mrf.mxu2  ;;  %v4322_v59 = vpop.f32.mrf.mxu3  ;;  %v1300_v35 = vsel %vm1095_vm6, %v1281_v5, %v1299_v1  ;;  %v4799_v5 = vshll.u32 %v4381_v34, 16  ;;  %v1316_v28 = vrot.slane %v1314_v48, 4 }
 0x113   : > { %v4324_v61 = vpop.f32.mrf.mxu0  ;;  %v4326_v29 = vpop.f32.mrf.mxu1 }
 0x114   : > { %v1271_v56 = vrot.slane %v4799_v5, 4 }
 0x11a   : > { %v4332_v38 = vpop.f32.mrf.mxu2  ;;  %v4334_v6 = vpop.f32.mrf.mxu3 }
 0x11b   : > { %v4336_v7 = vpop.f32.mrf.mxu0  ;;  %v4338_v8 = vpop.f32.mrf.mxu1 }
 0x11e   : > { %1000 = vmatmul.bf16.gmra.mxu1 %v4340_v10  ;;  %1658 = vmatmul.bf16.gmra.mxu0 %v1282_v13 }
 0x11f   : > { %1069 = vmatmul.bf16.gmra.mxu2 %v4068_v52  ;;  %1589 = vmatmul.bf16.gmra.mxu3 %v4344_v19 }
 0x122   : > { %v4359_v37 = vpop.f32.mrf.mxu2  ;;  %v4361_v39 = vpop.f32.mrf.mxu3 }
 0x123   : > { %v4363_v40 = vpop.f32.mrf.mxu0  ;;  %v4365_v52 = vpop.f32.mrf.mxu1 }
 0x12a   : > { %v4377_v4 = vpop.f32.mrf.mxu2  ;;  %v4379_v13 = vpop.f32.mrf.mxu3 }
 0x12b   : > { %4813 = vst [vmem:[#allocation3_spill] sm:$0xff] %v4379_v13  ;;  %v966_v23 = vpop.f32.mrf.mxu1  ;;  %v1624_v20 = vpop.f32.mrf.mxu0 }
 0x12c   : > { %v967_v24 = vadd.f32 %v966_v23, %v4258_v11  ;;  %v1313_v23 = vrot.slane %v1311_v46, 3 }
 0x12e   : > { %1005 = vmatmul.bf16.gmra.mxu1 %v4381_v34  ;;  %1663 = vmatmul.bf16.gmra.mxu0 %v1300_v35  ;;  %v1268_v35 = vrot.slane %v4797_v54, 3 }
 0x12f   : > { %1074 = vmatmul.bf16.gmra.mxu2 %v4142_v25  ;;  %1594 = vmatmul.bf16.gmra.mxu3 %v4386_v36 }
 0x130   : > { %v1272_v48 = vor.u32 %v1271_v56, %v1268_v35  ;;  %v1287_v56 = vshll.u32 %v4097_v62, 16 }
 0x132   : > { %v1035_v55 = vpop.f32.mrf.mxu2  ;;  %v1555_v11 = vpop.f32.mrf.mxu3  ;;  %v4411_v49 = vsel %vm1095_vm6, %v1254_v2, %v1272_v48 }
 0x133   : > { %v1036_v16 = vadd.f32 %v1035_v55, %v967_v24  ;;  %v968_v51 = vpop.f32.mrf.mxu1  ;;  %v1626_v0 = vpop.f32.mrf.mxu0  ;;  %v3361_v24 = vld [vmem:[%s4787_s1 + $0x1c0] sm:$0xff]  ;;  %v1317_v55 = vor.u32 %v1316_v28, %v1313_v23 }
 0x134   : > { %v969_v26 = vadd.f32 %v968_v51, %v4279_v33  ;;  %2409 = vmatpush.bf16.msra.mxu3 %v3361_v24  ;;  %v4426_v24 = vld [vmem:[#allocation2 + $0x70] sm:$0xff]  }
 0x135   : > { %v1556_v25 = vadd.f32 %v1555_v11, %v1036_v16  ;;  %v3716_v11 = vld [vmem:[#allocation2 + $0x6c] sm:$0xff]   ;;  %v1318_v16 = vsel %vm1095_vm6, %v1299_v1, %v1317_v55  ;;  %4816 = vst [vmem:[#allocation6_spill] sm:$0xff] %v4426_v24 }
 0x136   : > { %v1329_v30 = vshrl.u32 %v3716_v11, 16  ;;  %v1332_v28 = vshll.u32 %v3716_v11, 16 }
 0x137   : > { %v4406_v46 = vadd.f32 %v1624_v20, %v1556_v25 }
 0x138   : > { %v1331_v23 = vrot.slane %v1329_v30, 3  ;;  %v1334_v35 = vrot.slane %v1332_v28, 4 }
 0x139   : > { %4814 = vst [vmem:[#allocation4_spill] sm:$0xff] %v4406_v46 }
 0x13a   : > { %v1037_v54 = vpop.f32.mrf.mxu2  ;;  %v1557_v3 = vpop.f32.mrf.mxu3 }
 0x13b   : > { %v1038_v5 = vadd.f32 %v1037_v54, %v969_v26  ;;  %v971_v27 = vpop.f32.mrf.mxu1  ;;  %v1629_v33 = vpop.f32.mrf.mxu0  ;;  %v3319_v26 = vld [vmem:[%s4787_s1 + $0x80] sm:$0xff] }
 0x13c   : > { %v972_v51 = vadd.f32 %v971_v27, %v4297_v44  ;;  %v3369_v27 = vld [vmem:[%s4787_s1 + $0x200] sm:$0xff]  ;;  %1691 = vmatpush.bf16.msra.mxu1 %v3319_v26 }
 0x13d   : > { %v1558_v53 = vadd.f32 %v1557_v3, %v1038_v5  ;;  %v1284_v3 = vshrl.u32 %v4097_v62, 16  ;;  %2478 = vmatpush.bf16.msra.mxu0 %v3369_v27  ;;  %v1335_v27 = vor.u32 %v1334_v35, %v1331_v23 }
 0x13e   : > { %1010 = vmatmul.bf16.gmra.mxu1 %v4097_v62  ;;  %1668 = vmatmul.bf16.gmra.mxu0 %v1318_v16  ;;  %v3428_v62 = vunpack.c.h.b16 %v4426_v24 }
 0x13f   : > { %1079 = vmatmul.bf16.gmra.mxu2 %v3716_v11  ;;  %1599 = vmatmul.bf16.gmra.mxu3 %v4411_v49  ;;  %v4421_v44 = vadd.f32 %v1626_v0, %v1558_v53  ;;  %v4428_v11 = vld [vmem:[#allocation2 + $0x78] sm:$0xff]   ;;  %v1286_v53 = vrot.slane %v1284_v3, 3  ;;  %v1289_v0 = vrot.slane %v1287_v56, 4  ;;  %v1336_v3 = vsel %vm1095_vm6, %v1317_v55, %v1335_v27 }
 0x140   : > { %4817 = vst [vmem:[#allocation7_spill] sm:$0xff] %v4428_v11  ;;  %v3431_v26 = vunpack.c.l.b16 %v4428_v11 }
 0x141   : > { %4815 = vst [vmem:[#allocation5_spill] sm:$0xff] %v4421_v44  ;;  %v602_v44 = vpack.c.b16 %v3428_v62, %v3428_v62 }
 0x142   : > { %v1040_v1 = vpop.f32.mrf.mxu2  ;;  %v1560_v2 = vpop.f32.mrf.mxu3  ;;  %v690_v46 = vpack.c.b16 %v3431_v26, %v3428_v62 }
 0x143   : > { %v1041_v20 = vadd.f32 %v1040_v1, %v972_v51  ;;  %v973_v54 = vpop.f32.mrf.mxu1  ;;  %v1631_v5 = vpop.f32.mrf.mxu0  ;;  %v4434_v51 = vor.u32 %v1289_v0, %v1286_v53  ;;  %v1356_v23 = vshrl.u32 %v602_v44, 16  ;;  %v1359_v35 = vshll.u32 %v602_v44, 16 }
 0x144   : > { %v974_v25 = vadd.f32 %v973_v54, %v4324_v61  ;;  %v3432_v44 = vunpack.c.h.b16 %v4428_v11 }
 0x145   : > { %v1561_v16 = vadd.f32 %v1560_v2, %v1041_v20  ;;  %4819 = vst [vmem:[#allocation9_spill] sm:$0xff] %v4434_v51  ;;  %v4440_v2 = vsel %vm1095_vm6, %v1272_v48, %v4434_v51  ;;  %v515_v48 = vld [vmem:[#allocation2 + $0x20] sm:$0x8] }
 0x147   : > { %v4432_v21 = vadd.f32 %v1629_v33, %v1561_v16  ;;  %v581_v33 = vpack.c.b16 %v4121_v9, %v4121_v9  ;;  %v1358_v9 = vrot.slane %v1356_v23, 3 }
 0x149   : > { %4818 = vst [vmem:[#allocation8_spill] sm:$0xff] %v4432_v21  ;;  %v1347_v55 = vshrl.u32 %v581_v33, 16  ;;  %v3351_v21 = vld [vmem:[#allocation2 + $0xc] sm:$0xff] }
 0x14a   : > { %v1042_v30 = vpop.f32.mrf.mxu2  ;;  %v1562_v28 = vpop.f32.mrf.mxu3 }
 0x14b   : > { %v1043_v1 = vadd.f32 %v1042_v30, %v974_v25  ;;  %v976_v61 = vpop.f32.mrf.mxu1  ;;  %v1634_v54 = vpop.f32.mrf.mxu0  ;;  %v1361_v30 = vrot.slane %v1359_v35, 4 }
 0x14c   : > { %v977_v56 = vadd.f32 %v976_v61, %v4336_v7  ;;  %v1350_v7 = vshll.u32 %v581_v33, 16 }
 0x14d   : > { %v1563_v20 = vadd.f32 %v1562_v28, %v1043_v1  ;;  %v518_v28 = vld [vmem:[#allocation2 + $0x80] sm:$0xf]  ;;  %v1362_v33 = vor.u32 %v1361_v30, %v1358_v9  ;;  %v3583_v9 = vld [vmem:[#allocation2 + $0x18] sm:$0xff]  }
 0x14e   : > { %1015 = vmatmul.bf16.gmra.mxu1 %v4099_v63  ;;  %1673 = vmatmul.bf16.gmra.mxu0 %v1336_v3  ;;  %v1352_v1 = vrot.slane %v1350_v7, 4  ;;  %v607_v3 = vunpack.c.l.b16 %v515_v48  ;;  %v3722_v48 = vld [vmem:[#allocation2 + $0x24] sm:$0xff]  }
 0x14f   : > { %1084 = vmatmul.bf16.gmra.mxu2 %v690_v46  ;;  %1604 = vmatmul.bf16.gmra.mxu3 %v4440_v2  ;;  %v4446_v25 = vadd.f32 %v1631_v5, %v1563_v20  ;;  %v1349_v46 = vrot.slane %v1347_v55, 3  ;;  %v4450_v5 = vunpack.c.l.b16 %v518_v28  ;;  %v1935_v28 = vshll.u32 %v3351_v21, 16 }
 0x151   : > { %4820 = vst [vmem:[#allocation10_spill] sm:$0xff] %v4446_v25  ;;  %v1353_v25 = vor.u32 %v1352_v1, %v1349_v46  ;;  %v691_v7 = vpack.c.b16 %v4450_v5, %v3432_v44  ;;  %v1959_v46 = vshll.u32 %v3722_v48, 16 }
 0x152   : > { %v1045_v53 = vpop.f32.mrf.mxu2  ;;  %v1565_v0 = vpop.f32.mrf.mxu3  ;;  %4821 = vst [vmem:[#allocation11_spill] sm:$0xff] %v4450_v5 }
 0x153   : > { %v1046_v16 = vadd.f32 %v1045_v53, %v977_v56  ;;  %v978_v62 = vpop.f32.mrf.mxu1  ;;  %v1636_v26 = vpop.f32.mrf.mxu0  ;;  %v4823_v56 = vunpack.c.h.b16 %v3980_v17 }
 0x154   : > { %v979_v63 = vadd.f32 %v978_v62, %v4363_v40 }
 0x155   : > { %v1566_v61 = vadd.f32 %v1565_v0, %v1046_v16  ;;  %v611_v53 = vpack.c.b16 %v4823_v56, %v607_v3  ;;  %v1363_v0 = vsel %vm1095_vm6, %v1335_v27, %v1362_v33  ;;  %v1354_v16 = vsel %vm1095_vm6, %v4434_v51, %v1353_v25  ;;  %v4465_v27 = vld [vmem:[#allocation2 + $0x14] sm:$0xff]   ;;  %v4468_v3 = vld [vmem:[#allocation2 + $0x20] sm:$0xff]  }
 0x157   : > { %v4452_v20 = vadd.f32 %v1634_v54, %v1566_v61  ;;  %v1131_v17 = vshrl.u32 %v611_v53, 16  ;;  %v1134_v30 = vshll.u32 %v611_v53, 16  ;;  %v1947_v61 = vshll.u32 %v3583_v9, 16 }
 0x158   : > { %v1933_v53 = vshrl.u32 %v3351_v21, 16 }
 0x159   : > { %4822 = vst [vmem:[#allocation12_spill] sm:$0xff] %v4452_v20  ;;  %v1133_v56 = vrot.slane %v1131_v17, 3  ;;  %v4470_v20 = vrot.slane %v1959_v46, 1 }
 0x15a   : > { %v1047_v23 = vpop.f32.mrf.mxu2  ;;  %v1567_v35 = vpop.f32.mrf.mxu3 }
 0x15b   : > { %v1048_v40 = vadd.f32 %v1047_v23, %v979_v63  ;;  %v981_v62 = vpop.f32.mrf.mxu1  ;;  %v1639_v55 = vpop.f32.mrf.mxu0  ;;  %v4461_v63 = vld [vmem:[#allocation2 + $0x2c] sm:$0xff]   ;;  %v1136_v23 = vrot.slane %v1134_v30, 4 }
 0x15c   : > { %v982_v25 = vadd.f32 %v981_v62, %v4260_v12  ;;  %v1949_v12 = vrot.slane %v1947_v61, 1  ;;  %v1952_v62 = vshll.u32 %v4468_v3, 16 }
 0x15d   : > { %v1568_v54 = vadd.f32 %v1567_v35, %v1048_v40  ;;  %v1937_v35 = vrot.slane %v1935_v28, 1  ;;  %v1137_v11 = vor.u32 %v1136_v23, %v1133_v56 }
 0x15e   : > { %1020 = vmatmul.bf16.gmra.mxu1 %v4426_v24  ;;  %1678 = vmatmul.bf16.gmra.mxu0 %v1363_v0 }
 0x15f   : > { %1089 = vmatmul.bf16.gmra.mxu2 %v691_v7  ;;  %1609 = vmatmul.bf16.gmra.mxu3 %v1354_v16  ;;  %v4463_v1 = vadd.f32 %v1636_v26, %v1568_v54  ;;  %v1957_v16 = vshrl.u32 %v3722_v48, 16  ;;  %v1964_v26 = vshll.u32 %v4461_v63, 16  ;;  %v1940_v54 = vshll.u32 %v4465_v27, 16 }
 0x160   : > { %v1938_v17 = vor.u32 %v1937_v35, %v1933_v53 }
 0x161   : > { %4824 = vst [vmem:[#allocation13_spill] sm:$0xff] %v4463_v1  ;;  %v1945_v1 = vshrl.u32 %v3583_v9, 16  ;;  %v1962_v21 = vor.u32 %v4470_v20, %v1957_v16  ;;  %v1966_v30 = vrot.slane %v1964_v26, 1  ;;  %v1942_v48 = vrot.slane %v1940_v54, 1 }
 0x162   : > { %v1050_v44 = vpop.f32.mrf.mxu2  ;;  %v1570_v33 = vpop.f32.mrf.mxu3  ;;  %v1984_v26 = vshrl.u32 %v4461_v63, 16  ;;  %v1968_v54 = vshrl.u32 %v4465_v27, 16 }
 0x163   : > { %v1051_v40 = vadd.f32 %v1050_v44, %v982_v25  ;;  %v983_v7 = vpop.f32.mrf.mxu1  ;;  %v1641_v0 = vpop.f32.mrf.mxu0  ;;  %v1950_v46 = vor.u32 %v1949_v12, %v1945_v1  ;;  %v1954_v25 = vrot.slane %v1952_v62, 1  ;;  %v4482_v56 = vsel %vm1931_vm7, %v1962_v21, %v1966_v30  ;;  %v3720_v1 = vld [vmem:[#allocation2 + $0x1c] sm:$0xff]  }
 0x164   : > { %v984_v44 = vadd.f32 %v983_v7, %v4281_v15  ;;  %v3726_v15 = vld [vmem:[#allocation2 + $0x34] sm:$0xff]   ;;  %v1972_v12 = vshll.u32 %v3720_v1, 16  ;;  %v1976_v62 = vshrl.u32 %v4468_v3, 16  ;;  %v1986_v21 = vor.u32 %v1984_v26, %v1966_v30 }
 0x165   : > { %v1571_v5 = vadd.f32 %v1570_v33, %v1051_v40  ;;  %v1146_v33 = vsel %vm1095_vm6, %v1137_v11, %v4205_v22  ;;  %v3585_v22 = vld [vmem:[#allocation2 + $0x28] sm:$0xff]  }
 0x167   : > { %v4476_v28 = vadd.f32 %v1639_v55, %v1571_v5  ;;  %v1943_v5 = vsel %vm1931_vm7, %v1938_v17, %v1942_v48  ;;  %v1955_v55 = vsel %vm1931_vm7, %v1950_v46, %v1954_v25  ;;  %v1980_v17 = vshll.u32 %v3585_v22, 16 }
 0x16a   : > { %v1052_v24 = vpop.f32.mrf.mxu2  ;;  %v1572_v51 = vpop.f32.mrf.mxu3 }
 0x16b   : > { %v1053_v9 = vadd.f32 %v1052_v24, %v984_v44  ;;  %v986_v61 = vpop.f32.mrf.mxu1  ;;  %v1644_v13 = vpop.f32.mrf.mxu0 }
 0x16c   : > { %v987_v53 = vadd.f32 %v986_v61, %v4299_v45  ;;  %v1970_v45 = vor.u32 %v1968_v54, %v1942_v48  ;;  %v1978_v61 = vor.u32 %v1976_v62, %v1954_v25  ;;  %v2004_v54 = vshrl.u32 %v3726_v15, 16 }
 0x16d   : > { %v1573_v23 = vadd.f32 %v1572_v51, %v1053_v9  ;;  %v1988_v51 = vshll.u32 %v3726_v15, 16  ;;  %v1974_v9 = vrot.slane %v1972_v12, 1  ;;  %v1992_v62 = vshrl.u32 %v3720_v1, 16 }
 0x16e   : > { %1692 = vmatmul.bf16.vlgmr.msra.gmra.mxu1 %v1146_v33  ;;  %2479 = vmatmul.bf16.vlgmr.msra.gmra.mxu0 %v4482_v56  ;;  %v1982_v33 = vrot.slane %v1980_v17, 1  ;;  %v1996_v17 = vshrl.u32 %v3585_v22, 16 }
 0x16f   : > { %2341 = vmatmul.bf16.vlgmr.msra.gmra.mxu2 %v1943_v5  ;;  %2410 = vmatmul.bf16.vlgmr.msra.gmra.mxu3 %v1955_v55  ;;  %v4487_v24 = vadd.f32 %v1641_v0, %v1573_v23  ;;  %v1990_v46 = vrot.slane %v1988_v51, 1  ;;  %v1975_v3 = vsel %vm1931_vm7, %v1970_v45, %v1974_v9 }
 0x170   : > { %v1983_v30 = vsel %vm1931_vm7, %v1978_v61, %v1982_v33  ;;  %v1994_v61 = vor.u32 %v1992_v62, %v1974_v9  ;;  %v4826_v62 = vshrl.u32 %v4207_v43, 16 }
 0x172   : > { %v1055_v11 = vpop.f32.mrf.mxu2  ;;  %v1575_v35 = vpop.f32.mrf.mxu3  ;;  %v1995_v22 = vsel %vm1931_vm7, %v1994_v61, %v4470_v20 }
 0x173   : > { %v1056_v40 = vadd.f32 %v1055_v11, %v987_v53  ;;  %v988_v7 = vpop.f32.mrf.mxu1  ;;  %v1646_v16 = vpop.f32.mrf.mxu0  ;;  %v4497_v11 = vsel %vm1931_vm7, %v1986_v21, %v1990_v46 }
 0x174   : > { %v989_v5 = vadd.f32 %v988_v7, %v4326_v29  ;;  %v3728_v29 = vld [vmem:[#allocation2 + $0x3c] sm:$0xff]  }
 0x175   : > { %v1576_v0 = vadd.f32 %v1575_v35, %v1056_v40  ;;  %v2008_v12 = vshll.u32 %v3728_v29, 16  ;;  %v2020_v20 = vshrl.u32 %v3728_v29, 16 }
 0x177   : > { %v4493_v44 = vadd.f32 %v1644_v13, %v1576_v0  ;;  %v2010_v21 = vrot.slane %v2008_v12, 1 }
 0x17a   : > { %v1057_v55 = vpop.f32.mrf.mxu2  ;;  %v1577_v63 = vpop.f32.mrf.mxu3 }
 0x17b   : > { %v1058_v23 = vadd.f32 %v1057_v55, %v989_v5  ;;  %v991_v53 = vpop.f32.mrf.mxu1  ;;  %v1649_v27 = vpop.f32.mrf.mxu0  ;;  %v1998_v5 = vor.u32 %v1996_v17, %v1982_v33 }
 0x17c   : > { %v992_v25 = vadd.f32 %v991_v53, %v4338_v8 }
 0x17d   : > { %v1578_v13 = vadd.f32 %v1577_v63, %v1058_v23 }
 0x17e   : > { %1697 = vmatmul.bf16.gmra.mxu1 %v4233_v60  ;;  %2484 = vmatmul.bf16.gmra.mxu0 %v4497_v11  ;;  %v2006_v60 = vor.u32 %v2004_v54, %v1990_v46  ;;  %v2022_v54 = vor.u32 %v2020_v20, %v2010_v21 }
 0x17f   : > { %2346 = vmatmul.bf16.gmra.mxu2 %v1975_v3  ;;  %2415 = vmatmul.bf16.gmra.mxu3 %v1983_v30  ;;  %v4503_v48 = vadd.f32 %v1646_v16, %v1578_v13  ;;  %v4825_v16 = vshll.u32 %v4207_v43, 16  ;;  %v3732_v43 = vld [vmem:[#allocation2 + $0x4c] sm:$0xff]  }
 0x180   : > { %v4512_v1 = vsel %vm1931_vm7, %v2006_v60, %v2010_v21 }
 0x181   : > { %v2002_v55 = vrot.slane %v4825_v16, 1 }
 0x182   : > { %v1060_v35 = vpop.f32.mrf.mxu2  ;;  %v1580_v40 = vpop.f32.mrf.mxu3 }
 0x183   : > { %v1061_v7 = vadd.f32 %v1060_v35, %v992_v25  ;;  %v993_v26 = vpop.f32.mrf.mxu1  ;;  %v1651_v51 = vpop.f32.mrf.mxu0  ;;  %v2003_v46 = vsel %vm1931_vm7, %v1998_v5, %v2002_v55  ;;  %v2014_v17 = vor.u32 %v2002_v55, %v4826_v62 }
 0x184   : > { %v994_v8 = vadd.f32 %v993_v26, %v4365_v52  ;;  %v3730_v52 = vld [vmem:[#allocation2 + $0x44] sm:$0xff]  }
 0x185   : > { %v1581_v0 = vadd.f32 %v1580_v40, %v1061_v7  ;;  %v2024_v7 = vshll.u32 %v3730_v52, 16 }
 0x187   : > { %v4506_v45 = vadd.f32 %v1649_v27, %v1581_v0  ;;  %v2026_v12 = vrot.slane %v2024_v7, 1 }
 0x189   : > { %v4530_v29 = vsel %vm1931_vm7, %v2022_v54, %v2026_v12 }
 0x18a   : > { %v1062_v63 = vpop.f32.mrf.mxu2  ;;  %v1582_v23 = vpop.f32.mrf.mxu3 }
 0x18b   : > { %v1063_v53 = vadd.f32 %v1062_v63, %v994_v8  ;;  %v996_v3 = vpop.f32.mrf.mxu1  ;;  %v1654_v15 = vpop.f32.mrf.mxu0 }
 0x18c   : > { %v997_v27 = vadd.f32 %v996_v3, %v4275_v31 }
 0x18d   : > { %v1583_v9 = vadd.f32 %v1582_v23, %v1063_v53 }
 0x18e   : > { %1702 = vmatmul.bf16.gmra.mxu1 %v4266_v14  ;;  %2489 = vmatmul.bf16.gmra.mxu0 %v4512_v1 }
 0x18f   : > { %2351 = vmatmul.bf16.gmra.mxu2 %v1995_v22  ;;  %2420 = vmatmul.bf16.gmra.mxu3 %v2003_v46  ;;  %v4519_v33 = vadd.f32 %v1651_v51, %v1583_v9  ;;  %v4827_v51 = vshll.u32 %v4228_v58, 16  ;;  %v2036_v46 = vshrl.u32 %v3730_v52, 16  ;;  %v2040_v9 = vshll.u32 %v3732_v43, 16 }
 0x191   : > { %v2018_v0 = vrot.slane %v4827_v51, 1 }
 0x192   : > { %v1065_v30 = vpop.f32.mrf.mxu2  ;;  %v1585_v13 = vpop.f32.mrf.mxu3 }
 0x193   : > { %v1066_v25 = vadd.f32 %v1065_v30, %v997_v27  ;;  %v998_v35 = vpop.f32.mrf.mxu1  ;;  %v1656_v40 = vpop.f32.mrf.mxu0  ;;  %v2019_v21 = vsel %vm1931_vm7, %v2014_v17, %v2018_v0  ;;  %v2038_v30 = vor.u32 %v2036_v46, %v2026_v12 }
 0x194   : > { %v999_v31 = vadd.f32 %v998_v35, %v4293_v41  ;;  %v4829_v35 = vshll.u32 %v4262_v50, 16 }
 0x195   : > { %v1586_v26 = vadd.f32 %v1585_v13, %v1066_v25 }
 0x197   : > { %v4522_v14 = vadd.f32 %v1654_v15, %v1586_v26 }
 0x19a   : > { %v1067_v60 = vpop.f32.mrf.mxu2  ;;  %v1587_v61 = vpop.f32.mrf.mxu3 }
 0x19b   : > { %v1068_v5 = vadd.f32 %v1067_v60, %v999_v31  ;;  %v1001_v16 = vpop.f32.mrf.mxu1  ;;  %v1659_v8 = vpop.f32.mrf.mxu0 }
 0x19c   : > { %v1002_v55 = vadd.f32 %v1001_v16, %v4320_v57  ;;  %v2052_v16 = vshrl.u32 %v3732_v43, 16 }
 0x19d   : > { %v1588_v63 = vadd.f32 %v1587_v61, %v1068_v5 }
 0x19e   : > { %1707 = vmatmul.bf16.gmra.mxu1 %v4305_v47  ;;  %2494 = vmatmul.bf16.gmra.mxu0 %v4530_v29  ;;  %v2042_v47 = vrot.slane %v2040_v9, 1 }
 0x19f   : > { %2356 = vmatmul.bf16.gmra.mxu2 %v4482_v56  ;;  %2425 = vmatmul.bf16.gmra.mxu3 %v2019_v21  ;;  %v4536_v41 = vadd.f32 %v1656_v40, %v1588_v63  ;;  %v4828_v56 = vshrl.u32 %v4228_v58, 16  ;;  %v2034_v40 = vrot.slane %v4829_v35, 1  ;;  %v3734_v58 = vld [vmem:[#allocation2 + $0x54] sm:$0xff]  }
 0x1a0   : > { %v4547_v52 = vsel %vm1931_vm7, %v2038_v30, %v2042_v47  ;;  %v2054_v63 = vor.u32 %v2052_v16, %v2042_v47 }
 0x1a1   : > { %v2030_v25 = vor.u32 %v2018_v0, %v4828_v56 }
 0x1a2   : > { %v1070_v23 = vpop.f32.mrf.mxu2  ;;  %v1590_v53 = vpop.f32.mrf.mxu3 }
 0x1a3   : > { %v1071_v3 = vadd.f32 %v1070_v23, %v1002_v55  ;;  %v1003_v15 = vpop.f32.mrf.mxu1  ;;  %v1661_v22 = vpop.f32.mrf.mxu0  ;;  %v2035_v12 = vsel %vm1931_vm7, %v2030_v25, %v2034_v40 }
 0x1a4   : > { %v1004_v57 = vadd.f32 %v1003_v15, %v4332_v38 }
 0x1a5   : > { %v1591_v27 = vadd.f32 %v1590_v53, %v1071_v3  ;;  %v4831_v53 = vshll.u32 %v4301_v18, 16 }
 0x1a7   : > { %v4539_v13 = vadd.f32 %v1659_v8, %v1591_v27  ;;  %v2056_v8 = vshll.u32 %v3734_v58, 16  ;;  %v2050_v3 = vrot.slane %v4831_v53, 1 }
 0x1aa   : > { %v1072_v20 = vpop.f32.mrf.mxu2  ;;  %v1592_v7 = vpop.f32.mrf.mxu3 }
 0x1ab   : > { %v1073_v26 = vadd.f32 %v1072_v20, %v1004_v57  ;;  %v1006_v54 = vpop.f32.mrf.mxu1  ;;  %v1664_v62 = vpop.f32.mrf.mxu0 }
 0x1ac   : > { %v1007_v51 = vadd.f32 %v1006_v54, %v4359_v37 }
 0x1ad   : > { %v1593_v17 = vadd.f32 %v1592_v7, %v1073_v26  ;;  %v2068_v7 = vshrl.u32 %v3734_v58, 16 }
 0x1ae   : > { %1712 = vmatmul.bf16.gmra.mxu1 %v4344_v19  ;;  %2499 = vmatmul.bf16.gmra.mxu0 %v4547_v52  ;;  %v2058_v19 = vrot.slane %v2056_v8, 1 }
 0x1af   : > { %2361 = vmatmul.bf16.gmra.mxu2 %v4497_v11  ;;  %2430 = vmatmul.bf16.gmra.mxu3 %v2035_v12  ;;  %v4553_v38 = vadd.f32 %v1661_v22, %v1593_v17  ;;  %v4830_v11 = vshrl.u32 %v4262_v50, 16  ;;  %v3736_v50 = vld [vmem:[#allocation2 + $0x5c] sm:$0xff]  }
 0x1b0   : > { %v4564_v43 = vsel %vm1931_vm7, %v2054_v63, %v2058_v19  ;;  %v2072_v26 = vshll.u32 %v3736_v50, 16 }
 0x1b1   : > { %v2046_v23 = vor.u32 %v2034_v40, %v4830_v11 }
 0x1b2   : > { %v1075_v0 = vpop.f32.mrf.mxu2  ;;  %v1595_v31 = vpop.f32.mrf.mxu3 }
 0x1b3   : > { %v1076_v60 = vadd.f32 %v1075_v0, %v1007_v51  ;;  %v1008_v61 = vpop.f32.mrf.mxu1  ;;  %v1666_v5 = vpop.f32.mrf.mxu0  ;;  %v2051_v30 = vsel %vm1931_vm7, %v2046_v23, %v2050_v3  ;;  %v4833_v51 = vshll.u32 %v4340_v10, 16 }
 0x1b4   : > { %v1009_v37 = vadd.f32 %v1008_v61, %v4377_v4 }
 0x1b5   : > { %v1596_v21 = vadd.f32 %v1595_v31, %v1076_v60  ;;  %v2066_v0 = vrot.slane %v4833_v51, 1 }
 0x1b7   : > { %v4556_v55 = vadd.f32 %v1664_v62, %v1596_v21  ;;  %v2070_v62 = vor.u32 %v2068_v7, %v2058_v19 }
 0x1ba   : > { %v1077_v15 = vpop.f32.mrf.mxu2  ;;  %v1597_v22 = vpop.f32.mrf.mxu3 }
 0x1bb   : > { %v1078_v46 = vadd.f32 %v1077_v15, %v1009_v37  ;;  %v1011_v9 = vpop.f32.mrf.mxu1  ;;  %v1669_v27 = vpop.f32.mrf.mxu0  ;;  %v2084_v37 = vshrl.u32 %v3736_v50, 16 }
 0x1bc   : > { %v1012_v56 = vadd.f32 %v1011_v9, %v4277_v32 }
 0x1bd   : > { %v1598_v47 = vadd.f32 %v1597_v22, %v1078_v46 }
 0x1be   : > { %1717 = vmatmul.bf16.gmra.mxu1 %v4386_v36  ;;  %2504 = vmatmul.bf16.gmra.mxu0 %v4564_v43  ;;  %v2074_v36 = vrot.slane %v2072_v26, 1 }
 0x1bf   : > { %2366 = vmatmul.bf16.gmra.mxu2 %v4512_v1  ;;  %2435 = vmatmul.bf16.gmra.mxu3 %v2051_v30  ;;  %v4570_v4 = vadd.f32 %v1666_v5, %v1598_v47  ;;  %v4832_v1 = vshrl.u32 %v4301_v18, 16  ;;  %v3737_v18 = vld [vmem:[#allocation2 + $0x64] sm:$0xff]   ;;  %v4835_v30 = vshll.u32 %v4381_v34, 16 }
 0x1c0   : > { %v4581_v58 = vsel %vm1931_vm7, %v2070_v62, %v2074_v36  ;;  %v2088_v15 = vshll.u32 %v3737_v18, 16  ;;  %v2086_v46 = vor.u32 %v2084_v37, %v2074_v36 }
 0x1c1   : > { %v2062_v17 = vor.u32 %v2050_v3, %v4832_v1  ;;  %v2082_v47 = vrot.slane %v4835_v30, 1  ;;  %v3592_v1 = vld [vmem:[#allocation2 + $0x60] sm:$0xff]  }
 0x1c2   : > { %v1080_v25 = vpop.f32.mrf.mxu2  ;;  %v1600_v35 = vpop.f32.mrf.mxu3 }
 0x1c3   : > { %v1081_v40 = vadd.f32 %v1080_v25, %v1012_v56  ;;  %v1013_v57 = vpop.f32.mrf.mxu1  ;;  %v1671_v20 = vpop.f32.mrf.mxu0  ;;  %v2067_v8 = vsel %vm1931_vm7, %v2062_v17, %v2066_v0 }
 0x1c4   : > { %v1014_v32 = vadd.f32 %v1013_v57, %v4295_v42 }
 0x1c5   : > { %v1601_v54 = vadd.f32 %v1600_v35, %v1081_v40 }
 0x1c7   : > { %v4573_v12 = vadd.f32 %v1669_v27, %v1601_v54  ;;  %v3635_v54 = vld [vmem:[#allocation2 + $0x6c] sm:$0xff]  }
 0x1ca   : > { %v1082_v31 = vpop.f32.mrf.mxu2  ;;  %v1602_v60 = vpop.f32.mrf.mxu3 }
 0x1cb   : > { %v1083_v61 = vadd.f32 %v1082_v31, %v1014_v32  ;;  %v1016_v5 = vpop.f32.mrf.mxu1  ;;  %v1674_v16 = vpop.f32.mrf.mxu0 }
 0x1cc   : > { %v1017_v63 = vadd.f32 %v1016_v5, %v4322_v59  ;;  %v2104_v5 = vshll.u32 %v3635_v54, 16 }
 0x1cd   : > { %v1603_v21 = vadd.f32 %v1602_v60, %v1083_v61  ;;  %v2100_v61 = vshrl.u32 %v3737_v18, 16 }
 0x1ce   : > { %1722 = vmatmul.bf16.gmra.mxu1 %v4411_v49  ;;  %2509 = vmatmul.bf16.gmra.mxu0 %v4581_v58  ;;  %v2090_v49 = vrot.slane %v2088_v15, 1 }
 0x1cf   : > { %2371 = vmatmul.bf16.gmra.mxu2 %v4530_v29  ;;  %2440 = vmatmul.bf16.gmra.mxu3 %v2067_v8  ;;  %v4587_v42 = vadd.f32 %v1671_v20, %v1603_v21  ;;  %v4834_v29 = vshrl.u32 %v4340_v10, 16  ;;  %v3781_v10 = vld [vmem:[#allocation2 + $0x68] sm:$0xff]  }
 0x1d0   : > { %v4598_v50 = vsel %vm1931_vm7, %v2086_v46, %v2090_v49  ;;  %v1302_v26 = vshrl.u32 %v3781_v10, 16  ;;  %v4607_v21 = vor.u32 %v2100_v61, %v2090_v49  ;;  %v4638_v61 = vld [vmem:[%s4788_s2] ss:$0 sm:$0xff] }
 0x1d1   : > { %v2078_v27 = vor.u32 %v2066_v0, %v4834_v29  ;;  %v4838_v29 = vld [vmem:[#allocation9_spill] sm:$0xff] }
 0x1d2   : > { %v1085_v19 = vpop.f32.mrf.mxu2  ;;  %v1605_v11 = vpop.f32.mrf.mxu3  ;;  %v1304_v0 = vrot.slane %v1302_v26, 3 }
 0x1d3   : > { %v1086_v23 = vadd.f32 %v1085_v19, %v1017_v63  ;;  %v1018_v53 = vpop.f32.mrf.mxu1  ;;  %v1676_v3 = vpop.f32.mrf.mxu0  ;;  %v2083_v20 = vsel %vm1931_vm7, %v2078_v27, %v2082_v47  ;;  %v2106_v63 = vrot.slane %v2104_v5, 1 }
 0x1d4   : > { %v1019_v59 = vadd.f32 %v1018_v53, %v4334_v6  ;;  %v1305_v6 = vshll.u32 %v3781_v10, 16  ;;  %v4837_v53 = vld [vmem:[#allocation3_spill] sm:$0xff] }
 0x1d5   : > { %v1606_v22 = vadd.f32 %v1605_v11, %v1086_v23  ;;  %v2107_v49 = vsel %vm1931_vm7, %v4607_v21, %v2106_v63 }
 0x1d6   : > { %v1307_v60 = vrot.slane %v1305_v6, 4 }
 0x1d7   : > { %v4590_v9 = vadd.f32 %v1674_v16, %v1606_v22  ;;  %v2096_v16 = vshll.u32 %v3592_v1, 16 }
 0x1d9   : > { %v2098_v23 = vrot.slane %v2096_v16, 1 }
 0x1da   : > { %v1087_v56 = vpop.f32.mrf.mxu2  ;;  %v1607_v25 = vpop.f32.mrf.mxu3 }
 0x1db   : > { %v1088_v35 = vadd.f32 %v1087_v56, %v1019_v59  ;;  %v1021_v40 = vpop.f32.mrf.mxu1  ;;  %v1679_v57 = vpop.f32.mrf.mxu0 }
 0x1dc   : > { %v1022_v36 = vadd.f32 %v1021_v40, %v4361_v39  ;;  %v4836_v39 = vshrl.u32 %v4381_v34, 16  ;;  %v4839_v34 = vld [vmem:[#allocation6_spill] sm:$0xff] }
 0x1dd   : > { %v1608_v7 = vadd.f32 %v1607_v25, %v1088_v35  ;;  %v1323_v56 = vshll.u32 %v4839_v34, 16  ;;  %v4622_v25 = vld [vmem:[#allocation2 + $0x74] sm:$0xff]  ;;  %v4626_v40 = vld [vmem:[#allocation2 + $0x68] sm:$0xff]  }
 0x1de   : > { %1727 = vmatmul.bf16.gmra.mxu1 %v4440_v2  ;;  %2514 = vmatmul.bf16.gmra.mxu0 %v4598_v50  ;;  %v2094_v11 = vor.u32 %v2082_v47, %v4836_v39  ;;  %v1320_v47 = vshrl.u32 %v4839_v34, 16 }
 0x1df   : > { %2376 = vmatmul.bf16.gmra.mxu2 %v4547_v52  ;;  %2445 = vmatmul.bf16.gmra.mxu3 %v2083_v20  ;;  %v4604_v62 = vadd.f32 %v1676_v3, %v1608_v7  ;;  %v1308_v52 = vor.u32 %v1307_v60, %v1304_v0  ;;  %v2112_v0 = vshll.u32 %v4626_v40, 16 }
 0x1e0   : > { %v2099_v30 = vsel %vm1931_vm7, %v2094_v11, %v2098_v23  ;;  %v1322_v7 = vrot.slane %v1320_v47, 3 }
 0x1e1   : > { %v1309_v27 = vsel %vm1095_vm6, %v4838_v29, %v1308_v52  ;;  %v2114_v11 = vrot.slane %v2112_v0, 1 }
 0x1e2   : > { %v1090_v17 = vpop.f32.mrf.mxu2  ;;  %v1610_v51 = vpop.f32.mrf.mxu3 }
 0x1e3   : > { %v1091_v32 = vadd.f32 %v1090_v17, %v1022_v36  ;;  %v1023_v31 = vpop.f32.mrf.mxu1  ;;  %v1681_v2 = vpop.f32.mrf.mxu0  ;;  %v2116_v36 = vshrl.u32 %v3635_v54, 16  ;;  %v2120_v17 = vshll.u32 %v4622_v25, 16 }
 0x1e4   : > { %v1024_v3 = vadd.f32 %v1023_v31, %v4837_v53 }
 0x1e5   : > { %v1611_v8 = vadd.f32 %v1610_v51, %v1091_v32  ;;  %v2108_v51 = vshrl.u32 %v3592_v1, 16  ;;  %v4840_v32 = vld [vmem:[#allocation4_spill] sm:$0xff]  ;;  %v2118_v16 = vor.u32 %v2116_v36, %v2106_v63  ;;  %v2132_v36 = vshrl.u32 %v4622_v25, 16 }
 0x1e7   : > { %v4609_v19 = vadd.f32 %v1679_v57, %v1611_v8  ;;  %v2122_v8 = vrot.slane %v2120_v17, 1  ;;  %v2110_v39 = vor.u32 %v2108_v51, %v2098_v23  ;;  %v4841_v23 = vld [vmem:[#allocation5_spill] sm:$0xff] }
 0x1e9   : > { %v2115_v63 = vsel %vm1931_vm7, %v2110_v39, %v2114_v11 }
 0x1ea   : > { %v1092_v37 = vpop.f32.mrf.mxu2  ;;  %v1612_v15 = vpop.f32.mrf.mxu3 }
 0x1eb   : > { %v1093_v22 = vadd.f32 %v1092_v37, %v1024_v3  ;;  %v1693_v46 = vpop.f32.mrf.mxu1  ;;  %v2480_v18 = vpop.f32.mrf.mxu0  ;;  %v4644_v3 = vld [vmem:[%s4789_s3] ss:$0 sm:$0xff] }
 0x1ec   : > { %v1694_v31 = vadd.f32 %v1693_v46, %v4840_v32 }
 0x1ed   : > { %v1613_v59 = vadd.f32 %v1612_v15, %v1093_v22 }
 0x1ee   : > { %1732 = vmatmul.bf16.gmra.mxu1 %v1309_v27  ;;  %2519 = vmatmul.bf16.gmra.mxu0 %v2107_v49  ;;  %v4842_v49 = vld [vmem:[#allocation7_spill] sm:$0xff] }
 0x1ef   : > { %2381 = vmatmul.bf16.gmra.mxu2 %v4564_v43  ;;  %2450 = vmatmul.bf16.gmra.mxu3 %v2099_v30  ;;  %v4624_v35 = vadd.f32 %v1681_v2, %v1613_v59  ;;  %v1325_v43 = vrot.slane %v1323_v56, 4  ;;  %v1338_v30 = vshrl.u32 %v4842_v49, 16  ;;  %v1341_v59 = vshll.u32 %v4842_v49, 16  ;;  %v1777_v49 = vld [vmem:[#allocation2 + $0x6c] sm:$0x1] }
 0x1f1   : > { %v1326_v5 = vor.u32 %v1325_v43, %v1322_v7 }
 0x1f2   : > { %v2342_v57 = vpop.f32.mrf.mxu2  ;;  %v2411_v20 = vpop.f32.mrf.mxu3 }
 0x1f3   : > { %v2412_v10 = vadd.f32 %v2411_v20, %v2342_v57  ;;  %v1695_v26 = vpop.f32.mrf.mxu1  ;;  %v2482_v6 = vpop.f32.mrf.mxu0  ;;  %v1327_v46 = vsel %vm1095_vm6, %v1308_v52, %v1326_v5  ;;  %v4654_v52 = vld [vmem:[#allocation2 + $0x7c] sm:$0xff] }
 0x1f4   : > { %v1696_v29 = vadd.f32 %v1695_v26, %v4841_v23  ;;  %v1340_v26 = vrot.slane %v1338_v30, 3  ;;  %v2130_v23 = vrot.slane %v1323_v56, 1 }
 0x1f5   : > { %v2481_v2 = vadd.f32 %v2480_v18, %v2412_v10  ;;  %v2123_v18 = vsel %vm1931_vm7, %v2118_v16, %v2122_v8  ;;  %v4843_v16 = vld [vmem:[#allocation8_spill] sm:$0xff] }
 0x1f7   : > { %v2540_v60 = vadd.f32 %v2481_v2, %v1694_v31  ;;  %v2136_v2 = vshll.u32 %v4654_v52, 16 }
 0x1f9   : > { %v2568_v1 = vmul.f32 %v4638_v61, %v2540_v60 }
 0x1fa   : > { %v2344_v54 = vpop.f32.mrf.mxu2  ;;  %v2413_v53 = vpop.f32.mrf.mxu3 }
 0x1fb   : > { %v2414_v37 = vadd.f32 %v2413_v53, %v2344_v54  ;;  %v1698_v15 = vpop.f32.mrf.mxu1  ;;  %v2485_v22 = vpop.f32.mrf.mxu0  ;;  %v2596_v57 = vadd.f32 %v4644_v3, %v2568_v1  ;;  %v2134_v1 = vor.u32 %v2132_v36, %v2122_v8 }
 0x1fc   : > { %v1699_v39 = vadd.f32 %v1698_v15, %v4843_v16  ;;  %v1781_v15 = vld [vmem:[#allocation2 + $0x78] sm:$0x1] }
 0x1fd   : > { %v2483_v27 = vadd.f32 %v2482_v6, %v2414_v37  ;;  %v1343_v6 = vrot.slane %v1341_v59, 4  ;;  %v2620_v17 = vmax.f32 %v2596_v57, 0.0  ;;  %v1856_v36 = vunpack.c.l.b16 %v1781_v15 }
 0x1fe   : > { %1737 = vmatmul.bf16.gmra.mxu1 %v1327_v46  ;;  %2524 = vmatmul.bf16.gmra.mxu0 %v2123_v18  ;;  %v2138_v18 = vrot.slane %v2136_v2, 1 }
 0x1ff   : > { %v2541_v20 = vadd.f32 %v2483_v27, %v1696_v29  ;;  %2386 = vmatmul.bf16.gmra.mxu2 %v4581_v58  ;;  %2455 = vmatmul.bf16.gmra.mxu3 %v2115_v63  ;;  %v2124_v58 = vshrl.u32 %v4626_v40, 16  ;;  %v4662_v53 = vor.u32 %v1343_v6, %v1340_v26  ;;  %v2669_v37 = vrot.slane %v2620_v17, 2  ;;  %v1785_v29 = vld [vmem:[#allocation2 + $0x84] sm:$0x1] }
 0x200   : > { %v1835_v6 = vunpack.c.l.b16 %v1777_v49 }
 0x201   : > { %v2569_v7 = vmul.f32 %v4638_v61, %v2541_v20  ;;  %v2126_v63 = vor.u32 %v2124_v58, %v2114_v11  ;;  %v1345_v57 = vsel %vm1095_vm6, %v1326_v5, %v4662_v53 }
 0x202   : > { %v2347_v10 = vpop.f32.mrf.mxu2  ;;  %v2416_v43 = vpop.f32.mrf.mxu3 }
 0x203   : > { %v2597_v51 = vadd.f32 %v4644_v3, %v2569_v7  ;;  %v2417_v0 = vadd.f32 %v2416_v43, %v2347_v10  ;;  %v1700_v32 = vpop.f32.mrf.mxu1  ;;  %v2487_v31 = vpop.f32.mrf.mxu0  ;;  %v2139_v10 = vsel %vm1931_vm7, %v2134_v1, %v2138_v18  ;;  %v1877_v43 = vunpack.c.l.b16 %v1785_v29 }
 0x204   : > { %v2131_v26 = vsel %vm1931_vm7, %v2126_v63, %v2130_v23  ;;  %v1869_v1 = vpack.c.b16 %v1856_v36, %v1856_v36  ;;  %v2147_v36 = vor.u32 %v2130_v23, %v1320_v47 }
 0x205   : > { %v2621_v60 = vmax.f32 %v2597_v51, 0.0  ;;  %v2486_v54 = vadd.f32 %v2485_v22, %v2417_v0  ;;  %v4844_v22 = vld [vmem:[#allocation11_spill] sm:$0xff]  ;;  %v4845_v51 = vld [vmem:[#allocation10_spill] sm:$0xff] }
 0x206   : > { %v615_v30 = vpack.c.b16 %v4844_v22, %v4844_v22  ;;  %v1701_v0 = vadd.f32 %v1700_v32, %v4845_v51 }
 0x207   : > { %v2670_v25 = vrot.slane %v2621_v60, 2  ;;  %v2542_v46 = vadd.f32 %v2486_v54, %v1699_v39  ;;  %v1881_v39 = vpack.c.b16 %v1877_v43, %v1877_v43  ;;  %v1848_v54 = vpack.c.b16 %v1835_v6, %v1835_v6 }
 0x208   : > { %v1365_v58 = vshrl.u32 %v615_v30, 16  ;;  %v1368_v5 = vshll.u32 %v615_v30, 16  ;;  %v2153_v30 = vshrl.u32 %v4654_v52, 16 }
 0x209   : > { %v2671_v27 = vsel %vm2668_vm8, %v2669_v37, %v2670_v25  ;;  %v2570_v40 = vmul.f32 %v4638_v61, %v2542_v46 }
 0x20a   : > { %v2349_v59 = vpop.f32.mrf.mxu2  ;;  %v2418_v8 = vpop.f32.mrf.mxu3  ;;  %v1367_v32 = vrot.slane %v1365_v58, 3  ;;  %v2155_v43 = vor.u32 %v2153_v30, %v2138_v18 }
 0x20b   : > { %v2598_v11 = vadd.f32 %v4644_v3, %v2570_v40  ;;  %v2419_v20 = vadd.f32 %v2418_v8, %v2349_v59  ;;  %v1703_v7 = vpop.f32.mrf.mxu1  ;;  %v2490_v56 = vpop.f32.mrf.mxu0  ;;  %v2141_v59 = vshll.u32 %v1848_v54, 16  ;;  %v2149_v8 = vshll.u32 %v1869_v1, 16 }
 0x20d   : > { %v2622_v17 = vmax.f32 %v2598_v11, 0.0  ;;  %v2488_v2 = vadd.f32 %v2487_v31, %v2419_v20  ;;  %v1370_v31 = vrot.slane %v1368_v5, 4  ;;  %v2143_v6 = vrot.slane %v2141_v59, 1 }
 0x20e   : > { %1742 = vmatmul.bf16.gmra.mxu1 %v1345_v57  ;;  %2529 = vmatmul.bf16.gmra.mxu0 %v2139_v10  ;;  %v4846_v57 = vld [vmem:[#allocation12_spill] sm:$0xff] }
 0x20f   : > { %v2672_v60 = vrot.slane %v2622_v17, 2  ;;  %v2543_v16 = vadd.f32 %v2488_v2, %v1701_v0  ;;  %2391 = vmatmul.bf16.gmra.mxu2 %v4598_v50  ;;  %2460 = vmatmul.bf16.gmra.mxu3 %v2131_v26  ;;  %v2157_v50 = vshll.u32 %v1881_v39, 16  ;;  %v1704_v11 = vadd.f32 %v1703_v7, %v4846_v57 }
 0x210   : > { %v2151_v17 = vrot.slane %v2149_v8, 1  ;;  %v2144_v34 = vsel %vm1931_vm7, %v4607_v21, %v2143_v6 }
 0x211   : > { %v2673_v37 = vsel %vm2668_vm8, %v2670_v25, %v2672_v60  ;;  %v2571_v40 = vmul.f32 %v4638_v61, %v2543_v16  ;;  %v1371_v25 = vor.u32 %v1370_v31, %v1367_v32  ;;  %v2159_v26 = vrot.slane %v2157_v50, 1  ;;  %v4847_v16 = vld [vmem:[#allocation13_spill] sm:$0xff] }
 0x212   : > { %v3484_v46 = vpack.c.bf16 %v2673_v37, %v2671_v27  ;;  %v2352_v63 = vpop.f32.mrf.mxu2  ;;  %v2421_v29 = vpop.f32.mrf.mxu3  ;;  %v2152_v47 = vsel %vm1931_vm7, %v2147_v36, %v2151_v17 }
 0x213   : > { %v2422_v49 = vadd.f32 %v2421_v29, %v2352_v63  ;;  %v1705_v15 = vpop.f32.mrf.mxu1  ;;  %v2492_v22 = vpop.f32.mrf.mxu0  ;;  %v2599_v27 = vadd.f32 %v4644_v3, %v2571_v40  ;;  %v1372_v2 = vsel %vm1095_vm6, %v4662_v53, %v1371_v25  ;;  %v2160_v18 = vsel %vm1931_vm7, %v2155_v43, %v2159_v26 }
 0x214   : > { %3485 = vst [vmem:[%s3894_s8] sm:$0xff] %v3484_v46   ;;  %v1706_v39 = vadd.f32 %v1705_v15, %v4847_v16 }
 0x215   : > { %v2491_v20 = vadd.f32 %v2490_v56, %v2422_v49  ;;  %v2623_v7 = vmax.f32 %v2599_v27, 0.0 }
 0x217   : > { %v2544_v10 = vadd.f32 %v2491_v20, %v1704_v11  ;;  %v2674_v53 = vrot.slane %v2623_v7, 2 }
 0x219   : > { %v2572_v52 = vmul.f32 %v4638_v61, %v2544_v10 }
 0x21a   : > { %v2354_v51 = vpop.f32.mrf.mxu2  ;;  %v2423_v0 = vpop.f32.mrf.mxu3 }
 0x21b   : > { %v2600_v56 = vadd.f32 %v4644_v3, %v2572_v52  ;;  %v2424_v58 = vadd.f32 %v2423_v0, %v2354_v51  ;;  %v1708_v5 = vpop.f32.mrf.mxu1  ;;  %v2495_v60 = vpop.f32.mrf.mxu0 }
 0x21d   : > { %v2624_v23 = vmax.f32 %v2600_v56, 0.0  ;;  %v2493_v54 = vadd.f32 %v2492_v22, %v2424_v58  ;;  %v1709_v22 = vadd.f32 %v1708_v5, %v4476_v28 }
 0x21e   : > { %1747 = vmatmul.bf16.gmra.mxu1 %v1372_v2  ;;  %2534 = vmatmul.bf16.gmra.mxu0 %v2160_v18 }
 0x21f   : > { %v2675_v1 = vrot.slane %v2624_v23, 2  ;;  %v2545_v37 = vadd.f32 %v2493_v54, %v1706_v39  ;;  %2396 = vmatmul.bf16.gmra.mxu2 %v2144_v34  ;;  %2465 = vmatmul.bf16.gmra.mxu3 %v2152_v47 }
 0x221   : > { %v2676_v46 = vsel %vm2668_vm8, %v2674_v53, %v2675_v1  ;;  %v2573_v63 = vmul.f32 %v4638_v61, %v2545_v37 }
 0x222   : > { %v2357_v29 = vpop.f32.mrf.mxu2  ;;  %v2426_v32 = vpop.f32.mrf.mxu3 }
 0x223   : > { %v2601_v21 = vadd.f32 %v4644_v3, %v2573_v63  ;;  %v2427_v31 = vadd.f32 %v2426_v32, %v2357_v29  ;;  %v1710_v40 = vpop.f32.mrf.mxu1  ;;  %v2497_v49 = vpop.f32.mrf.mxu0 }
 0x224   : > { %v1711_v26 = vadd.f32 %v1710_v40, %v4487_v24 }
 0x225   : > { %v2625_v15 = vmax.f32 %v2601_v21, 0.0  ;;  %v2496_v30 = vadd.f32 %v2495_v60, %v2427_v31 }
 0x227   : > { %v2677_v50 = vrot.slane %v2625_v15, 2  ;;  %v2546_v59 = vadd.f32 %v2496_v30, %v1709_v22 }
 0x229   : > { %v2678_v8 = vsel %vm2668_vm8, %v2675_v1, %v2677_v50  ;;  %v2574_v25 = vmul.f32 %v4638_v61, %v2546_v59 }
 0x22a   : > { %v3489_v57 = vpack.c.bf16 %v2678_v8, %v2676_v46  ;;  %v2359_v11 = vpop.f32.mrf.mxu2  ;;  %v2428_v20 = vpop.f32.mrf.mxu3 }
 0x22b   : > { %v2429_v27 = vadd.f32 %v2428_v20, %v2359_v11  ;;  %v1713_v10 = vpop.f32.mrf.mxu1  ;;  %v2500_v43 = vpop.f32.mrf.mxu0  ;;  %v2602_v36 = vadd.f32 %v4644_v3, %v2574_v25 }
 0x22c   : > { %3605 = vst [vmem:[%s3894_s8 + $0x8] sm:$0xff] %v3489_v57   ;;  %v1714_v60 = vadd.f32 %v1713_v10, %v4493_v44 }
 0x22d   : > { %v2498_v6 = vadd.f32 %v2497_v49, %v2429_v27  ;;  %v2626_v0 = vmax.f32 %v2602_v36, 0.0 }
 0x22f   : > { %v2547_v28 = vadd.f32 %v2498_v6, %v1711_v26  ;;  %v2679_v34 = vrot.slane %v2626_v0, 2 }
 0x231   : > { %v2575_v17 = vmul.f32 %v4638_v61, %v2547_v28 }
 0x232   : > { %v2362_v52 = vpop.f32.mrf.mxu2  ;;  %v2431_v51 = vpop.f32.mrf.mxu3 }
 0x233   : > { %v2603_v2 = vadd.f32 %v4644_v3, %v2575_v17  ;;  %v2432_v7 = vadd.f32 %v2431_v51, %v2362_v52  ;;  %v1715_v56 = vpop.f32.mrf.mxu1  ;;  %v2502_v58 = vpop.f32.mrf.mxu0 }
 0x234   : > { %v1716_v29 = vadd.f32 %v1715_v56, %v4503_v48 }
 0x235   : > { %v2627_v5 = vmax.f32 %v2603_v2, 0.0  ;;  %v2501_v18 = vadd.f32 %v2500_v43, %v2432_v7 }
 0x237   : > { %v2680_v24 = vrot.slane %v2627_v5, 2  ;;  %v2548_v47 = vadd.f32 %v2501_v18, %v1714_v60 }
 0x239   : > { %v2681_v23 = vsel %vm2668_vm8, %v2679_v34, %v2680_v24  ;;  %v2576_v16 = vmul.f32 %v4638_v61, %v2548_v47 }
 0x23a   : > { %v2364_v39 = vpop.f32.mrf.mxu2  ;;  %v2433_v54 = vpop.f32.mrf.mxu3 }
 0x23b   : > { %v2604_v53 = vadd.f32 %v4644_v3, %v2576_v16  ;;  %v2434_v1 = vadd.f32 %v2433_v54, %v2364_v39  ;;  %v1718_v37 = vpop.f32.mrf.mxu1  ;;  %v2505_v46 = vpop.f32.mrf.mxu0 }
 0x23c   : > { %v1719_v8 = vadd.f32 %v1718_v37, %v4506_v45 }
 0x23d   : > { %v2628_v63 = vmax.f32 %v2604_v53, 0.0  ;;  %v2503_v44 = vadd.f32 %v2502_v58, %v2434_v1 }
 0x23f   : > { %v2682_v32 = vrot.slane %v2628_v63, 2  ;;  %v2549_v21 = vadd.f32 %v2503_v44, %v1716_v29 }
 0x241   : > { %v2683_v31 = vsel %vm2668_vm8, %v2680_v24, %v2682_v32  ;;  %v2577_v22 = vmul.f32 %v4638_v61, %v2549_v21 }
 0x242   : > { %v3494_v40 = vpack.c.bf16 %v2683_v31, %v2681_v23  ;;  %v2367_v49 = vpop.f32.mrf.mxu2  ;;  %v2436_v15 = vpop.f32.mrf.mxu3 }
 0x243   : > { %v2437_v30 = vadd.f32 %v2436_v15, %v2367_v49  ;;  %v1720_v50 = vpop.f32.mrf.mxu1  ;;  %v2507_v59 = vpop.f32.mrf.mxu0  ;;  %v2605_v11 = vadd.f32 %v4644_v3, %v2577_v22 }
 0x244   : > { %3606 = vst [vmem:[%s3894_s8 + $0x10] sm:$0xff] %v3494_v40   ;;  %v1721_v17 = vadd.f32 %v1720_v50, %v4519_v33 }
 0x245   : > { %v2506_v57 = vadd.f32 %v2505_v46, %v2437_v30  ;;  %v2629_v10 = vmax.f32 %v2605_v11, 0.0 }
 0x247   : > { %v2550_v48 = vadd.f32 %v2506_v57, %v1719_v8  ;;  %v2684_v51 = vrot.slane %v2629_v10, 2 }
 0x249   : > { %v2578_v20 = vmul.f32 %v4638_v61, %v2550_v48 }
 0x24a   : > { %v2369_v25 = vpop.f32.mrf.mxu2  ;;  %v2438_v27 = vpop.f32.mrf.mxu3 }
 0x24b   : > { %v2606_v43 = vadd.f32 %v4644_v3, %v2578_v20  ;;  %v2439_v26 = vadd.f32 %v2438_v27, %v2369_v25  ;;  %v1723_v6 = vpop.f32.mrf.mxu1  ;;  %v2510_v36 = vpop.f32.mrf.mxu0 }
 0x24c   : > { %v1724_v47 = vadd.f32 %v1723_v6, %v4522_v14 }
 0x24d   : > { %v2630_v28 = vmax.f32 %v2606_v43, 0.0  ;;  %v2508_v52 = vadd.f32 %v2507_v59, %v2439_v26 }
 0x24f   : > { %v2685_v45 = vrot.slane %v2630_v28, 2  ;;  %v2551_v0 = vadd.f32 %v2508_v52, %v1721_v17 }
 0x251   : > { %v2686_v2 = vsel %vm2668_vm8, %v2684_v51, %v2685_v45  ;;  %v2579_v7 = vmul.f32 %v4638_v61, %v2551_v0 }
 0x252   : > { %v2372_v56 = vpop.f32.mrf.mxu2  ;;  %v2441_v58 = vpop.f32.mrf.mxu3 }
 0x253   : > { %v2607_v5 = vadd.f32 %v4644_v3, %v2579_v7  ;;  %v2442_v60 = vadd.f32 %v2441_v58, %v2372_v56  ;;  %v1725_v18 = vpop.f32.mrf.mxu1  ;;  %v2512_v34 = vpop.f32.mrf.mxu0 }
 0x254   : > { %v1726_v44 = vadd.f32 %v1725_v18, %v4536_v41 }
 0x255   : > { %v2631_v24 = vmax.f32 %v2607_v5, 0.0  ;;  %v2511_v33 = vadd.f32 %v2510_v36, %v2442_v60 }
 0x257   : > { %v2687_v23 = vrot.slane %v2631_v24, 2  ;;  %v2552_v16 = vadd.f32 %v2511_v33, %v1724_v47 }
 0x259   : > { %v2688_v39 = vsel %vm2668_vm8, %v2685_v45, %v2687_v23  ;;  %v2580_v37 = vmul.f32 %v4638_v61, %v2552_v16 }
 0x25a   : > { %v3499_v54 = vpack.c.bf16 %v2688_v39, %v2686_v2  ;;  %v2374_v53 = vpop.f32.mrf.mxu2  ;;  %v2443_v1 = vpop.f32.mrf.mxu3 }
 0x25b   : > { %v2444_v46 = vadd.f32 %v2443_v1, %v2374_v53  ;;  %v1728_v63 = vpop.f32.mrf.mxu1  ;;  %v2515_v29 = vpop.f32.mrf.mxu0  ;;  %v2608_v21 = vadd.f32 %v4644_v3, %v2580_v37 }
 0x25c   : > { %3607 = vst [vmem:[%s3894_s8 + $0x18] sm:$0xff] %v3499_v54   ;;  %v1729_v57 = vadd.f32 %v1728_v63, %v4539_v13 }
 0x25d   : > { %v2513_v32 = vadd.f32 %v2512_v34, %v2444_v46  ;;  %v2632_v15 = vmax.f32 %v2608_v21, 0.0 }
 0x25f   : > { %v2553_v14 = vadd.f32 %v2513_v32, %v1726_v44  ;;  %v2689_v48 = vrot.slane %v2632_v15, 2 }
 0x261   : > { %v2581_v31 = vmul.f32 %v4638_v61, %v2553_v14 }
 0x262   : > { %v2377_v40 = vpop.f32.mrf.mxu2  ;;  %v2446_v49 = vpop.f32.mrf.mxu3 }
 0x263   : > { %v2609_v22 = vadd.f32 %v4644_v3, %v2581_v31  ;;  %v2447_v30 = vadd.f32 %v2446_v49, %v2377_v40  ;;  %v1730_v50 = vpop.f32.mrf.mxu1  ;;  %v2517_v59 = vpop.f32.mrf.mxu0 }
 0x264   : > { %v1731_v52 = vadd.f32 %v1730_v50, %v4553_v38 }
 0x265   : > { %v2633_v8 = vmax.f32 %v2609_v22, 0.0  ;;  %v2516_v11 = vadd.f32 %v2515_v29, %v2447_v30 }
 0x267   : > { %v2690_v41 = vrot.slane %v2633_v8, 2  ;;  %v2554_v20 = vadd.f32 %v2516_v11, %v1729_v57 }
 0x269   : > { %v2691_v25 = vsel %vm2668_vm8, %v2689_v48, %v2690_v41  ;;  %v2582_v27 = vmul.f32 %v4638_v61, %v2554_v20 }
 0x26a   : > { %v2379_v10 = vpop.f32.mrf.mxu2  ;;  %v2448_v43 = vpop.f32.mrf.mxu3 }
 0x26b   : > { %v2610_v26 = vadd.f32 %v4644_v3, %v2582_v27  ;;  %v2449_v6 = vadd.f32 %v2448_v43, %v2379_v10  ;;  %v1733_v36 = vpop.f32.mrf.mxu1  ;;  %v2520_v28 = vpop.f32.mrf.mxu0 }
 0x26c   : > { %v1734_v34 = vadd.f32 %v1733_v36, %v4556_v55 }
 0x26d   : > { %v2634_v17 = vmax.f32 %v2610_v26, 0.0  ;;  %v2518_v13 = vadd.f32 %v2517_v59, %v2449_v6 }
 0x26f   : > { %v2692_v51 = vrot.slane %v2634_v17, 2  ;;  %v2555_v45 = vadd.f32 %v2518_v13, %v1731_v52 }
 0x271   : > { %v2693_v0 = vsel %vm2668_vm8, %v2690_v41, %v2692_v51  ;;  %v2583_v58 = vmul.f32 %v4638_v61, %v2555_v45 }
 0x272   : > { %v3504_v2 = vpack.c.bf16 %v2693_v0, %v2691_v25  ;;  %v2382_v7 = vpop.f32.mrf.mxu2  ;;  %v2451_v56 = vpop.f32.mrf.mxu3 }
 0x273   : > { %v2452_v5 = vadd.f32 %v2451_v56, %v2382_v7  ;;  %v1735_v60 = vpop.f32.mrf.mxu1  ;;  %v2522_v18 = vpop.f32.mrf.mxu0  ;;  %v2611_v47 = vadd.f32 %v4644_v3, %v2583_v58 }
 0x274   : > { %3608 = vst [vmem:[%s3894_s8 + $0x20] sm:$0xff] %v3504_v2   ;;  %v1736_v63 = vadd.f32 %v1735_v60, %v4570_v4 }
 0x275   : > { %v2521_v24 = vadd.f32 %v2520_v28, %v2452_v5  ;;  %v2635_v39 = vmax.f32 %v2611_v47, 0.0 }
 0x277   : > { %v2556_v38 = vadd.f32 %v2521_v24, %v1734_v34  ;;  %v2694_v44 = vrot.slane %v2635_v39, 2 }
 0x279   : > { %v2584_v33 = vmul.f32 %v4638_v61, %v2556_v38 }
 0x27a   : > { %v2384_v23 = vpop.f32.mrf.mxu2  ;;  %v2453_v16 = vpop.f32.mrf.mxu3 }
 0x27b   : > { %v2612_v54 = vadd.f32 %v4644_v3, %v2584_v33  ;;  %v2454_v53 = vadd.f32 %v2453_v16, %v2384_v23  ;;  %v1738_v1 = vpop.f32.mrf.mxu1  ;;  %v2525_v37 = vpop.f32.mrf.mxu0 }
 0x27c   : > { %v1739_v59 = vadd.f32 %v1738_v1, %v4573_v12 }
 0x27d   : > { %v2636_v46 = vmax.f32 %v2612_v54, 0.0  ;;  %v2523_v29 = vadd.f32 %v2522_v18, %v2454_v53 }
 0x27f   : > { %v2695_v55 = vrot.slane %v2636_v46, 2  ;;  %v2557_v32 = vadd.f32 %v2523_v29, %v1736_v63 }
 0x281   : > { %v2696_v21 = vsel %vm2668_vm8, %v2694_v44, %v2695_v55  ;;  %v2585_v14 = vmul.f32 %v4638_v61, %v2557_v32 }
 0x282   : > { %v2387_v31 = vpop.f32.mrf.mxu2  ;;  %v2456_v40 = vpop.f32.mrf.mxu3 }
 0x283   : > { %v2613_v49 = vadd.f32 %v4644_v3, %v2585_v14  ;;  %v2457_v15 = vadd.f32 %v2456_v40, %v2387_v31  ;;  %v1740_v22 = vpop.f32.mrf.mxu1  ;;  %v2527_v30 = vpop.f32.mrf.mxu0 }
 0x284   : > { %v1741_v43 = vadd.f32 %v1740_v22, %v4587_v42 }
 0x285   : > { %v2637_v50 = vmax.f32 %v2613_v49, 0.0  ;;  %v2526_v4 = vadd.f32 %v2525_v37, %v2457_v15 }
 0x287   : > { %v2697_v8 = vrot.slane %v2637_v50, 2  ;;  %v2558_v57 = vadd.f32 %v2526_v4, %v1739_v59 }
 0x289   : > { %v2698_v11 = vsel %vm2668_vm8, %v2695_v55, %v2697_v8  ;;  %v2586_v25 = vmul.f32 %v4638_v61, %v2558_v57 }
 0x28a   : > { %v3509_v48 = vpack.c.bf16 %v2698_v11, %v2696_v21  ;;  %v2389_v41 = vpop.f32.mrf.mxu2  ;;  %v2458_v20 = vpop.f32.mrf.mxu3 }
 0x28b   : > { %v2459_v27 = vadd.f32 %v2458_v20, %v2389_v41  ;;  %v1743_v10 = vpop.f32.mrf.mxu1  ;;  %v2530_v6 = vpop.f32.mrf.mxu0  ;;  %v2614_v36 = vadd.f32 %v4644_v3, %v2586_v25 }
 0x28c   : > { %3609 = vst [vmem:[%s3894_s8 + $0x28] sm:$0xff] %v3509_v48   ;;  %v1744_v2 = vadd.f32 %v1743_v10, %v4590_v9 }
 0x28d   : > { %v2528_v26 = vadd.f32 %v2527_v30, %v2459_v27  ;;  %v2638_v13 = vmax.f32 %v2614_v36, 0.0 }
 0x28f   : > { %v2559_v12 = vadd.f32 %v2528_v26, %v1741_v43  ;;  %v2699_v58 = vrot.slane %v2638_v13, 2 }
 0x291   : > { %v2587_v28 = vmul.f32 %v4638_v61, %v2559_v12 }
 0x292   : > { %v2392_v17 = vpop.f32.mrf.mxu2  ;;  %v2461_v52 = vpop.f32.mrf.mxu3 }
 0x293   : > { %v2615_v51 = vadd.f32 %v4644_v3, %v2587_v28  ;;  %v2462_v45 = vadd.f32 %v2461_v52, %v2392_v17  ;;  %v1745_v56 = vpop.f32.mrf.mxu1  ;;  %v2532_v60 = vpop.f32.mrf.mxu0 }
 0x294   : > { %v1746_v16 = vadd.f32 %v1745_v56, %v4604_v62 }
 0x295   : > { %v2639_v0 = vmax.f32 %v2615_v51, 0.0  ;;  %v2531_v7 = vadd.f32 %v2530_v6, %v2462_v45 }
 0x297   : > { %v2700_v42 = vrot.slane %v2639_v0, 2  ;;  %v2560_v5 = vadd.f32 %v2531_v7, %v1744_v2 }
 0x299   : > { %v2701_v18 = vsel %vm2668_vm8, %v2699_v58, %v2700_v42  ;;  %v2588_v34 = vmul.f32 %v4638_v61, %v2560_v5 }
 0x29a   : > { %v2394_v24 = vpop.f32.mrf.mxu2  ;;  %v2463_v47 = vpop.f32.mrf.mxu3 }
 0x29b   : > { %v2616_v38 = vadd.f32 %v4644_v3, %v2588_v34  ;;  %v2464_v33 = vadd.f32 %v2463_v47, %v2394_v24  ;;  %v1748_v53 = vpop.f32.mrf.mxu1  ;;  %v2535_v37 = vpop.f32.mrf.mxu0 }
 0x29c   : > { %v1749_v32 = vadd.f32 %v1748_v53, %v4609_v19 }
 0x29d   : > { %v2640_v23 = vmax.f32 %v2616_v38, 0.0  ;;  %v2533_v9 = vadd.f32 %v2532_v60, %v2464_v33 }
 0x29f   : > { %v2702_v39 = vrot.slane %v2640_v23, 2  ;;  %v2561_v54 = vadd.f32 %v2533_v9, %v1746_v16 }
 0x2a1   : > { %v2703_v1 = vsel %vm2668_vm8, %v2700_v42, %v2702_v39  ;;  %v2589_v44 = vmul.f32 %v4638_v61, %v2561_v54 }
 0x2a2   : > { %v3514_v46 = vpack.c.bf16 %v2703_v1, %v2701_v18  ;;  %v2397_v63 = vpop.f32.mrf.mxu2  ;;  %v2466_v29 = vpop.f32.mrf.mxu3 }
 0x2a3   : > { %v2467_v55 = vadd.f32 %v2466_v29, %v2397_v63  ;;  %v2617_v14 = vadd.f32 %v4644_v3, %v2589_v44  ;;  %v1750_v40 = vpop.f32.mrf.mxu1  ;;  %v2537_v59 = vpop.f32.mrf.mxu0 }
 0x2a4   : > { %3610 = vst [vmem:[%s3894_s8 + $0x30] sm:$0xff] %v3514_v46   ;;  %v1751_v8 = vadd.f32 %v1750_v40, %v4624_v35 }
 0x2a5   : > { %v2536_v21 = vadd.f32 %v2535_v37, %v2467_v55  ;;  %v2641_v22 = vmax.f32 %v2617_v14, 0.0 }
 0x2a7   : > { %v2562_v62 = vadd.f32 %v2536_v21, %v1749_v32  ;;  %v2704_v19 = vrot.slane %v2641_v22, 2 }
 0x2a9   : > { %v2590_v31 = vmul.f32 %v4638_v61, %v2562_v62 }
 0x2aa   : > { %v2399_v49 = vpop.f32.mrf.mxu2  ;;  %v2468_v15 = vpop.f32.mrf.mxu3 }
 0x2ab   : > { %v2618_v30 = vadd.f32 %v4644_v3, %v2590_v31  ;;  %v2469_v50 = vadd.f32 %v2468_v15, %v2399_v49 }
 0x2ad   : > { %v2642_v4 = vmax.f32 %v2618_v30, 0.0  ;;  %v2538_v57 = vadd.f32 %v2537_v59, %v2469_v50 }
 0x2af   : > { %v2705_v11 = vrot.slane %v2642_v4, 2  ;;  %v2563_v48 = vadd.f32 %v2538_v57, %v1751_v8 }
 0x2b1   : > { %v2706_v41 = vsel %vm2668_vm8, %v2704_v19, %v2705_v11  ;;  %v2591_v20 = vmul.f32 %v4638_v61, %v2563_v48 }
 0x2b3   : > { %v2619_v25 = vadd.f32 %v4644_v3, %v2591_v20 }
 0x2b5   : > { %v2643_v27 = vmax.f32 %v2619_v25, 0.0 }
 0x2b7   : > { %v2707_v10 = vrot.slane %v2643_v27, 2 }
 0x2b9   : > { %v2708_v43 = vsel %vm2668_vm8, %v2705_v11, %v2707_v10 }
 0x2ba   : > { %v3519_v26 = vpack.c.bf16 %v2708_v43, %v2706_v41 }
 0x2bc   : > { %3611 = vst [vmem:[%s3894_s8 + $0x38] sm:$0xff] %v3519_v26  }
 0x2bd PF: > { %s14_s19 = sadd.s32 1, %s3820_s19   ;;  %s4848_s15 = smov %s3812_s17 }
 0x2be   : > { %p11_p13 = scmp.ge.s32.totalorder %s14_s19, 6   ;;  %s4849_s16 = smov %s3816_s18 }
 0x2bf   : > { %s4850_s17 = smov %s4853_s20  ;;  %s4851_s18 = smov %s4857_s21 }
 0x2c0   :  { %13 = sbr.rel (!%p11_p13) target bundleno = 3 (0x3), region = 86 }

</bundles_post_ra>
